<compile_context>
chip_gen: v6e
topology: v6e:2x2x1
jax: 0.10.0
libtpu: 0.0.40
codegen_flags: <defaults>
</compile_context>

<pallas_src>
import jax
import jax.numpy as jnp
from jax import lax
from jax.experimental import pallas as pl
from jax.experimental.pallas import tpu as pltpu

LANE = 128


def _round_up(x, m):
    return ((x + m - 1) // m) * m


# ------------------------------ Pallas kernel -------------------------------

def make_decoder_kernel(num_layers, S, Sm, D, kp_s, kp_c, hp):
    # Column offsets into the fused x-side weight slab (all multiples of 128):
    # [ wq_s | wk_s | wv_s | wt_s | w1_s | wq_c | wk_c | wv_c | wt_c | w1_c ]
    o_qkv_s = 0                       # fused [wq_s|wk_s|wv_s], width 2*kp_s + D
    o_wt_s = 2 * kp_s + D
    o_w1_s = o_wt_s + D
    o_wq_c = o_w1_s + hp
    o_kv_c = o_wq_c + kp_c            # fused [wk_c|wv_c], width kp_c + D
    o_wt_c = o_kv_c + kp_c + D
    o_w1_c = o_wt_c + D

    def kernel(tgt_ref, mem_ref, wa_ref, wb_ref, vec_ref, out_ref):
        Bc = tgt_ref.shape[0]

        def mm(x, w_bf16):
            # MXU matmul: bf16 operands, f32 accumulation.
            return jnp.dot(x.astype(jnp.bfloat16), w_bf16,
                           preferred_element_type=jnp.float32)

        def l2n(x):
            # F.normalize(x, p=2, dim=-1): x / max(||x||, 1e-12)   (EUP rsqrt)
            ss = jnp.sum(x * x, axis=-1, keepdims=True)
            return x * lax.rsqrt(jnp.maximum(ss, 1e-24))

        def attention(x, qx, kx, vx, o_wt):
            # x:(Bc,Sq,D) f32, qx:(Bc,Sq,K) L2-normed, kx:(Bc,Sk,K) L2-normed,
            # vx:(Bc,Sk,D).  Returns relu(trans_conv(x - attn_out)) as (Bc*Sq,D).
            logits = jnp.einsum('bqk,bsk->bqs',
                                qx.astype(jnp.bfloat16), kx.astype(jnp.bfloat16),
                                preferred_element_type=jnp.float32)
            # |logits| <= 1 (normalized q/k) -> no max-shift needed (exact).
            e = jnp.exp(logits)
            aff = e * pl.reciprocal(jnp.sum(e, axis=-1, keepdims=True),
                                    approx=True)
            # PyTorch: affinity / (1e-9 + affinity.sum(dim=1, keepdim=True))
            aff = aff * pl.reciprocal(1e-9 + jnp.sum(aff, axis=1, keepdims=True),
                                      approx=True)
            out = jnp.einsum('bqs,bsd->bqd',
                             aff.astype(jnp.bfloat16), vx.astype(jnp.bfloat16),
                             preferred_element_type=jnp.float32)
            y = (x - out).reshape(-1, D)
            y = mm(y, wa_ref[:, o_wt:o_wt + D])        # trans_conv
            return jnp.maximum(y, 0.0)                 # relu

        def trans_nl(y, o_w1, o_w2, vrow):
            # TransNonlinear: linear1 -> relu -> linear2 -> residual -> LayerNorm
            # TODO(synk): dropout layers treated as identity (eval-mode forward).
            b1 = vec_ref[vrow:vrow + 1, :hp]
            b2 = vec_ref[vrow + 1:vrow + 2, :D]
            g = vec_ref[vrow + 2:vrow + 3, :D]
            be = vec_ref[vrow + 3:vrow + 4, :D]
            h = jnp.maximum(mm(y, wa_ref[:, o_w1:o_w1 + hp]) + b1, 0.0)
            s = y + mm(h, wb_ref[:, o_w2:o_w2 + D]) + b2
            mu = jnp.mean(s, axis=-1, keepdims=True)
            var = jnp.mean((s - mu) ** 2, axis=-1, keepdims=True)
            return (s - mu) * lax.rsqrt(var + 1e-5) * g + be

        def inorm_relu(x):
            # InstanceNorm1d(d_model), affine=False: normalize over the sequence
            # axis per (batch, channel); biased variance, eps=1e-5; then relu.
            mu = jnp.mean(x, axis=1, keepdims=True)
            var = jnp.mean((x - mu) ** 2, axis=1, keepdims=True)
            return jnp.maximum((x - mu) * lax.rsqrt(var + 1e-5), 0.0)

        # Cross-attn key/value projections of memory are layer-invariant:
        # compute them once, before the layer loop.
        mkv = mm(mem_ref[...].reshape(Bc * Sm, D),
                 wa_ref[:, o_kv_c:o_kv_c + kp_c + D]).reshape(Bc, Sm, kp_c + D)
        mem_k = l2n(mkv[..., :kp_c])
        mem_v = mkv[..., kp_c:]

        def layer(_, x):                               # x: (Bc, S, D) f32
            # --- self attention (query = key = value = x), fused q/k/v proj ---
            qkv = mm(x.reshape(Bc * S, D),
                     wa_ref[:, o_qkv_s:o_qkv_s + 2 * kp_s + D]
                     ).reshape(Bc, S, 2 * kp_s + D)
            qx = l2n(qkv[..., :kp_s])
            kx = l2n(qkv[..., kp_s:2 * kp_s])
            vx = qkv[..., 2 * kp_s:]
            t2 = attention(x, qx, kx, vx, o_wt_s)
            t2 = trans_nl(t2, o_w1_s, 0, 0)
            x = inorm_relu(x + t2.reshape(Bc, S, D))   # norm1 + relu

            # --- cross attention against memory ---
            qc = l2n(mm(x.reshape(Bc * S, D),
                        wa_ref[:, o_wq_c:o_wq_c + kp_c]).reshape(Bc, S, kp_c))
            m2 = attention(x, qc, mem_k, mem_v, o_wt_c)
            m2 = trans_nl(m2, o_w1_c, D, 4)
            return inorm_relu(x + m2.reshape(Bc, S, D))  # norm2 + relu

        # _get_clones shares ONE module instance -> identical params every layer.
        out = lax.fori_loop(0, num_layers, layer, tgt_ref[...], unroll=True)
        out_ref[...] = out.astype(out_ref.dtype)

    return kernel


# ------------------------------- wrapper ------------------------------------

def transformer_decoder(tgt, memory, wa, wb, vec, *, num_layers, kp_s, kp_c, hp,
                        batch_chunks=1):
    """tgt: (S, B, D), memory: (Sm, B, D) -> (S, B, D).  Single pallas_call."""
    S, B, D = tgt.shape
    Sm = memory.shape[0]
    assert B % batch_chunks == 0
    Bc = B // batch_chunks
    # One-time batch-major transpose (tiny HBM traffic at these shapes); gives
    # perfect (8,128) tiling of the (S, D) minor dims inside the kernel.
    t = jnp.transpose(tgt, (1, 0, 2))
    m = jnp.transpose(memory, (1, 0, 2))
    kernel = make_decoder_kernel(num_layers, S, Sm, D, kp_s, kp_c, hp)
    out = pl.pallas_call(
        kernel,
        grid=(batch_chunks,),                          # 1 step; 2 on v7x megacore
        in_specs=[
            pl.BlockSpec((Bc, S, D), lambda i: (i, 0, 0)),    # tgt     (B, S, D)
            pl.BlockSpec((Bc, Sm, D), lambda i: (i, 0, 0)),   # memory  (B, Sm, D)
            pl.BlockSpec(wa.shape, lambda i: (0, 0)),         # fused x-side weights
            pl.BlockSpec(wb.shape, lambda i: (0, 0)),         # fused FFN w2 slab
            pl.BlockSpec(vec.shape, lambda i: (0, 0)),        # row-vector slab
        ],
        out_specs=pl.BlockSpec((Bc, S, D), lambda i: (i, 0, 0)),
        out_shape=jax.ShapeDtypeStruct((B, S, D), jnp.float32),
        compiler_params=pltpu.CompilerParams(dimension_semantics=("parallel",)),
    )(t, m, wa, wb, vec)
    return jnp.transpose(out, (1, 0, 2))


transformer_decoder = jax.jit(
    transformer_decoder,
    static_argnames=("num_layers", "kp_s", "kp_c", "hp", "batch_chunks"))


# --------------------------- parameter construction -------------------------

def init_params(key, d_model=128, key_dim_self=64, key_dim_cross=128):
    """Raw weights mirroring the PyTorch module init; stored as (in, out) for x @ W."""
    ks = iter(jax.random.split(key, 16))

    def nrm(shape, std):
        return std * jax.random.normal(next(ks), shape, jnp.float32)

    def unif(shape, fan_in):
        b = 1.0 / float(fan_in) ** 0.5
        return jax.random.uniform(next(ks), shape, jnp.float32, -b, b)

    def block(kd):
        return dict(
            wk=nrm((d_model, kd), (2.0 / kd) ** 0.5),
            wq=nrm((d_model, kd), (2.0 / kd) ** 0.5),
            wv=nrm((d_model, d_model), (2.0 / d_model) ** 0.5),
            wt=unif((d_model, d_model), d_model),              # trans_conv
            w1=unif((d_model, kd), d_model),
            b1=unif((1, kd), d_model),
            w2=unif((kd, d_model), kd),
            b2=unif((1, d_model), kd),
            gamma=jnp.ones((1, d_model), jnp.float32),
            beta=jnp.zeros((1, d_model), jnp.float32),
        )

    return block(key_dim_self), block(key_dim_cross)


def fuse_params(self_p, cross_p):
    """Pack all weights into three VMEM slabs (bf16 matmul slabs + f32 vectors)."""
    d = self_p["wv"].shape[0]
    kp_s = _round_up(self_p["wq"].shape[1], LANE)
    kp_c = _round_up(cross_p["wq"].shape[1], LANE)
    hp = max(_round_up(self_p["w1"].shape[1], LANE),
             _round_up(cross_p["w1"].shape[1], LANE))
    vw = max(d, hp)

    def pc(w, n):   # zero-pad columns: exact (zero lanes add nothing downstream)
        return jnp.pad(w, ((0, 0), (0, n - w.shape[1])))

    def pr(w, n):   # zero-pad rows of w2: padded hidden units contribute nothing
        return jnp.pad(w, ((0, n - w.shape[0]), (0, 0)))

    # Slab A: every (D, *) projection, lane-concatenated.  bf16 MXU operand.
    wa = jnp.concatenate(
        [pc(self_p["wq"], kp_s), pc(self_p["wk"], kp_s), self_p["wv"],
         self_p["wt"], pc(self_p["w1"], hp),
         pc(cross_p["wq"], kp_c), pc(cross_p["wk"], kp_c), cross_p["wv"],
         cross_p["wt"], pc(cross_p["w1"], hp)],
        axis=1).astype(jnp.bfloat16)
    # Slab B: the two FFN w2 matrices (hidden -> D).  bf16 MXU operand.
    wb = jnp.concatenate([pr(self_p["w2"], hp), pr(cross_p["w2"], hp)],
                         axis=1).astype(jnp.bfloat16)
    # Slab C: row vectors (biases + LayerNorm affine), one (8, vw) f32 tile.
    vec = jnp.concatenate(
        [pc(self_p["b1"], vw), pc(self_p["b2"], vw),
         pc(self_p["gamma"], vw), pc(self_p["beta"], vw),
         pc(cross_p["b1"], vw), pc(cross_p["b2"], vw),
         pc(cross_p["gamma"], vw), pc(cross_p["beta"], vw)],
        axis=0).astype(jnp.float32)
    return wa, wb, vec, kp_s, kp_c, hp


# --------------------------- pure-JAX reference ------------------------------

def _ref_decoder(tgt, memory, self_p, cross_p, num_layers):
    """Exact f32 reference mirroring the PyTorch forward (seq-first layout)."""
    def l2n(x):
        n = jnp.sqrt(jnp.sum(x * x, axis=-1, keepdims=True))
        return x / jnp.maximum(n, 1e-12)

    def relation(q, kv, p):                                    # (Sq,B,D),(Sk,B,D)
        wq = l2n(q @ p["wq"])
        wk = l2n(kv @ p["wk"])
        dot = jnp.einsum("qbk,sbk->bqs", wq, wk)
        aff = jax.nn.softmax(dot, axis=-1)
        aff = aff / (1e-9 + jnp.sum(aff, axis=1, keepdims=True))
        wv = kv @ p["wv"]
        out = jnp.einsum("bqs,sbd->qbd", aff, wv)
        return jax.nn.relu((q - out) @ p["wt"])

    def trans_nl(x, p):
        h = jax.nn.relu(x @ p["w1"] + p["b1"])
        s = x + h @ p["w2"] + p["b2"]
        mu = jnp.mean(s, -1, keepdims=True)
        var = jnp.mean((s - mu) ** 2, -1, keepdims=True)
        return (s - mu) / jnp.sqrt(var + 1e-5) * p["gamma"] + p["beta"]

    def inorm_relu(x):                                         # over seq axis
        mu = jnp.mean(x, 0, keepdims=True)
        var = jnp.mean((x - mu) ** 2, 0, keepdims=True)
        return jax.nn.relu((x - mu) / jnp.sqrt(var + 1e-5))

    out = tgt
    for _ in range(num_layers):
        out = inorm_relu(out + trans_nl(relation(out, out, self_p), self_p))
        out = inorm_relu(out + trans_nl(relation(out, memory, cross_p), cross_p))
    return out


# ----------------------------------- main ------------------------------------

if __name__ == "__main__":
    key = jax.random.PRNGKey(0)
    kparam, ktgt, kmem = jax.random.split(key, 3)

    D, S, Sm, B = 128, 8, 16, 2          # d_model, #queries, #memory pixels, batch
    NUM_LAYERS = 2

    self_p, cross_p = init_params(kparam, d_model=D, key_dim_self=64,
                                  key_dim_cross=128)
    wa, wb, vec, kp_s, kp_c, hp = fuse_params(self_p, cross_p)

    tgt = jax.random.normal(ktgt, (S, B, D), jnp.float32)       # (S, B, D)
    memory = jax.random.normal(kmem, (Sm, B, D), jnp.float32)   # (Sm, B, D)

    out = transformer_decoder(tgt, memory, wa, wb, vec,
                              num_layers=NUM_LAYERS, kp_s=kp_s, kp_c=kp_c,
                              hp=hp, batch_chunks=1)
    out = jax.block_until_ready(out)
    assert out.shape == (S, B, D) and out.dtype == jnp.float32
    assert bool(jnp.all(jnp.isfinite(out)))

    # Correctness vs. exact f32 reference.  Tolerance accounts for bf16 MXU
    # operands + approx EUP reciprocals compounding over 2 layers.
    ref = _ref_decoder(tgt, memory, self_p, cross_p, NUM_LAYERS)
    err = jnp.abs(out - ref)
    tol = 1.5e-1 + 5e-2 * jnp.abs(ref)
    assert bool(jnp.all(err <= tol)), f"max abs err {float(jnp.max(err))}"

    print("KERNEL_OK")
</pallas_src>

<mosaic_0001>
module attributes {stable_mosaic.version = 11 : i64} {
  func.func @kernel(%arg0: i32, %arg1: memref<2x8x128xf32, #tpu.memory_space<vmem>>, %arg2: memref<2x16x128xf32, #tpu.memory_space<vmem>>, %arg3: memref<128x1280xbf16, #tpu.memory_space<vmem>>, %arg4: memref<128x256xbf16, #tpu.memory_space<vmem>>, %arg5: memref<8x128xf32, #tpu.memory_space<vmem>>, %arg6: memref<2x8x128xf32, #tpu.memory_space<vmem>>) attributes {dimension_semantics = [#tpu.dimension_semantics<parallel>], iteration_bounds = array<i64: 1>, scalar_prefetch = 0 : i64, scratch_operands = 0 : i64, tpu.core_type = #tpu.core_type<tc>, window_params = [{transform_indices = @transform_0, window_bounds = array<i64: 2, 8, 128>}, {transform_indices = @transform_1, window_bounds = array<i64: 2, 16, 128>}, {pipeline_mode = #tpu.pipeline_mode<synchronous>, transform_indices = @transform_2, window_bounds = array<i64: 128, 1280>}, {pipeline_mode = #tpu.pipeline_mode<synchronous>, transform_indices = @transform_3, window_bounds = array<i64: 128, 256>}, {pipeline_mode = #tpu.pipeline_mode<synchronous>, transform_indices = @transform_4, window_bounds = array<i64: 8, 128>}, {transform_indices = @transform_5, window_bounds = array<i64: 2, 8, 128>}]} {
    %c0 = arith.constant 0 : index
    %c0_0 = arith.constant 0 : index
    %c0_1 = arith.constant 0 : index
    %0 = vector.load %arg2[%c0, %c0_0, %c0_1] : memref<2x16x128xf32, #tpu.memory_space<vmem>>, vector<2x16x128xf32>
    %1 = vector.shape_cast %0 : vector<2x16x128xf32> to vector<32x128xf32>
    %c0_2 = arith.constant 0 : index
    %c768 = arith.constant 768 : index
    %2 = vector.load %arg3[%c0_2, %c768] : memref<128x1280xbf16, #tpu.memory_space<vmem>>, vector<128x256xbf16>
    %3 = arith.truncf %1 : vector<32x128xf32> to vector<32x128xbf16>
    %cst = arith.constant dense<0.000000e+00> : vector<32x256xf32>
    %4 = tpu.matmul %3, %2, %cst {dimension_numbers = #tpu.dot_dimension_numbers<[1], [0], [0], [1], [0, 0, 1, 1], [], []>} : vector<32x128xbf16>, vector<128x256xbf16>, vector<32x256xf32> -> vector<32x256xf32>
    %5 = vector.shape_cast %4 : vector<32x256xf32> to vector<2x16x256xf32>
    %6 = vector.extract_strided_slice %5 {offsets = [0, 0, 0], sizes = [2, 16, 128], strides = [1, 1, 1]} : vector<2x16x256xf32> to vector<2x16x128xf32>
    %7 = arith.mulf %6, %6 : vector<2x16x128xf32>
    %cst_3 = arith.constant dense<0.000000e+00> : vector<2x16xf32>
    %8 = vector.multi_reduction <add>, %7, %cst_3 [2] : vector<2x16x128xf32> to vector<2x16xf32>
    %9 = vector.shape_cast %8 : vector<2x16xf32> to vector<2x16x1xf32>
    %cst_4 = arith.constant 1.000000e-24 : f32
    %10 = vector.broadcast %cst_4 : f32 to vector<2x16x1xf32>
    %11 = arith.maximumf %9, %10 : vector<2x16x1xf32>
    %12 = math.rsqrt %11 : vector<2x16x1xf32>
    %13 = vector.broadcast %12 : vector<2x16x1xf32> to vector<2x16x128xf32>
    %14 = arith.mulf %6, %13 : vector<2x16x128xf32>
    %15 = vector.extract_strided_slice %5 {offsets = [0, 0, 128], sizes = [2, 16, 128], strides = [1, 1, 1]} : vector<2x16x256xf32> to vector<2x16x128xf32>
    %c0_5 = arith.constant 0 : index
    %c0_6 = arith.constant 0 : index
    %c0_7 = arith.constant 0 : index
    %16 = vector.load %arg1[%c0_5, %c0_6, %c0_7] : memref<2x8x128xf32, #tpu.memory_space<vmem>>, vector<2x8x128xf32>
    %c0_i32 = arith.constant 0 : i32
    %17 = vector.shape_cast %16 : vector<2x8x128xf32> to vector<16x128xf32>
    %c0_8 = arith.constant 0 : index
    %c0_9 = arith.constant 0 : index
    %18 = vector.load %arg3[%c0_8, %c0_9] : memref<128x1280xbf16, #tpu.memory_space<vmem>>, vector<128x384xbf16>
    %19 = arith.truncf %17 : vector<16x128xf32> to vector<16x128xbf16>
    %cst_10 = arith.constant dense<0.000000e+00> : vector<16x384xf32>
    %20 = tpu.matmul %19, %18, %cst_10 {dimension_numbers = #tpu.dot_dimension_numbers<[1], [0], [0], [1], [0, 0, 1, 1], [], []>} : vector<16x128xbf16>, vector<128x384xbf16>, vector<16x384xf32> -> vector<16x384xf32>
    %21 = vector.shape_cast %20 : vector<16x384xf32> to vector<2x8x384xf32>
    %22 = vector.extract_strided_slice %21 {offsets = [0, 0, 0], sizes = [2, 8, 128], strides = [1, 1, 1]} : vector<2x8x384xf32> to vector<2x8x128xf32>
    %23 = arith.mulf %22, %22 : vector<2x8x128xf32>
    %cst_11 = arith.constant dense<0.000000e+00> : vector<2x8xf32>
    %24 = vector.multi_reduction <add>, %23, %cst_11 [2] : vector<2x8x128xf32> to vector<2x8xf32>
    %25 = vector.shape_cast %24 : vector<2x8xf32> to vector<2x8x1xf32>
    %cst_12 = arith.constant 1.000000e-24 : f32
    %26 = vector.broadcast %cst_12 : f32 to vector<2x8x1xf32>
    %27 = arith.maximumf %25, %26 : vector<2x8x1xf32>
    %28 = math.rsqrt %27 : vector<2x8x1xf32>
    %29 = vector.broadcast %28 : vector<2x8x1xf32> to vector<2x8x128xf32>
    %30 = arith.mulf %22, %29 : vector<2x8x128xf32>
    %31 = vector.extract_strided_slice %21 {offsets = [0, 0, 128], sizes = [2, 8, 128], strides = [1, 1, 1]} : vector<2x8x384xf32> to vector<2x8x128xf32>
    %32 = arith.mulf %31, %31 : vector<2x8x128xf32>
    %cst_13 = arith.constant dense<0.000000e+00> : vector<2x8xf32>
    %33 = vector.multi_reduction <add>, %32, %cst_13 [2] : vector<2x8x128xf32> to vector<2x8xf32>
    %34 = vector.shape_cast %33 : vector<2x8xf32> to vector<2x8x1xf32>
    %cst_14 = arith.constant 1.000000e-24 : f32
    %35 = vector.broadcast %cst_14 : f32 to vector<2x8x1xf32>
    %36 = arith.maximumf %34, %35 : vector<2x8x1xf32>
    %37 = math.rsqrt %36 : vector<2x8x1xf32>
    %38 = vector.broadcast %37 : vector<2x8x1xf32> to vector<2x8x128xf32>
    %39 = arith.mulf %31, %38 : vector<2x8x128xf32>
    %40 = vector.extract_strided_slice %21 {offsets = [0, 0, 256], sizes = [2, 8, 128], strides = [1, 1, 1]} : vector<2x8x384xf32> to vector<2x8x128xf32>
    %41 = arith.truncf %30 : vector<2x8x128xf32> to vector<2x8x128xbf16>
    %42 = arith.truncf %39 : vector<2x8x128xf32> to vector<2x8x128xbf16>
    "tpu.trace_start"() <{level = 10 : i32, message = "bqk,bsk->bqs"}> : () -> ()
    %cst_15 = arith.constant dense<0.000000e+00> : vector<2x8x8xf32>
    %43 = tpu.matmul %41, %42, %cst_15 {dimension_numbers = #tpu.dot_dimension_numbers<[2], [2], [1], [1], [0, 0, 0, 1, 1, 1], [0], [0]>} : vector<2x8x128xbf16>, vector<2x8x128xbf16>, vector<2x8x8xf32> -> vector<2x8x8xf32>
    "tpu.trace_stop"() : () -> ()
    %44 = math.exp %43 : vector<2x8x8xf32>
    %cst_16 = arith.constant dense<0.000000e+00> : vector<2x8xf32>
    %45 = vector.multi_reduction <add>, %44, %cst_16 [2] : vector<2x8x8xf32> to vector<2x8xf32>
    %46 = vector.shape_cast %45 : vector<2x8xf32> to vector<2x8x1xf32>
    %47 = tpu.reciprocal %46 {approx = true} : vector<2x8x1xf32> -> vector<2x8x1xf32>
    %48 = vector.broadcast %47 : vector<2x8x1xf32> to vector<2x8x8xf32>
    %49 = arith.mulf %44, %48 : vector<2x8x8xf32>
    %cst_17 = arith.constant dense<0.000000e+00> : vector<2x8xf32>
    %50 = vector.multi_reduction <add>, %49, %cst_17 [1] : vector<2x8x8xf32> to vector<2x8xf32>
    %51 = vector.shape_cast %50 : vector<2x8xf32> to vector<2x1x8xf32>
    %cst_18 = arith.constant 9.99999971E-10 : f32
    %52 = vector.broadcast %cst_18 : f32 to vector<2x1x8xf32>
    %53 = arith.addf %52, %51 : vector<2x1x8xf32>
    %54 = tpu.reciprocal %53 {approx = true} : vector<2x1x8xf32> -> vector<2x1x8xf32>
    %55 = vector.broadcast %54 : vector<2x1x8xf32> to vector<2x8x8xf32>
    %56 = arith.mulf %49, %55 : vector<2x8x8xf32>
    %57 = arith.truncf %56 : vector<2x8x8xf32> to vector<2x8x8xbf16>
    %58 = arith.truncf %40 : vector<2x8x128xf32> to vector<2x8x128xbf16>
    "tpu.trace_start"() <{level = 10 : i32, message = "bqs,bsd->bqd"}> : () -> ()
    %cst_19 = arith.constant dense<0.000000e+00> : vector<2x8x128xf32>
    %59 = tpu.matmul %57, %58, %cst_19 {dimension_numbers = #tpu.dot_dimension_numbers<[2], [1], [1], [2], [0, 0, 0, 1, 1, 2], [0], [0]>} : vector<2x8x8xbf16>, vector<2x8x128xbf16>, vector<2x8x128xf32> -> vector<2x8x128xf32>
    "tpu.trace_stop"() : () -> ()
    %60 = arith.subf %16, %59 : vector<2x8x128xf32>
    %61 = vector.shape_cast %60 : vector<2x8x128xf32> to vector<16x128xf32>
    %c0_20 = arith.constant 0 : index
    %c384 = arith.constant 384 : index
    %62 = vector.load %arg3[%c0_20, %c384] : memref<128x1280xbf16, #tpu.memory_space<vmem>>, vector<128x128xbf16>
    %63 = arith.truncf %61 : vector<16x128xf32> to vector<16x128xbf16>
    %cst_21 = arith.constant dense<0.000000e+00> : vector<16x128xf32>
    %64 = tpu.matmul %63, %62, %cst_21 {dimension_numbers = #tpu.dot_dimension_numbers<[1], [0], [0], [1], [0, 0, 1, 1], [], []>} : vector<16x128xbf16>, vector<128x128xbf16>, vector<16x128xf32> -> vector<16x128xf32>
    %cst_22 = arith.constant 0.000000e+00 : f32
    %65 = vector.broadcast %cst_22 : f32 to vector<16x128xf32>
    %66 = arith.maximumf %64, %65 : vector<16x128xf32>
    %c0_23 = arith.constant 0 : index
    %c0_24 = arith.constant 0 : index
    %67 = vector.load %arg5[%c0_23, %c0_24] : memref<8x128xf32, #tpu.memory_space<vmem>>, vector<1x128xf32>
    %c1 = arith.constant 1 : index
    %c0_25 = arith.constant 0 : index
    %68 = vector.load %arg5[%c1, %c0_25] : memref<8x128xf32, #tpu.memory_space<vmem>>, vector<1x128xf32>
    %c2 = arith.constant 2 : index
    %c0_26 = arith.constant 0 : index
    %69 = vector.load %arg5[%c2, %c0_26] : memref<8x128xf32, #tpu.memory_space<vmem>>, vector<1x128xf32>
    %c3 = arith.constant 3 : index
    %c0_27 = arith.constant 0 : index
    %70 = vector.load %arg5[%c3, %c0_27] : memref<8x128xf32, #tpu.memory_space<vmem>>, vector<1x128xf32>
    %c0_28 = arith.constant 0 : index
    %c512 = arith.constant 512 : index
    %71 = vector.load %arg3[%c0_28, %c512] : memref<128x1280xbf16, #tpu.memory_space<vmem>>, vector<128x128xbf16>
    %72 = arith.truncf %66 : vector<16x128xf32> to vector<16x128xbf16>
    %cst_29 = arith.constant dense<0.000000e+00> : vector<16x128xf32>
    %73 = tpu.matmul %72, %71, %cst_29 {dimension_numbers = #tpu.dot_dimension_numbers<[1], [0], [0], [1], [0, 0, 1, 1], [], []>} : vector<16x128xbf16>, vector<128x128xbf16>, vector<16x128xf32> -> vector<16x128xf32>
    %74 = vector.broadcast %67 : vector<1x128xf32> to vector<16x128xf32>
    %75 = arith.addf %73, %74 : vector<16x128xf32>
    %cst_30 = arith.constant 0.000000e+00 : f32
    %76 = vector.broadcast %cst_30 : f32 to vector<16x128xf32>
    %77 = arith.maximumf %75, %76 : vector<16x128xf32>
    %c0_31 = arith.constant 0 : index
    %c0_32 = arith.constant 0 : index
    %78 = vector.load %arg4[%c0_31, %c0_32] : memref<128x256xbf16, #tpu.memory_space<vmem>>, vector<128x128xbf16>
    %79 = arith.truncf %77 : vector<16x128xf32> to vector<16x128xbf16>
    %cst_33 = arith.constant dense<0.000000e+00> : vector<16x128xf32>
    %80 = tpu.matmul %79, %78, %cst_33 {dimension_numbers = #tpu.dot_dimension_numbers<[1], [0], [0], [1], [0, 0, 1, 1], [], []>} : vector<16x128xbf16>, vector<128x128xbf16>, vector<16x128xf32> -> vector<16x128xf32>
    %81 = arith.addf %66, %80 : vector<16x128xf32>
    %82 = vector.broadcast %68 : vector<1x128xf32> to vector<16x128xf32>
    %83 = arith.addf %81, %82 : vector<16x128xf32>
    %cst_34 = arith.constant dense<0.000000e+00> : vector<16xf32>
    %84 = vector.multi_reduction <add>, %83, %cst_34 [1] : vector<16x128xf32> to vector<16xf32>
    %85 = vector.shape_cast %84 : vector<16xf32> to vector<16x1xf32>
    %cst_35 = arith.constant 1.280000e+02 : f32
    %86 = vector.broadcast %cst_35 : f32 to vector<16x1xf32>
    %87 = arith.divf %85, %86 : vector<16x1xf32>
    %88 = vector.broadcast %87 : vector<16x1xf32> to vector<16x128xf32>
    %89 = arith.subf %83, %88 : vector<16x128xf32>
    %90 = arith.mulf %89, %89 : vector<16x128xf32>
    %cst_36 = arith.constant dense<0.000000e+00> : vector<16xf32>
    %91 = vector.multi_reduction <add>, %90, %cst_36 [1] : vector<16x128xf32> to vector<16xf32>
    %92 = vector.shape_cast %91 : vector<16xf32> to vector<16x1xf32>
    %cst_37 = arith.constant 1.280000e+02 : f32
    %93 = vector.broadcast %cst_37 : f32 to vector<16x1xf32>
    %94 = arith.divf %92, %93 : vector<16x1xf32>
    %95 = vector.broadcast %87 : vector<16x1xf32> to vector<16x128xf32>
    %96 = arith.subf %83, %95 : vector<16x128xf32>
    %cst_38 = arith.constant 9.99999974E-6 : f32
    %97 = vector.broadcast %cst_38 : f32 to vector<16x1xf32>
    %98 = arith.addf %94, %97 : vector<16x1xf32>
    %99 = math.rsqrt %98 : vector<16x1xf32>
    %100 = vector.broadcast %99 : vector<16x1xf32> to vector<16x128xf32>
    %101 = arith.mulf %96, %100 : vector<16x128xf32>
    %102 = vector.broadcast %69 : vector<1x128xf32> to vector<16x128xf32>
    %103 = arith.mulf %101, %102 : vector<16x128xf32>
    %104 = vector.broadcast %70 : vector<1x128xf32> to vector<16x128xf32>
    %105 = arith.addf %103, %104 : vector<16x128xf32>
    %106 = vector.shape_cast %105 : vector<16x128xf32> to vector<2x8x128xf32>
    %107 = arith.addf %16, %106 : vector<2x8x128xf32>
    %cst_39 = arith.constant dense<0.000000e+00> : vector<2x128xf32>
    %108 = vector.multi_reduction <add>, %107, %cst_39 [1] : vector<2x8x128xf32> to vector<2x128xf32>
    %109 = vector.shape_cast %108 : vector<2x128xf32> to vector<2x1x128xf32>
    %cst_40 = arith.constant 8.000000e+00 : f32
    %110 = vector.broadcast %cst_40 : f32 to vector<2x1x128xf32>
    %111 = arith.divf %109, %110 : vector<2x1x128xf32>
    %112 = vector.broadcast %111 : vector<2x1x128xf32> to vector<2x8x128xf32>
    %113 = arith.subf %107, %112 : vector<2x8x128xf32>
    %114 = arith.mulf %113, %113 : vector<2x8x128xf32>
    %cst_41 = arith.constant dense<0.000000e+00> : vector<2x128xf32>
    %115 = vector.multi_reduction <add>, %114, %cst_41 [1] : vector<2x8x128xf32> to vector<2x128xf32>
    %116 = vector.shape_cast %115 : vector<2x128xf32> to vector<2x1x128xf32>
    %cst_42 = arith.constant 8.000000e+00 : f32
    %117 = vector.broadcast %cst_42 : f32 to vector<2x1x128xf32>
    %118 = arith.divf %116, %117 : vector<2x1x128xf32>
    %119 = vector.broadcast %111 : vector<2x1x128xf32> to vector<2x8x128xf32>
    %120 = arith.subf %107, %119 : vector<2x8x128xf32>
    %cst_43 = arith.constant 9.99999974E-6 : f32
    %121 = vector.broadcast %cst_43 : f32 to vector<2x1x128xf32>
    %122 = arith.addf %118, %121 : vector<2x1x128xf32>
    %123 = math.rsqrt %122 : vector<2x1x128xf32>
    %124 = vector.broadcast %123 : vector<2x1x128xf32> to vector<2x8x128xf32>
    %125 = arith.mulf %120, %124 : vector<2x8x128xf32>
    %cst_44 = arith.constant 0.000000e+00 : f32
    %126 = vector.broadcast %cst_44 : f32 to vector<2x8x128xf32>
    %127 = arith.maximumf %125, %126 : vector<2x8x128xf32>
    %128 = vector.shape_cast %127 : vector<2x8x128xf32> to vector<16x128xf32>
    %c0_45 = arith.constant 0 : index
    %c640 = arith.constant 640 : index
    %129 = vector.load %arg3[%c0_45, %c640] : memref<128x1280xbf16, #tpu.memory_space<vmem>>, vector<128x128xbf16>
    %130 = arith.truncf %128 : vector<16x128xf32> to vector<16x128xbf16>
    %cst_46 = arith.constant dense<0.000000e+00> : vector<16x128xf32>
    %131 = tpu.matmul %130, %129, %cst_46 {dimension_numbers = #tpu.dot_dimension_numbers<[1], [0], [0], [1], [0, 0, 1, 1], [], []>} : vector<16x128xbf16>, vector<128x128xbf16>, vector<16x128xf32> -> vector<16x128xf32>
    %132 = vector.shape_cast %131 : vector<16x128xf32> to vector<2x8x128xf32>
    %133 = arith.mulf %132, %132 : vector<2x8x128xf32>
    %cst_47 = arith.constant dense<0.000000e+00> : vector<2x8xf32>
    %134 = vector.multi_reduction <add>, %133, %cst_47 [2] : vector<2x8x128xf32> to vector<2x8xf32>
    %135 = vector.shape_cast %134 : vector<2x8xf32> to vector<2x8x1xf32>
    %cst_48 = arith.constant 1.000000e-24 : f32
    %136 = vector.broadcast %cst_48 : f32 to vector<2x8x1xf32>
    %137 = arith.maximumf %135, %136 : vector<2x8x1xf32>
    %138 = math.rsqrt %137 : vector<2x8x1xf32>
    %139 = vector.broadcast %138 : vector<2x8x1xf32> to vector<2x8x128xf32>
    %140 = arith.mulf %132, %139 : vector<2x8x128xf32>
    %141 = arith.truncf %140 : vector<2x8x128xf32> to vector<2x8x128xbf16>
    %142 = arith.truncf %14 : vector<2x16x128xf32> to vector<2x16x128xbf16>
    "tpu.trace_start"() <{level = 10 : i32, message = "bqk,bsk->bqs"}> : () -> ()
    %cst_49 = arith.constant dense<0.000000e+00> : vector<2x8x16xf32>
    %143 = tpu.matmul %141, %142, %cst_49 {dimension_numbers = #tpu.dot_dimension_numbers<[2], [2], [1], [1], [0, 0, 0, 1, 1, 1], [0], [0]>} : vector<2x8x128xbf16>, vector<2x16x128xbf16>, vector<2x8x16xf32> -> vector<2x8x16xf32>
    "tpu.trace_stop"() : () -> ()
    %144 = math.exp %143 : vector<2x8x16xf32>
    %cst_50 = arith.constant dense<0.000000e+00> : vector<2x8xf32>
    %145 = vector.multi_reduction <add>, %144, %cst_50 [2] : vector<2x8x16xf32> to vector<2x8xf32>
    %146 = vector.shape_cast %145 : vector<2x8xf32> to vector<2x8x1xf32>
    %147 = tpu.reciprocal %146 {approx = true} : vector<2x8x1xf32> -> vector<2x8x1xf32>
    %148 = vector.broadcast %147 : vector<2x8x1xf32> to vector<2x8x16xf32>
    %149 = arith.mulf %144, %148 : vector<2x8x16xf32>
    %cst_51 = arith.constant dense<0.000000e+00> : vector<2x16xf32>
    %150 = vector.multi_reduction <add>, %149, %cst_51 [1] : vector<2x8x16xf32> to vector<2x16xf32>
    %151 = vector.shape_cast %150 : vector<2x16xf32> to vector<2x1x16xf32>
    %cst_52 = arith.constant 9.99999971E-10 : f32
    %152 = vector.broadcast %cst_52 : f32 to vector<2x1x16xf32>
    %153 = arith.addf %152, %151 : vector<2x1x16xf32>
    %154 = tpu.reciprocal %153 {approx = true} : vector<2x1x16xf32> -> vector<2x1x16xf32>
    %155 = vector.broadcast %154 : vector<2x1x16xf32> to vector<2x8x16xf32>
    %156 = arith.mulf %149, %155 : vector<2x8x16xf32>
    %157 = arith.truncf %156 : vector<2x8x16xf32> to vector<2x8x16xbf16>
    %158 = arith.truncf %15 : vector<2x16x128xf32> to vector<2x16x128xbf16>
    "tpu.trace_start"() <{level = 10 : i32, message = "bqs,bsd->bqd"}> : () -> ()
    %cst_53 = arith.constant dense<0.000000e+00> : vector<2x8x128xf32>
    %159 = tpu.matmul %157, %158, %cst_53 {dimension_numbers = #tpu.dot_dimension_numbers<[2], [1], [1], [2], [0, 0, 0, 1, 1, 2], [0], [0]>} : vector<2x8x16xbf16>, vector<2x16x128xbf16>, vector<2x8x128xf32> -> vector<2x8x128xf32>
    "tpu.trace_stop"() : () -> ()
    %160 = arith.subf %127, %159 : vector<2x8x128xf32>
    %161 = vector.shape_cast %160 : vector<2x8x128xf32> to vector<16x128xf32>
    %c0_54 = arith.constant 0 : index
    %c1024 = arith.constant 1024 : index
    %162 = vector.load %arg3[%c0_54, %c1024] : memref<128x1280xbf16, #tpu.memory_space<vmem>>, vector<128x128xbf16>
    %163 = arith.truncf %161 : vector<16x128xf32> to vector<16x128xbf16>
    %cst_55 = arith.constant dense<0.000000e+00> : vector<16x128xf32>
    %164 = tpu.matmul %163, %162, %cst_55 {dimension_numbers = #tpu.dot_dimension_numbers<[1], [0], [0], [1], [0, 0, 1, 1], [], []>} : vector<16x128xbf16>, vector<128x128xbf16>, vector<16x128xf32> -> vector<16x128xf32>
    %cst_56 = arith.constant 0.000000e+00 : f32
    %165 = vector.broadcast %cst_56 : f32 to vector<16x128xf32>
    %166 = arith.maximumf %164, %165 : vector<16x128xf32>
    %c4 = arith.constant 4 : index
    %c0_57 = arith.constant 0 : index
    %167 = vector.load %arg5[%c4, %c0_57] : memref<8x128xf32, #tpu.memory_space<vmem>>, vector<1x128xf32>
    %c5 = arith.constant 5 : index
    %c0_58 = arith.constant 0 : index
    %168 = vector.load %arg5[%c5, %c0_58] : memref<8x128xf32, #tpu.memory_space<vmem>>, vector<1x128xf32>
    %c6 = arith.constant 6 : index
    %c0_59 = arith.constant 0 : index
    %169 = vector.load %arg5[%c6, %c0_59] : memref<8x128xf32, #tpu.memory_space<vmem>>, vector<1x128xf32>
    %c7 = arith.constant 7 : index
    %c0_60 = arith.constant 0 : index
    %170 = vector.load %arg5[%c7, %c0_60] : memref<8x128xf32, #tpu.memory_space<vmem>>, vector<1x128xf32>
    %c0_61 = arith.constant 0 : index
    %c1152 = arith.constant 1152 : index
    %171 = vector.load %arg3[%c0_61, %c1152] : memref<128x1280xbf16, #tpu.memory_space<vmem>>, vector<128x128xbf16>
    %172 = arith.truncf %166 : vector<16x128xf32> to vector<16x128xbf16>
    %cst_62 = arith.constant dense<0.000000e+00> : vector<16x128xf32>
    %173 = tpu.matmul %172, %171, %cst_62 {dimension_numbers = #tpu.dot_dimension_numbers<[1], [0], [0], [1], [0, 0, 1, 1], [], []>} : vector<16x128xbf16>, vector<128x128xbf16>, vector<16x128xf32> -> vector<16x128xf32>
    %174 = vector.broadcast %167 : vector<1x128xf32> to vector<16x128xf32>
    %175 = arith.addf %173, %174 : vector<16x128xf32>
    %cst_63 = arith.constant 0.000000e+00 : f32
    %176 = vector.broadcast %cst_63 : f32 to vector<16x128xf32>
    %177 = arith.maximumf %175, %176 : vector<16x128xf32>
    %c0_64 = arith.constant 0 : index
    %c128 = arith.constant 128 : index
    %178 = vector.load %arg4[%c0_64, %c128] : memref<128x256xbf16, #tpu.memory_space<vmem>>, vector<128x128xbf16>
    %179 = arith.truncf %177 : vector<16x128xf32> to vector<16x128xbf16>
    %cst_65 = arith.constant dense<0.000000e+00> : vector<16x128xf32>
    %180 = tpu.matmul %179, %178, %cst_65 {dimension_numbers = #tpu.dot_dimension_numbers<[1], [0], [0], [1], [0, 0, 1, 1], [], []>} : vector<16x128xbf16>, vector<128x128xbf16>, vector<16x128xf32> -> vector<16x128xf32>
    %181 = arith.addf %166, %180 : vector<16x128xf32>
    %182 = vector.broadcast %168 : vector<1x128xf32> to vector<16x128xf32>
    %183 = arith.addf %181, %182 : vector<16x128xf32>
    %cst_66 = arith.constant dense<0.000000e+00> : vector<16xf32>
    %184 = vector.multi_reduction <add>, %183, %cst_66 [1] : vector<16x128xf32> to vector<16xf32>
    %185 = vector.shape_cast %184 : vector<16xf32> to vector<16x1xf32>
    %cst_67 = arith.constant 1.280000e+02 : f32
    %186 = vector.broadcast %cst_67 : f32 to vector<16x1xf32>
    %187 = arith.divf %185, %186 : vector<16x1xf32>
    %188 = vector.broadcast %187 : vector<16x1xf32> to vector<16x128xf32>
    %189 = arith.subf %183, %188 : vector<16x128xf32>
    %190 = arith.mulf %189, %189 : vector<16x128xf32>
    %cst_68 = arith.constant dense<0.000000e+00> : vector<16xf32>
    %191 = vector.multi_reduction <add>, %190, %cst_68 [1] : vector<16x128xf32> to vector<16xf32>
    %192 = vector.shape_cast %191 : vector<16xf32> to vector<16x1xf32>
    %cst_69 = arith.constant 1.280000e+02 : f32
    %193 = vector.broadcast %cst_69 : f32 to vector<16x1xf32>
    %194 = arith.divf %192, %193 : vector<16x1xf32>
    %195 = vector.broadcast %187 : vector<16x1xf32> to vector<16x128xf32>
    %196 = arith.subf %183, %195 : vector<16x128xf32>
    %cst_70 = arith.constant 9.99999974E-6 : f32
    %197 = vector.broadcast %cst_70 : f32 to vector<16x1xf32>
    %198 = arith.addf %194, %197 : vector<16x1xf32>
    %199 = math.rsqrt %198 : vector<16x1xf32>
    %200 = vector.broadcast %199 : vector<16x1xf32> to vector<16x128xf32>
    %201 = arith.mulf %196, %200 : vector<16x128xf32>
    %202 = vector.broadcast %169 : vector<1x128xf32> to vector<16x128xf32>
    %203 = arith.mulf %201, %202 : vector<16x128xf32>
    %204 = vector.broadcast %170 : vector<1x128xf32> to vector<16x128xf32>
    %205 = arith.addf %203, %204 : vector<16x128xf32>
    %206 = vector.shape_cast %205 : vector<16x128xf32> to vector<2x8x128xf32>
    %207 = arith.addf %127, %206 : vector<2x8x128xf32>
    %cst_71 = arith.constant dense<0.000000e+00> : vector<2x128xf32>
    %208 = vector.multi_reduction <add>, %207, %cst_71 [1] : vector<2x8x128xf32> to vector<2x128xf32>
    %209 = vector.shape_cast %208 : vector<2x128xf32> to vector<2x1x128xf32>
    %cst_72 = arith.constant 8.000000e+00 : f32
    %210 = vector.broadcast %cst_72 : f32 to vector<2x1x128xf32>
    %211 = arith.divf %209, %210 : vector<2x1x128xf32>
    %212 = vector.broadcast %211 : vector<2x1x128xf32> to vector<2x8x128xf32>
    %213 = arith.subf %207, %212 : vector<2x8x128xf32>
    %214 = arith.mulf %213, %213 : vector<2x8x128xf32>
    %cst_73 = arith.constant dense<0.000000e+00> : vector<2x128xf32>
    %215 = vector.multi_reduction <add>, %214, %cst_73 [1] : vector<2x8x128xf32> to vector<2x128xf32>
    %216 = vector.shape_cast %215 : vector<2x128xf32> to vector<2x1x128xf32>
    %cst_74 = arith.constant 8.000000e+00 : f32
    %217 = vector.broadcast %cst_74 : f32 to vector<2x1x128xf32>
    %218 = arith.divf %216, %217 : vector<2x1x128xf32>
    %219 = vector.broadcast %211 : vector<2x1x128xf32> to vector<2x8x128xf32>
    %220 = arith.subf %207, %219 : vector<2x8x128xf32>
    %cst_75 = arith.constant 9.99999974E-6 : f32
    %221 = vector.broadcast %cst_75 : f32 to vector<2x1x128xf32>
    %222 = arith.addf %218, %221 : vector<2x1x128xf32>
    %223 = math.rsqrt %222 : vector<2x1x128xf32>
    %224 = vector.broadcast %223 : vector<2x1x128xf32> to vector<2x8x128xf32>
    %225 = arith.mulf %220, %224 : vector<2x8x128xf32>
    %cst_76 = arith.constant 0.000000e+00 : f32
    %226 = vector.broadcast %cst_76 : f32 to vector<2x8x128xf32>
    %227 = arith.maximumf %225, %226 : vector<2x8x128xf32>
    %c1_i32 = arith.constant 1 : i32
    %228 = vector.shape_cast %227 : vector<2x8x128xf32> to vector<16x128xf32>
    %c0_77 = arith.constant 0 : index
    %c0_78 = arith.constant 0 : index
    %229 = vector.load %arg3[%c0_77, %c0_78] : memref<128x1280xbf16, #tpu.memory_space<vmem>>, vector<128x384xbf16>
    %230 = arith.truncf %228 : vector<16x128xf32> to vector<16x128xbf16>
    %cst_79 = arith.constant dense<0.000000e+00> : vector<16x384xf32>
    %231 = tpu.matmul %230, %229, %cst_79 {dimension_numbers = #tpu.dot_dimension_numbers<[1], [0], [0], [1], [0, 0, 1, 1], [], []>} : vector<16x128xbf16>, vector<128x384xbf16>, vector<16x384xf32> -> vector<16x384xf32>
    %232 = vector.shape_cast %231 : vector<16x384xf32> to vector<2x8x384xf32>
    %233 = vector.extract_strided_slice %232 {offsets = [0, 0, 0], sizes = [2, 8, 128], strides = [1, 1, 1]} : vector<2x8x384xf32> to vector<2x8x128xf32>
    %234 = arith.mulf %233, %233 : vector<2x8x128xf32>
    %cst_80 = arith.constant dense<0.000000e+00> : vector<2x8xf32>
    %235 = vector.multi_reduction <add>, %234, %cst_80 [2] : vector<2x8x128xf32> to vector<2x8xf32>
    %236 = vector.shape_cast %235 : vector<2x8xf32> to vector<2x8x1xf32>
    %cst_81 = arith.constant 1.000000e-24 : f32
    %237 = vector.broadcast %cst_81 : f32 to vector<2x8x1xf32>
    %238 = arith.maximumf %236, %237 : vector<2x8x1xf32>
    %239 = math.rsqrt %238 : vector<2x8x1xf32>
    %240 = vector.broadcast %239 : vector<2x8x1xf32> to vector<2x8x128xf32>
    %241 = arith.mulf %233, %240 : vector<2x8x128xf32>
    %242 = vector.extract_strided_slice %232 {offsets = [0, 0, 128], sizes = [2, 8, 128], strides = [1, 1, 1]} : vector<2x8x384xf32> to vector<2x8x128xf32>
    %243 = arith.mulf %242, %242 : vector<2x8x128xf32>
    %cst_82 = arith.constant dense<0.000000e+00> : vector<2x8xf32>
    %244 = vector.multi_reduction <add>, %243, %cst_82 [2] : vector<2x8x128xf32> to vector<2x8xf32>
    %245 = vector.shape_cast %244 : vector<2x8xf32> to vector<2x8x1xf32>
    %cst_83 = arith.constant 1.000000e-24 : f32
    %246 = vector.broadcast %cst_83 : f32 to vector<2x8x1xf32>
    %247 = arith.maximumf %245, %246 : vector<2x8x1xf32>
    %248 = math.rsqrt %247 : vector<2x8x1xf32>
    %249 = vector.broadcast %248 : vector<2x8x1xf32> to vector<2x8x128xf32>
    %250 = arith.mulf %242, %249 : vector<2x8x128xf32>
    %251 = vector.extract_strided_slice %232 {offsets = [0, 0, 256], sizes = [2, 8, 128], strides = [1, 1, 1]} : vector<2x8x384xf32> to vector<2x8x128xf32>
    %252 = arith.truncf %241 : vector<2x8x128xf32> to vector<2x8x128xbf16>
    %253 = arith.truncf %250 : vector<2x8x128xf32> to vector<2x8x128xbf16>
    "tpu.trace_start"() <{level = 10 : i32, message = "bqk,bsk->bqs"}> : () -> ()
    %cst_84 = arith.constant dense<0.000000e+00> : vector<2x8x8xf32>
    %254 = tpu.matmul %252, %253, %cst_84 {dimension_numbers = #tpu.dot_dimension_numbers<[2], [2], [1], [1], [0, 0, 0, 1, 1, 1], [0], [0]>} : vector<2x8x128xbf16>, vector<2x8x128xbf16>, vector<2x8x8xf32> -> vector<2x8x8xf32>
    "tpu.trace_stop"() : () -> ()
    %255 = math.exp %254 : vector<2x8x8xf32>
    %cst_85 = arith.constant dense<0.000000e+00> : vector<2x8xf32>
    %256 = vector.multi_reduction <add>, %255, %cst_85 [2] : vector<2x8x8xf32> to vector<2x8xf32>
    %257 = vector.shape_cast %256 : vector<2x8xf32> to vector<2x8x1xf32>
    %258 = tpu.reciprocal %257 {approx = true} : vector<2x8x1xf32> -> vector<2x8x1xf32>
    %259 = vector.broadcast %258 : vector<2x8x1xf32> to vector<2x8x8xf32>
    %260 = arith.mulf %255, %259 : vector<2x8x8xf32>
    %cst_86 = arith.constant dense<0.000000e+00> : vector<2x8xf32>
    %261 = vector.multi_reduction <add>, %260, %cst_86 [1] : vector<2x8x8xf32> to vector<2x8xf32>
    %262 = vector.shape_cast %261 : vector<2x8xf32> to vector<2x1x8xf32>
    %cst_87 = arith.constant 9.99999971E-10 : f32
    %263 = vector.broadcast %cst_87 : f32 to vector<2x1x8xf32>
    %264 = arith.addf %263, %262 : vector<2x1x8xf32>
    %265 = tpu.reciprocal %264 {approx = true} : vector<2x1x8xf32> -> vector<2x1x8xf32>
    %266 = vector.broadcast %265 : vector<2x1x8xf32> to vector<2x8x8xf32>
    %267 = arith.mulf %260, %266 : vector<2x8x8xf32>
    %268 = arith.truncf %267 : vector<2x8x8xf32> to vector<2x8x8xbf16>
    %269 = arith.truncf %251 : vector<2x8x128xf32> to vector<2x8x128xbf16>
    "tpu.trace_start"() <{level = 10 : i32, message = "bqs,bsd->bqd"}> : () -> ()
    %cst_88 = arith.constant dense<0.000000e+00> : vector<2x8x128xf32>
    %270 = tpu.matmul %268, %269, %cst_88 {dimension_numbers = #tpu.dot_dimension_numbers<[2], [1], [1], [2], [0, 0, 0, 1, 1, 2], [0], [0]>} : vector<2x8x8xbf16>, vector<2x8x128xbf16>, vector<2x8x128xf32> -> vector<2x8x128xf32>
    "tpu.trace_stop"() : () -> ()
    %271 = arith.subf %227, %270 : vector<2x8x128xf32>
    %272 = vector.shape_cast %271 : vector<2x8x128xf32> to vector<16x128xf32>
    %c0_89 = arith.constant 0 : index
    %c384_90 = arith.constant 384 : index
    %273 = vector.load %arg3[%c0_89, %c384_90] : memref<128x1280xbf16, #tpu.memory_space<vmem>>, vector<128x128xbf16>
    %274 = arith.truncf %272 : vector<16x128xf32> to vector<16x128xbf16>
    %cst_91 = arith.constant dense<0.000000e+00> : vector<16x128xf32>
    %275 = tpu.matmul %274, %273, %cst_91 {dimension_numbers = #tpu.dot_dimension_numbers<[1], [0], [0], [1], [0, 0, 1, 1], [], []>} : vector<16x128xbf16>, vector<128x128xbf16>, vector<16x128xf32> -> vector<16x128xf32>
    %cst_92 = arith.constant 0.000000e+00 : f32
    %276 = vector.broadcast %cst_92 : f32 to vector<16x128xf32>
    %277 = arith.maximumf %275, %276 : vector<16x128xf32>
    %c0_93 = arith.constant 0 : index
    %c0_94 = arith.constant 0 : index
    %278 = vector.load %arg5[%c0_93, %c0_94] : memref<8x128xf32, #tpu.memory_space<vmem>>, vector<1x128xf32>
    %c1_95 = arith.constant 1 : index
    %c0_96 = arith.constant 0 : index
    %279 = vector.load %arg5[%c1_95, %c0_96] : memref<8x128xf32, #tpu.memory_space<vmem>>, vector<1x128xf32>
    %c2_97 = arith.constant 2 : index
    %c0_98 = arith.constant 0 : index
    %280 = vector.load %arg5[%c2_97, %c0_98] : memref<8x128xf32, #tpu.memory_space<vmem>>, vector<1x128xf32>
    %c3_99 = arith.constant 3 : index
    %c0_100 = arith.constant 0 : index
    %281 = vector.load %arg5[%c3_99, %c0_100] : memref<8x128xf32, #tpu.memory_space<vmem>>, vector<1x128xf32>
    %c0_101 = arith.constant 0 : index
    %c512_102 = arith.constant 512 : index
    %282 = vector.load %arg3[%c0_101, %c512_102] : memref<128x1280xbf16, #tpu.memory_space<vmem>>, vector<128x128xbf16>
    %283 = arith.truncf %277 : vector<16x128xf32> to vector<16x128xbf16>
    %cst_103 = arith.constant dense<0.000000e+00> : vector<16x128xf32>
    %284 = tpu.matmul %283, %282, %cst_103 {dimension_numbers = #tpu.dot_dimension_numbers<[1], [0], [0], [1], [0, 0, 1, 1], [], []>} : vector<16x128xbf16>, vector<128x128xbf16>, vector<16x128xf32> -> vector<16x128xf32>
    %285 = vector.broadcast %278 : vector<1x128xf32> to vector<16x128xf32>
    %286 = arith.addf %284, %285 : vector<16x128xf32>
    %cst_104 = arith.constant 0.000000e+00 : f32
    %287 = vector.broadcast %cst_104 : f32 to vector<16x128xf32>
    %288 = arith.maximumf %286, %287 : vector<16x128xf32>
    %c0_105 = arith.constant 0 : index
    %c0_106 = arith.constant 0 : index
    %289 = vector.load %arg4[%c0_105, %c0_106] : memref<128x256xbf16, #tpu.memory_space<vmem>>, vector<128x128xbf16>
    %290 = arith.truncf %288 : vector<16x128xf32> to vector<16x128xbf16>
    %cst_107 = arith.constant dense<0.000000e+00> : vector<16x128xf32>
    %291 = tpu.matmul %290, %289, %cst_107 {dimension_numbers = #tpu.dot_dimension_numbers<[1], [0], [0], [1], [0, 0, 1, 1], [], []>} : vector<16x128xbf16>, vector<128x128xbf16>, vector<16x128xf32> -> vector<16x128xf32>
    %292 = arith.addf %277, %291 : vector<16x128xf32>
    %293 = vector.broadcast %279 : vector<1x128xf32> to vector<16x128xf32>
    %294 = arith.addf %292, %293 : vector<16x128xf32>
    %cst_108 = arith.constant dense<0.000000e+00> : vector<16xf32>
    %295 = vector.multi_reduction <add>, %294, %cst_108 [1] : vector<16x128xf32> to vector<16xf32>
    %296 = vector.shape_cast %295 : vector<16xf32> to vector<16x1xf32>
    %cst_109 = arith.constant 1.280000e+02 : f32
    %297 = vector.broadcast %cst_109 : f32 to vector<16x1xf32>
    %298 = arith.divf %296, %297 : vector<16x1xf32>
    %299 = vector.broadcast %298 : vector<16x1xf32> to vector<16x128xf32>
    %300 = arith.subf %294, %299 : vector<16x128xf32>
    %301 = arith.mulf %300, %300 : vector<16x128xf32>
    %cst_110 = arith.constant dense<0.000000e+00> : vector<16xf32>
    %302 = vector.multi_reduction <add>, %301, %cst_110 [1] : vector<16x128xf32> to vector<16xf32>
    %303 = vector.shape_cast %302 : vector<16xf32> to vector<16x1xf32>
    %cst_111 = arith.constant 1.280000e+02 : f32
    %304 = vector.broadcast %cst_111 : f32 to vector<16x1xf32>
    %305 = arith.divf %303, %304 : vector<16x1xf32>
    %306 = vector.broadcast %298 : vector<16x1xf32> to vector<16x128xf32>
    %307 = arith.subf %294, %306 : vector<16x128xf32>
    %cst_112 = arith.constant 9.99999974E-6 : f32
    %308 = vector.broadcast %cst_112 : f32 to vector<16x1xf32>
    %309 = arith.addf %305, %308 : vector<16x1xf32>
    %310 = math.rsqrt %309 : vector<16x1xf32>
    %311 = vector.broadcast %310 : vector<16x1xf32> to vector<16x128xf32>
    %312 = arith.mulf %307, %311 : vector<16x128xf32>
    %313 = vector.broadcast %280 : vector<1x128xf32> to vector<16x128xf32>
    %314 = arith.mulf %312, %313 : vector<16x128xf32>
    %315 = vector.broadcast %281 : vector<1x128xf32> to vector<16x128xf32>
    %316 = arith.addf %314, %315 : vector<16x128xf32>
    %317 = vector.shape_cast %316 : vector<16x128xf32> to vector<2x8x128xf32>
    %318 = arith.addf %227, %317 : vector<2x8x128xf32>
    %cst_113 = arith.constant dense<0.000000e+00> : vector<2x128xf32>
    %319 = vector.multi_reduction <add>, %318, %cst_113 [1] : vector<2x8x128xf32> to vector<2x128xf32>
    %320 = vector.shape_cast %319 : vector<2x128xf32> to vector<2x1x128xf32>
    %cst_114 = arith.constant 8.000000e+00 : f32
    %321 = vector.broadcast %cst_114 : f32 to vector<2x1x128xf32>
    %322 = arith.divf %320, %321 : vector<2x1x128xf32>
    %323 = vector.broadcast %322 : vector<2x1x128xf32> to vector<2x8x128xf32>
    %324 = arith.subf %318, %323 : vector<2x8x128xf32>
    %325 = arith.mulf %324, %324 : vector<2x8x128xf32>
    %cst_115 = arith.constant dense<0.000000e+00> : vector<2x128xf32>
    %326 = vector.multi_reduction <add>, %325, %cst_115 [1] : vector<2x8x128xf32> to vector<2x128xf32>
    %327 = vector.shape_cast %326 : vector<2x128xf32> to vector<2x1x128xf32>
    %cst_116 = arith.constant 8.000000e+00 : f32
    %328 = vector.broadcast %cst_116 : f32 to vector<2x1x128xf32>
    %329 = arith.divf %327, %328 : vector<2x1x128xf32>
    %330 = vector.broadcast %322 : vector<2x1x128xf32> to vector<2x8x128xf32>
    %331 = arith.subf %318, %330 : vector<2x8x128xf32>
    %cst_117 = arith.constant 9.99999974E-6 : f32
    %332 = vector.broadcast %cst_117 : f32 to vector<2x1x128xf32>
    %333 = arith.addf %329, %332 : vector<2x1x128xf32>
    %334 = math.rsqrt %333 : vector<2x1x128xf32>
    %335 = vector.broadcast %334 : vector<2x1x128xf32> to vector<2x8x128xf32>
    %336 = arith.mulf %331, %335 : vector<2x8x128xf32>
    %cst_118 = arith.constant 0.000000e+00 : f32
    %337 = vector.broadcast %cst_118 : f32 to vector<2x8x128xf32>
    %338 = arith.maximumf %336, %337 : vector<2x8x128xf32>
    %339 = vector.shape_cast %338 : vector<2x8x128xf32> to vector<16x128xf32>
    %c0_119 = arith.constant 0 : index
    %c640_120 = arith.constant 640 : index
    %340 = vector.load %arg3[%c0_119, %c640_120] : memref<128x1280xbf16, #tpu.memory_space<vmem>>, vector<128x128xbf16>
    %341 = arith.truncf %339 : vector<16x128xf32> to vector<16x128xbf16>
    %cst_121 = arith.constant dense<0.000000e+00> : vector<16x128xf32>
    %342 = tpu.matmul %341, %340, %cst_121 {dimension_numbers = #tpu.dot_dimension_numbers<[1], [0], [0], [1], [0, 0, 1, 1], [], []>} : vector<16x128xbf16>, vector<128x128xbf16>, vector<16x128xf32> -> vector<16x128xf32>
    %343 = vector.shape_cast %342 : vector<16x128xf32> to vector<2x8x128xf32>
    %344 = arith.mulf %343, %343 : vector<2x8x128xf32>
    %cst_122 = arith.constant dense<0.000000e+00> : vector<2x8xf32>
    %345 = vector.multi_reduction <add>, %344, %cst_122 [2] : vector<2x8x128xf32> to vector<2x8xf32>
    %346 = vector.shape_cast %345 : vector<2x8xf32> to vector<2x8x1xf32>
    %cst_123 = arith.constant 1.000000e-24 : f32
    %347 = vector.broadcast %cst_123 : f32 to vector<2x8x1xf32>
    %348 = arith.maximumf %346, %347 : vector<2x8x1xf32>
    %349 = math.rsqrt %348 : vector<2x8x1xf32>
    %350 = vector.broadcast %349 : vector<2x8x1xf32> to vector<2x8x128xf32>
    %351 = arith.mulf %343, %350 : vector<2x8x128xf32>
    %352 = arith.truncf %351 : vector<2x8x128xf32> to vector<2x8x128xbf16>
    %353 = arith.truncf %14 : vector<2x16x128xf32> to vector<2x16x128xbf16>
    "tpu.trace_start"() <{level = 10 : i32, message = "bqk,bsk->bqs"}> : () -> ()
    %cst_124 = arith.constant dense<0.000000e+00> : vector<2x8x16xf32>
    %354 = tpu.matmul %352, %353, %cst_124 {dimension_numbers = #tpu.dot_dimension_numbers<[2], [2], [1], [1], [0, 0, 0, 1, 1, 1], [0], [0]>} : vector<2x8x128xbf16>, vector<2x16x128xbf16>, vector<2x8x16xf32> -> vector<2x8x16xf32>
    "tpu.trace_stop"() : () -> ()
    %355 = math.exp %354 : vector<2x8x16xf32>
    %cst_125 = arith.constant dense<0.000000e+00> : vector<2x8xf32>
    %356 = vector.multi_reduction <add>, %355, %cst_125 [2] : vector<2x8x16xf32> to vector<2x8xf32>
    %357 = vector.shape_cast %356 : vector<2x8xf32> to vector<2x8x1xf32>
    %358 = tpu.reciprocal %357 {approx = true} : vector<2x8x1xf32> -> vector<2x8x1xf32>
    %359 = vector.broadcast %358 : vector<2x8x1xf32> to vector<2x8x16xf32>
    %360 = arith.mulf %355, %359 : vector<2x8x16xf32>
    %cst_126 = arith.constant dense<0.000000e+00> : vector<2x16xf32>
    %361 = vector.multi_reduction <add>, %360, %cst_126 [1] : vector<2x8x16xf32> to vector<2x16xf32>
    %362 = vector.shape_cast %361 : vector<2x16xf32> to vector<2x1x16xf32>
    %cst_127 = arith.constant 9.99999971E-10 : f32
    %363 = vector.broadcast %cst_127 : f32 to vector<2x1x16xf32>
    %364 = arith.addf %363, %362 : vector<2x1x16xf32>
    %365 = tpu.reciprocal %364 {approx = true} : vector<2x1x16xf32> -> vector<2x1x16xf32>
    %366 = vector.broadcast %365 : vector<2x1x16xf32> to vector<2x8x16xf32>
    %367 = arith.mulf %360, %366 : vector<2x8x16xf32>
    %368 = arith.truncf %367 : vector<2x8x16xf32> to vector<2x8x16xbf16>
    %369 = arith.truncf %15 : vector<2x16x128xf32> to vector<2x16x128xbf16>
    "tpu.trace_start"() <{level = 10 : i32, message = "bqs,bsd->bqd"}> : () -> ()
    %cst_128 = arith.constant dense<0.000000e+00> : vector<2x8x128xf32>
    %370 = tpu.matmul %368, %369, %cst_128 {dimension_numbers = #tpu.dot_dimension_numbers<[2], [1], [1], [2], [0, 0, 0, 1, 1, 2], [0], [0]>} : vector<2x8x16xbf16>, vector<2x16x128xbf16>, vector<2x8x128xf32> -> vector<2x8x128xf32>
    "tpu.trace_stop"() : () -> ()
    %371 = arith.subf %338, %370 : vector<2x8x128xf32>
    %372 = vector.shape_cast %371 : vector<2x8x128xf32> to vector<16x128xf32>
    %c0_129 = arith.constant 0 : index
    %c1024_130 = arith.constant 1024 : index
    %373 = vector.load %arg3[%c0_129, %c1024_130] : memref<128x1280xbf16, #tpu.memory_space<vmem>>, vector<128x128xbf16>
    %374 = arith.truncf %372 : vector<16x128xf32> to vector<16x128xbf16>
    %cst_131 = arith.constant dense<0.000000e+00> : vector<16x128xf32>
    %375 = tpu.matmul %374, %373, %cst_131 {dimension_numbers = #tpu.dot_dimension_numbers<[1], [0], [0], [1], [0, 0, 1, 1], [], []>} : vector<16x128xbf16>, vector<128x128xbf16>, vector<16x128xf32> -> vector<16x128xf32>
    %cst_132 = arith.constant 0.000000e+00 : f32
    %376 = vector.broadcast %cst_132 : f32 to vector<16x128xf32>
    %377 = arith.maximumf %375, %376 : vector<16x128xf32>
    %c4_133 = arith.constant 4 : index
    %c0_134 = arith.constant 0 : index
    %378 = vector.load %arg5[%c4_133, %c0_134] : memref<8x128xf32, #tpu.memory_space<vmem>>, vector<1x128xf32>
    %c5_135 = arith.constant 5 : index
    %c0_136 = arith.constant 0 : index
    %379 = vector.load %arg5[%c5_135, %c0_136] : memref<8x128xf32, #tpu.memory_space<vmem>>, vector<1x128xf32>
    %c6_137 = arith.constant 6 : index
    %c0_138 = arith.constant 0 : index
    %380 = vector.load %arg5[%c6_137, %c0_138] : memref<8x128xf32, #tpu.memory_space<vmem>>, vector<1x128xf32>
    %c7_139 = arith.constant 7 : index
    %c0_140 = arith.constant 0 : index
    %381 = vector.load %arg5[%c7_139, %c0_140] : memref<8x128xf32, #tpu.memory_space<vmem>>, vector<1x128xf32>
    %c0_141 = arith.constant 0 : index
    %c1152_142 = arith.constant 1152 : index
    %382 = vector.load %arg3[%c0_141, %c1152_142] : memref<128x1280xbf16, #tpu.memory_space<vmem>>, vector<128x128xbf16>
    %383 = arith.truncf %377 : vector<16x128xf32> to vector<16x128xbf16>
    %cst_143 = arith.constant dense<0.000000e+00> : vector<16x128xf32>
    %384 = tpu.matmul %383, %382, %cst_143 {dimension_numbers = #tpu.dot_dimension_numbers<[1], [0], [0], [1], [0, 0, 1, 1], [], []>} : vector<16x128xbf16>, vector<128x128xbf16>, vector<16x128xf32> -> vector<16x128xf32>
    %385 = vector.broadcast %378 : vector<1x128xf32> to vector<16x128xf32>
    %386 = arith.addf %384, %385 : vector<16x128xf32>
    %cst_144 = arith.constant 0.000000e+00 : f32
    %387 = vector.broadcast %cst_144 : f32 to vector<16x128xf32>
    %388 = arith.maximumf %386, %387 : vector<16x128xf32>
    %c0_145 = arith.constant 0 : index
    %c128_146 = arith.constant 128 : index
    %389 = vector.load %arg4[%c0_145, %c128_146] : memref<128x256xbf16, #tpu.memory_space<vmem>>, vector<128x128xbf16>
    %390 = arith.truncf %388 : vector<16x128xf32> to vector<16x128xbf16>
    %cst_147 = arith.constant dense<0.000000e+00> : vector<16x128xf32>
    %391 = tpu.matmul %390, %389, %cst_147 {dimension_numbers = #tpu.dot_dimension_numbers<[1], [0], [0], [1], [0, 0, 1, 1], [], []>} : vector<16x128xbf16>, vector<128x128xbf16>, vector<16x128xf32> -> vector<16x128xf32>
    %392 = arith.addf %377, %391 : vector<16x128xf32>
    %393 = vector.broadcast %379 : vector<1x128xf32> to vector<16x128xf32>
    %394 = arith.addf %392, %393 : vector<16x128xf32>
    %cst_148 = arith.constant dense<0.000000e+00> : vector<16xf32>
    %395 = vector.multi_reduction <add>, %394, %cst_148 [1] : vector<16x128xf32> to vector<16xf32>
    %396 = vector.shape_cast %395 : vector<16xf32> to vector<16x1xf32>
    %cst_149 = arith.constant 1.280000e+02 : f32
    %397 = vector.broadcast %cst_149 : f32 to vector<16x1xf32>
    %398 = arith.divf %396, %397 : vector<16x1xf32>
    %399 = vector.broadcast %398 : vector<16x1xf32> to vector<16x128xf32>
    %400 = arith.subf %394, %399 : vector<16x128xf32>
    %401 = arith.mulf %400, %400 : vector<16x128xf32>
    %cst_150 = arith.constant dense<0.000000e+00> : vector<16xf32>
    %402 = vector.multi_reduction <add>, %401, %cst_150 [1] : vector<16x128xf32> to vector<16xf32>
    %403 = vector.shape_cast %402 : vector<16xf32> to vector<16x1xf32>
    %cst_151 = arith.constant 1.280000e+02 : f32
    %404 = vector.broadcast %cst_151 : f32 to vector<16x1xf32>
    %405 = arith.divf %403, %404 : vector<16x1xf32>
    %406 = vector.broadcast %398 : vector<16x1xf32> to vector<16x128xf32>
    %407 = arith.subf %394, %406 : vector<16x128xf32>
    %cst_152 = arith.constant 9.99999974E-6 : f32
    %408 = vector.broadcast %cst_152 : f32 to vector<16x1xf32>
    %409 = arith.addf %405, %408 : vector<16x1xf32>
    %410 = math.rsqrt %409 : vector<16x1xf32>
    %411 = vector.broadcast %410 : vector<16x1xf32> to vector<16x128xf32>
    %412 = arith.mulf %407, %411 : vector<16x128xf32>
    %413 = vector.broadcast %380 : vector<1x128xf32> to vector<16x128xf32>
    %414 = arith.mulf %412, %413 : vector<16x128xf32>
    %415 = vector.broadcast %381 : vector<1x128xf32> to vector<16x128xf32>
    %416 = arith.addf %414, %415 : vector<16x128xf32>
    %417 = vector.shape_cast %416 : vector<16x128xf32> to vector<2x8x128xf32>
    %418 = arith.addf %338, %417 : vector<2x8x128xf32>
    %cst_153 = arith.constant dense<0.000000e+00> : vector<2x128xf32>
    %419 = vector.multi_reduction <add>, %418, %cst_153 [1] : vector<2x8x128xf32> to vector<2x128xf32>
    %420 = vector.shape_cast %419 : vector<2x128xf32> to vector<2x1x128xf32>
    %cst_154 = arith.constant 8.000000e+00 : f32
    %421 = vector.broadcast %cst_154 : f32 to vector<2x1x128xf32>
    %422 = arith.divf %420, %421 : vector<2x1x128xf32>
    %423 = vector.broadcast %422 : vector<2x1x128xf32> to vector<2x8x128xf32>
    %424 = arith.subf %418, %423 : vector<2x8x128xf32>
    %425 = arith.mulf %424, %424 : vector<2x8x128xf32>
    %cst_155 = arith.constant dense<0.000000e+00> : vector<2x128xf32>
    %426 = vector.multi_reduction <add>, %425, %cst_155 [1] : vector<2x8x128xf32> to vector<2x128xf32>
    %427 = vector.shape_cast %426 : vector<2x128xf32> to vector<2x1x128xf32>
    %cst_156 = arith.constant 8.000000e+00 : f32
    %428 = vector.broadcast %cst_156 : f32 to vector<2x1x128xf32>
    %429 = arith.divf %427, %428 : vector<2x1x128xf32>
    %430 = vector.broadcast %422 : vector<2x1x128xf32> to vector<2x8x128xf32>
    %431 = arith.subf %418, %430 : vector<2x8x128xf32>
    %cst_157 = arith.constant 9.99999974E-6 : f32
    %432 = vector.broadcast %cst_157 : f32 to vector<2x1x128xf32>
    %433 = arith.addf %429, %432 : vector<2x1x128xf32>
    %434 = math.rsqrt %433 : vector<2x1x128xf32>
    %435 = vector.broadcast %434 : vector<2x1x128xf32> to vector<2x8x128xf32>
    %436 = arith.mulf %431, %435 : vector<2x8x128xf32>
    %cst_158 = arith.constant 0.000000e+00 : f32
    %437 = vector.broadcast %cst_158 : f32 to vector<2x8x128xf32>
    %438 = arith.maximumf %436, %437 : vector<2x8x128xf32>
    %c0_159 = arith.constant 0 : index
    %c0_160 = arith.constant 0 : index
    %c0_161 = arith.constant 0 : index
    %439 = vector.load %arg6[%c0_159, %c0_160, %c0_161] : memref<2x8x128xf32, #tpu.memory_space<vmem>>, vector<2x8x128xf32>
    tpu.vector_store %arg6[%c0_159, %c0_160, %c0_161], %438 {strides = array<i32>} : memref<2x8x128xf32, #tpu.memory_space<vmem>>, vector<2x8x128xf32>,
    return
  }
  func.func @transform_0(%arg0: i32) -> (i32, i32, i32) {
    %c0_i32 = arith.constant 0 : i32
    %c0_i32_0 = arith.constant 0 : i32
    %c0_i32_1 = arith.constant 0 : i32
    return %arg0, %c0_i32, %c0_i32_0 : i32, i32, i32
  }
  func.func @transform_1(%arg0: i32) -> (i32, i32, i32) {
    %c0_i32 = arith.constant 0 : i32
    %c0_i32_0 = arith.constant 0 : i32
    %c0_i32_1 = arith.constant 0 : i32
    return %arg0, %c0_i32, %c0_i32_0 : i32, i32, i32
  }
  func.func @transform_2(%arg0: i32) -> (i32, i32) {
    %c0_i32 = arith.constant 0 : i32
    %c0_i32_0 = arith.constant 0 : i32
    %c0_i32_1 = arith.constant 0 : i32
    return %c0_i32, %c0_i32_0 : i32, i32
  }
  func.func @transform_3(%arg0: i32) -> (i32, i32) {
    %c0_i32 = arith.constant 0 : i32
    %c0_i32_0 = arith.constant 0 : i32
    %c0_i32_1 = arith.constant 0 : i32
    return %c0_i32, %c0_i32_0 : i32, i32
  }
  func.func @transform_4(%arg0: i32) -> (i32, i32) {
    %c0_i32 = arith.constant 0 : i32
    %c0_i32_0 = arith.constant 0 : i32
    %c0_i32_1 = arith.constant 0 : i32
    return %c0_i32, %c0_i32_0 : i32, i32
  }
  func.func @transform_5(%arg0: i32) -> (i32, i32, i32) {
    %c0_i32 = arith.constant 0 : i32
    %c0_i32_0 = arith.constant 0 : i32
    %c0_i32_1 = arith.constant 0 : i32
    return %arg0, %c0_i32, %c0_i32_0 : i32, i32, i32
  }
}

</mosaic_0001>

<bundles_post_ra>
// kernel: transformer_decoder.1
= control target key start
LH: loop header
LB: loop body
LE: loop exit
PB: predicated region body
PF: predicated region fallthrough
CT: control target
= control target key end

     0   :  { %10 = vsyncpa [#allocation3], 0  ;;  %s5155_s0 = inlined_call_operand.vmem [shape: f32[2,8,128], index: 0, kind: input, shape index: {}]   ;;  %s5156_s1 = inlined_call_operand.vmem [shape: f32[2,16,128], index: 1, kind: input, shape index: {}]   ;;  %s5157_s2 = inlined_call_operand.hbm [shape: bf16[128,1280], index: 2, kind: input, shape index: {}]   ;;  %s5158_s3 = inlined_call_operand.hbm [shape: bf16[128,256], index: 3, kind: input, shape index: {}]   ;;  %s5159_s4 = inlined_call_operand.vmem [shape: f32[8,128], index: 4, kind: input, shape index: {}]   ;;  %s5160_s5 = inlined_call_operand.vmem [shape: f32[2,8,128], index: 5, kind: output, shape index: {}]  }
   0x1   :  { %11 = vsyncpa [#allocation5], 0  ;;  %s4680_s18 = smov [#allocation2]  }
   0x2   :  { %s21_s19 = sshll.u32 %s4680_s18, 4  ;;  %s22_s19 = int_to_ptr.vmem [resolvable:$true] %s21_s19 }
   0x3   :  { %s4644_s20 = scalar_lea.vmem %s22_s19, 10240  ;;  %p4649_p1 = scmp.lt.s32.totalorder %s22_s19, %s22_s19 }
   0x4   :  { %p4645_p0 = scmp.ne.s32.totalorder %s22_s19, %s4644_s20  ;;  %p4650_p2 = scmp.lt.s32.totalorder %s4644_s20, %s4644_s20 }
   0x6   :  { %p4651_p3 = por %p4650_p2, %p4649_p1 }
   0x8   :  { %p4652_p4 = pnand %p4651_p3, %p4645_p0 }
   0xa   :  { %4655 = shalt.err (!%p4652_p4)
}
   0xb   :  { %s4681_s21 = smov 640   ;;  %s4682_s22 = smov 40  }
   0xc   :  { %27 = dma.hbm_to_vmem [thread:$0]  %s5157_s2, 10240, %s22_s19, [#allocation3], %s4681_s21, %s4681_s21, %s4682_s22  }
   0xd   :  { %s4683_s25 = smov [#allocation4]  }
   0xe   :  { %s33_s26 = sshll.u32 %s4683_s25, 4  ;;  %s34_s26 = int_to_ptr.vmem [resolvable:$true] %s33_s26 }
   0xf   :  { %s4664_s27 = scalar_lea.vmem %s34_s26, 2048  ;;  %p4669_p6 = scmp.lt.s32.totalorder %s34_s26, %s34_s26 }
  0x10   :  { %p4665_p5 = scmp.ne.s32.totalorder %s34_s26, %s4664_s27  ;;  %p4670_p7 = scmp.lt.s32.totalorder %s4664_s27, %s4664_s27 }
  0x12   :  { %p4671_p8 = por %p4670_p7, %p4669_p6 }
  0x14   :  { %p4672_p9 = pnand %p4671_p8, %p4665_p5 }
  0x16   :  { %4675 = shalt.err (!%p4672_p9)
}
  0x17   :  { %s4684_s28 = smov 128   ;;  %s4685_s29 = smov 8  }
  0x18   :  { %39 = dma.hbm_to_vmem [thread:$0]  %s5158_s3, 2048, %s34_s26, [#allocation5], %s4684_s28, %s4684_s28, %s4685_s29  }
  0x19   :  { %4676 = dma.done.wait [#allocation3], 10240  }
  0x1a   :  { %4677 = vsyncadd [#allocation3], 4294957056 }
  0x1b   :  { %4678 = dma.done.wait [#allocation5], 2048  }
  0x1c   :  { %4679 = vsyncadd [#allocation5], 4294965248  ;;  %v4686_v0 = vmov 0   ;;  %v4322_v1 = vld [vmem:[#allocation2 + $0x234] ss:$40 sps:$4 sm:$0xff]   ;;  %v4730_v17 = vld [vmem:[%s5155_s0] sm:$0xff] }
  0x1d   :  { %423 = vmatprep.mubr.bf16.mxu1 %v4686_v0  ;;  %183 = vmatprep.mubr.bf16.mxu0 %v4686_v0  ;;  %v4324_v2 = vld [vmem:[#allocation2 + $0x230] ss:$40 sps:$4 sm:$0xff]   ;;  %v4325_v3 = vld [vmem:[#allocation2 + $0x1e4] ss:$40 sps:$4 sm:$0xff]   ;;  %v4327_v4 = vld [vmem:[#allocation2 + $0x1e0] ss:$40 sps:$4 sm:$0xff]  }
  0x1e   :  { %391 = vmatprep.subr.bf16.mxu1 %v4322_v1  ;;  %v4328_v5 = vld [vmem:[#allocation2 + $0x194] ss:$40 sps:$4 sm:$0xff]   ;;  %v4330_v6 = vld [vmem:[#allocation2 + $0x190] ss:$40 sps:$4 sm:$0xff]   ;;  %v4331_v7 = vld [vmem:[#allocation2 + $0x144] ss:$40 sps:$4 sm:$0xff]  }
  0x1f   :  { %392 = vmatpush1.bf16.msra.mxu1 %v4324_v2  ;;  %v4333_v8 = vld [vmem:[#allocation2 + $0x140] ss:$40 sps:$4 sm:$0xff]   ;;  %v4334_v9 = vld [vmem:[#allocation2 + $0xf4] ss:$40 sps:$4 sm:$0xff]   ;;  %v4336_v10 = vld [vmem:[#allocation2 + $0xf0] ss:$40 sps:$4 sm:$0xff]  }
  0x20   :  { %393 = vmatprep.subr.bf16.mxu1 %v4325_v3  ;;  %v4337_v11 = vld [vmem:[#allocation2 + $0xa4] ss:$40 sps:$4 sm:$0xff]   ;;  %v4339_v12 = vld [vmem:[#allocation2 + $0xa0] ss:$40 sps:$4 sm:$0xff]   ;;  %v4340_v13 = vld [vmem:[#allocation2 + $0x54] ss:$40 sps:$4 sm:$0xff]  }
  0x21   :  { %v4342_v14 = vld [vmem:[#allocation2 + $0x50] ss:$40 sps:$4 sm:$0xff]   ;;  %v4343_v15 = vld [vmem:[#allocation2 + $0x4] ss:$40 sps:$4 sm:$0xff]   ;;  %v4345_v16 = vld [vmem:[#allocation2] ss:$40 sps:$4 sm:$0xff]  }
  0x22   :  { %v4735_v18 = vld [vmem:[%s5155_s0 + $0x8] sm:$0xff]  ;;  %v4687_v28 = vmov 0.0   ;;  %vm4688_vm0 = vmmov 0   ;;  %v4349_v31 = vld [vmem:[#allocation2 + $0x1fc] ss:$40 sps:$4 sm:$0xff]   ;;  %v51_v50 = vld [vmem:[%s5156_s1 + $0x10] sm:$0xff] }
  0x23   :  { %394 = vmatpush1.bf16.msra.mxu1 %v4327_v4  ;;  %v4739_v19 = vpack.c.bf16 %v4735_v18, %v4730_v17  ;;  %v4346_v29 = vld [vmem:[#allocation2 + $0x24c] ss:$40 sps:$4 sm:$0xff]   ;;  %v4348_v30 = vld [vmem:[#allocation2 + $0x248] ss:$40 sps:$4 sm:$0xff]   ;;  %v4351_v32 = vld [vmem:[#allocation2 + $0x1f8] ss:$40 sps:$4 sm:$0xff]  }
  0x24   :  { %395 = vmatprep.subr.bf16.mxu1 %v4328_v5  ;;  %151 = vmatprep.subr.bf16.mxu0 %v4346_v29  ;;  %v4352_v33 = vld [vmem:[#allocation2 + $0x1ac] ss:$40 sps:$4 sm:$0xff]   ;;  %v4354_v34 = vld [vmem:[#allocation2 + $0x1a8] ss:$40 sps:$4 sm:$0xff]   ;;  %v4355_v35 = vld [vmem:[#allocation2 + $0x15c] ss:$40 sps:$4 sm:$0xff]  }
  0x25   :  { %152 = vmatpush1.bf16.msra.mxu0 %v4348_v30  ;;  %v4357_v36 = vld [vmem:[#allocation2 + $0x158] ss:$40 sps:$4 sm:$0xff]   ;;  %v4358_v37 = vld [vmem:[#allocation2 + $0x10c] ss:$40 sps:$4 sm:$0xff]   ;;  %v4360_v38 = vld [vmem:[#allocation2 + $0x108] ss:$40 sps:$4 sm:$0xff]  }
  0x26   :  { %153 = vmatprep.subr.bf16.mxu0 %v4349_v31  ;;  %v4361_v39 = vld [vmem:[#allocation2 + $0xbc] ss:$40 sps:$4 sm:$0xff]   ;;  %v4363_v40 = vld [vmem:[#allocation2 + $0xb8] ss:$40 sps:$4 sm:$0xff]   ;;  %v4364_v41 = vld [vmem:[#allocation2 + $0x6c] ss:$40 sps:$4 sm:$0xff]  }
  0x27   :  { %396 = vmatpush1.bf16.msra.mxu1 %v4330_v6  ;;  %v4366_v42 = vld [vmem:[#allocation2 + $0x68] ss:$40 sps:$4 sm:$0xff]   ;;  %v4367_v43 = vld [vmem:[#allocation2 + $0x1c] ss:$40 sps:$4 sm:$0xff]   ;;  %v4369_v44 = vld [vmem:[#allocation2 + $0x18] ss:$40 sps:$4 sm:$0xff]  }
  0x28   :  { %397 = vmatprep.subr.bf16.mxu1 %v4331_v7  ;;  %v49_v45 = vld [vmem:[%s5156_s1] sm:$0xff]  ;;  %v50_v46 = vld [vmem:[%s5156_s1 + $0x8] sm:$0xff]  ;;  %v52_v51 = vld [vmem:[%s5156_s1 + $0x18] sm:$0xff]  ;;  %vm587_vm1 = vcmask 64512   ;;  %vm625_vm2 = vcmask 1043456   ;;  %vm1339_vm3 = vcmask 130048  }
  0x29   :  { %154 = vmatpush1.bf16.msra.mxu0 %v4351_v32  ;;  %v69_v47 = vpack.c.bf16 %v50_v46, %v49_v45  ;;  %v4370_v48 = vld [vmem:[#allocation2 + $0x238] ss:$40 sps:$4 sm:$0xff]   ;;  %v4371_v49 = vld [vmem:[#allocation2 + $0x1e8] ss:$40 sps:$4 sm:$0xff]   ;;  %v70_v52 = vpack.c.bf16 %v52_v51, %v51_v50  ;;  %v4379_v50 = vld [vmem:[#allocation2 + $0x1ec] ss:$40 sps:$4 sm:$0xff]  }
  0x2a   :  { %155 = vmatprep.subr.bf16.mxu0 %v4352_v33  ;;  %v4372_v53 = vld [vmem:[#allocation2 + $0x198] ss:$40 sps:$4 sm:$0xff]   ;;  %v4373_v54 = vld [vmem:[#allocation2 + $0x148] ss:$40 sps:$4 sm:$0xff]   ;;  %v4380_v51 = vld [vmem:[#allocation2 + $0x19c] ss:$40 sps:$4 sm:$0xff]  }
  0x2b   :  { %398 = vmatpush1.bf16.msra.mxu1 %v4333_v8  ;;  %v4374_v55 = vld [vmem:[#allocation2 + $0xf8] ss:$40 sps:$4 sm:$0xff]   ;;  %v4375_v56 = vld [vmem:[#allocation2 + $0xa8] ss:$40 sps:$4 sm:$0xff]  }
  0x2c   :  { %399 = vmatprep.subr.bf16.mxu1 %v4334_v9  ;;  %v4376_v57 = vld [vmem:[#allocation2 + $0x58] ss:$40 sps:$4 sm:$0xff]   ;;  %v4377_v58 = vld [vmem:[#allocation2 + $0x8] ss:$40 sps:$4 sm:$0xff]  }
  0x2d   :  { %156 = vmatpush1.bf16.msra.mxu0 %v4354_v34 }
  0x2e   :  { %157 = vmatprep.subr.bf16.mxu0 %v4355_v35 }
  0x2f   :  { %400 = vmatpush1.bf16.msra.mxu1 %v4336_v10 }
  0x30   :  { %401 = vmatprep.subr.bf16.mxu1 %v4337_v11 }
  0x31   :  { %158 = vmatpush1.bf16.msra.mxu0 %v4357_v36 }
  0x32   :  { %159 = vmatprep.subr.bf16.mxu0 %v4358_v37 }
  0x33   :  { %402 = vmatpush1.bf16.msra.mxu1 %v4339_v12 }
  0x34   :  { %403 = vmatprep.subr.bf16.mxu1 %v4340_v13 }
  0x35   :  { %160 = vmatpush1.bf16.msra.mxu0 %v4360_v38 }
  0x36   :  { %161 = vmatprep.subr.bf16.mxu0 %v4361_v39 }
  0x37   :  { %404 = vmatpush1.bf16.msra.mxu1 %v4342_v14 }
  0x38   :  { %405 = vmatprep.subr.bf16.mxu1 %v4343_v15 }
  0x39   :  { %162 = vmatpush1.bf16.msra.mxu0 %v4363_v40 }
  0x3a   :  { %163 = vmatprep.subr.bf16.mxu0 %v4364_v41 }
  0x3b   :  { %406 = vmatpush1.bf16.msra.mxu1 %v4345_v16 }
  0x3c   :  { %3917 = vmatprep.subr.bf16.mxu1 %v4687_v28 }
  0x3d   :  { %164 = vmatpush1.bf16.msra.mxu0 %v4366_v42 }
  0x3e   :  { %424 = vmatmul.mubr.bf16.vlgmr.msra.gmra.mxu1 %v4739_v19  ;;  %165 = vmatprep.subr.bf16.mxu0 %v4367_v43 }
  0x3f   :  { %3919 = vmatprep.mubr.msk.bf16.mxu1 %vm4688_vm0, %v4687_v28 }
  0x41   :  { %166 = vmatpush1.bf16.msra.mxu0 %v4369_v44 }
  0x42   :  { %3897 = vmatprep.subr.bf16.mxu0 %v4687_v28 }
  0x44   :  { %184 = vmatmul.mubr.bf16.vlgmr.msra.gmra.mxu0 %v69_v47 }
  0x45   :  { %3898 = vmatpush3.bf16.msra.mxu0 %v4370_v48  ;;  %193 = vmatprep.mubr.bf16.mxu0 %v4686_v0 }
  0x46   :  { %3899 = vmatprep.subr.bf16.mxu0 %v4687_v28 }
  0x49   :  { %3900 = vmatpush3.bf16.msra.mxu0 %v4371_v49  ;;  %v4378_v49 = vld [vmem:[#allocation2 + $0x23c] ss:$40 sps:$4 sm:$0xff]  }
  0x4a   :  { %3901 = vmatprep.subr.bf16.mxu0 %v4687_v28 }
  0x4c   :  { %194 = vmatmul.mubr.bf16.gmra.mxu0 %v70_v52  ;;  %v4381_v52 = vld [vmem:[#allocation2 + $0x14c] ss:$40 sps:$4 sm:$0xff]  }
  0x4d   :  { %3902 = vmatpush3.bf16.msra.mxu0 %v4372_v53  ;;  %3913 = vmatprep.mubr.msk.bf16.mxu0 %vm4688_vm0, %v4687_v28  ;;  %v4382_v53 = vld [vmem:[#allocation2 + $0xfc] ss:$40 sps:$4 sm:$0xff]  }
  0x4e   :  { %3903 = vmatprep.subr.bf16.mxu0 %v4687_v28 }
  0x51   :  { %3904 = vmatpush3.bf16.msra.mxu0 %v4373_v54 }
  0x52   :  { %3905 = vmatprep.subr.bf16.mxu0 %v4687_v28 }
  0x55   :  { %3906 = vmatpush3.bf16.msra.mxu0 %v4374_v55 }
  0x56   :  { %3907 = vmatprep.subr.bf16.mxu0 %v4687_v28 }
  0x59   :  { %3908 = vmatpush3.bf16.msra.mxu0 %v4375_v56 }
  0x5a   :  { %3909 = vmatprep.subr.bf16.mxu0 %v4687_v28 }
  0x5d   :  { %3910 = vmatpush3.bf16.msra.mxu0 %v4376_v57 }
  0x5e   :  { %3911 = vmatprep.subr.bf16.mxu0 %v4687_v28 }
  0x61   :  { %3912 = vmatpush3.bf16.msra.mxu0 %v4377_v58 }
  0x62   :  { %3941 = vmatprep.subr.bf16.mxu0 %v4687_v28 }
  0x64   :  { %3914 = vmatmul.mubr.bf16.vlgmr.msra.gmra.mxu0 %v4739_v19 }
  0x65   :  { %3957 = vmatprep.mubr.msk.bf16.mxu0 %vm4688_vm0, %v4687_v28  ;;  %3942 = vmatpush3.bf16.msra.mxu0 %v4378_v49 }
  0x66   :  { %3943 = vmatprep.subr.bf16.mxu0 %v4687_v28 }
  0x69   :  { %3944 = vmatpush3.bf16.msra.mxu0 %v4379_v50  ;;  %v4392_v50 = vld [vmem:[#allocation2 + $0x60] ss:$40 sps:$4 sm:$0xff]  }
  0x6a   :  { %3945 = vmatprep.subr.bf16.mxu0 %v4687_v28 }
  0x6d   :  { %3946 = vmatpush3.bf16.msra.mxu0 %v4380_v51  ;;  %v4393_v51 = vld [vmem:[#allocation2 + $0x10] ss:$40 sps:$4 sm:$0xff]  }
  0x6e   :  { %3947 = vmatprep.subr.bf16.mxu0 %v4687_v28 }
  0x71   :  { %3948 = vmatpush3.bf16.msra.mxu0 %v4381_v52  ;;  %v4394_v52 = vld [vmem:[#allocation4 + $0x70] ss:$8 sps:$4 sm:$0xff]  }
  0x72   :  { %3949 = vmatprep.subr.bf16.mxu0 %v4687_v28 }
  0x75   :  { %3950 = vmatpush3.bf16.msra.mxu0 %v4382_v53  ;;  %v4397_v53 = vld [vmem:[#allocation4 + $0x40] ss:$8 sps:$4 sm:$0xff]  }
  0x76   :  { %3951 = vmatprep.subr.bf16.mxu0 %v4687_v28 }
  0xfe   :  { %v4742_v20 = vpop.f32.mrf.mxu1 }
  0xff   :  { %v475_v25 = vmul.f32 %v4742_v20, %v4742_v20 }
 0x100   :  { %v4744_v21 = vpop.f32.mrf.mxu1 }
 0x101   :  { %v487_v22 = vmul.f32 %v4744_v21, %v4744_v21 }
 0x102   :  { %v4748_v23 = vpop.f32.mrf.mxu1 }
 0x103   :  { %489 = vadd.xlane.f32.xlu0 %v487_v22  ;;  %v476_v27 = vmul.f32 %v4748_v23, %v4748_v23 }
 0x104   :  { %v4750_v24 = vpop.f32.mrf.mxu1  ;;  %v4800_v33 = vpop.f32.mrf.mxu0 }
 0x105   :  { %v488_v26 = vmul.f32 %v4750_v24, %v4750_v24 }
 0x106   :  { %v187_v34 = vpop.f32.mrf.mxu0 }
 0x107   :  { %477 = vadd.xlane.f32.xlu0 %v475_v25  ;;  %491 = vadd.xlane.f32.xlu1 %v488_v26 }
 0x108   :  { %v4802_v35 = vpop.f32.mrf.mxu0 }
 0x10a   :  { %v191_v36 = vpop.f32.mrf.mxu0 }
 0x10b   :  { %479 = vadd.xlane.f32.xlu1 %v476_v27  ;;  %v4804_v37 = vpack.c.bf16 %v191_v36, %v187_v34 }
 0x10c   :  { %v4806_v38 = vpop.f32.mrf.mxu0 }
 0x10e   :  { %v197_v39 = vpop.f32.mrf.mxu0 }
 0x110   :  { %v4808_v40 = vpop.f32.mrf.mxu0 }
 0x112   :  { %v201_v41 = vpop.f32.mrf.mxu0 }
 0x113   :  { %v4810_v42 = vpack.c.bf16 %v201_v41, %v197_v39 }
 0x124   :  { %v468_v43 = vpop.f32.mrf.mxu0 }
 0x125   :  { %v620_v44 = vpack.c.bf16 %v468_v43, %v468_v43 }
 0x126   :  { %v3915_v45 = vpop.f32.mrf.mxu0 }
 0x127   :  { %v627_v46 = vsel %vm625_vm2, %v620_v44, 0 }
 0x128   :  { %v471_v47 = vpop.f32.mrf.mxu0 }
 0x12a   :  { %v3916_v48 = vpop.f32.mrf.mxu0 }
 0x18c   :  { %v490_v59 = vpop.xlane.xlu0 %489 }
 0x18d   :  { %v493_v60 = vmax.f32 %v490_v59, 1e-24 }
 0x18f   :  { %4522 = vrsqrt.f32 %v493_v60 }
 0x190   :  { %v478_v61 = vpop.xlane.xlu0 %477  ;;  %v492_v62 = vpop.xlane.xlu1 %491 }
 0x191   :  { %v481_v63 = vmax.f32 %v478_v61, 1e-24  ;;  %v494_v1 = vmax.f32 %v492_v62, 1e-24 }
 0x193   :  { %4524 = vrsqrt.f32 %v481_v63 }
 0x194   :  { %4526 = vrsqrt.f32 %v494_v1  ;;  %v480_v2 = vpop.xlane.xlu1 %479 }
 0x195   :  { %v482_v3 = vmax.f32 %v480_v2, 1e-24 }
 0x197   :  { %4528 = vrsqrt.f32 %v482_v3 }
 0x19c   :  { %v4523_v4 = vpop.eup %4522 }
 0x19d   :  { %v497_v5 = vmul.f32 %v4523_v4, %v4744_v21 }
 0x19f   :  { %v501_v6 = vpack.c.bf16 %v497_v5, %v497_v5 }
 0x1a0   :  { %v4525_v7 = vpop.eup %4524 }
 0x1a1   :  { %v4527_v8 = vpop.eup %4526  ;;  %3918 = vmatpush3.bf16.xpose.msra.mxu1 %v501_v6  ;;  %v485_v9 = vmul.f32 %v4525_v7, %v4742_v20 }
 0x1a2   :  { %3923 = vmatprep.subr.bf16.mxu1 %v4687_v28  ;;  %v498_v10 = vmul.f32 %v4527_v8, %v4750_v24 }
 0x1a3   :  { %v499_v11 = vpack.c.bf16 %v485_v9, %v485_v9 }
 0x1a4   :  { %v4529_v12 = vpop.eup %4528  ;;  %v502_v13 = vpack.c.bf16 %v498_v10, %v498_v10 }
 0x1a5   :  { %v486_v14 = vmul.f32 %v4529_v12, %v4748_v23 }
 0x1a7   :  { %v500_v15 = vpack.c.bf16 %v486_v14, %v486_v14  ;;  %v621_v14 = vpack.c.bf16 %v471_v47, %v471_v47 }
 0x1a8   :  { %3920 = vmatmul.mubr.bf16.vlgmr.msra.gmra.mxu1 %v499_v11 }
 0x1a9   :  { %3924 = vmatpush3.bf16.xpose.msra.mxu1 %v502_v13  ;;  %3925 = vmatprep.mubr.msk.bf16.mxu1 %vm4688_vm0, %v4687_v28 }
 0x1aa   :  { %3929 = vmatprep.subr.bf16.mxu1 %v4687_v28 }
 0x1b0   :  { %3926 = vmatmul.mubr.bf16.vlgmr.msra.gmra.mxu1 %v500_v15 }
 0x1b1   :  { %3931 = vmatprep.mubr.msk.bf16.mxu1 %vm4688_vm0, %v4687_v28  ;;  %3930 = vmatpush3.bf16.msra.mxu1 %v627_v46 }
 0x1b2   :  { %3935 = vmatprep.subr.bf16.mxu1 %v4687_v28 }
 0x268   :  { %v537_v16 = vpop.f32.mrf.mxu1 }
 0x269   :  { %v583_v19 = vmul.f32 1.442695, %v537_v16 }
 0x26a   :  { %v3921_v20 = vpop.f32.mrf.mxu1 }
 0x26b   :  { %4530 = vpow2.f32 %v583_v19  ;;  %v673_v19 = vsel %vm625_vm2, %v621_v14, 0 }
 0x26c   :  { %v540_v21 = vpop.f32.mrf.mxu1 }
 0x26e   :  { %v3922_v22 = vpop.f32.mrf.mxu1 }
 0x270   :  { %v577_v24 = vpop.f32.mrf.mxu1 }
 0x271   :  { %v585_v25 = vmul.f32 1.442695, %v577_v24  ;;  %v4383_v24 = vld [vmem:[#allocation2 + $0xac] ss:$40 sps:$4 sm:$0xff]  }
 0x272   :  { %v3927_v26 = vpop.f32.mrf.mxu1  ;;  %3952 = vmatpush3.bf16.msra.mxu0 %v4383_v24 }
 0x273   :  { %4532 = vpow2.f32 %v585_v25  ;;  %3953 = vmatprep.subr.bf16.mxu0 %v4687_v28  ;;  %v4384_v25 = vld [vmem:[#allocation2 + $0x5c] ss:$40 sps:$4 sm:$0xff]   ;;  %v4385_v26 = vld [vmem:[#allocation2 + $0xc] ss:$40 sps:$4 sm:$0xff]  }
 0x274   :  { %v580_v27 = vpop.f32.mrf.mxu1 }
 0x275   :  { %v4386_v27 = vld [vmem:[#allocation2 + $0x240] ss:$40 sps:$4 sm:$0xff]  }
 0x276   :  { %v3928_v29 = vpop.f32.mrf.mxu1  ;;  %3954 = vmatpush3.bf16.msra.mxu0 %v4384_v25 }
 0x277   :  { %3955 = vmatprep.subr.bf16.mxu0 %v4687_v28  ;;  %v4387_v29 = vld [vmem:[#allocation2 + $0x1f0] ss:$40 sps:$4 sm:$0xff]  }
 0x278   :  { %v4531_v23 = vpop.eup %4530 }
 0x279   :  { %v588_v30 = vsel %vm587_vm1, %v4531_v23, 0.0 }
 0x27a   :  { %589 = vadd.xlane.f32.xlu0 %v588_v30  ;;  %3956 = vmatpush3.bf16.msra.mxu0 %v4385_v26  ;;  %v4389_v30 = vld [vmem:[#allocation2 + $0x150] ss:$40 sps:$4 sm:$0xff]  }
 0x27b   :  { %3981 = vmatprep.subr.bf16.mxu0 %v4687_v28 }
 0x280   :  { %v4533_v31 = vpop.eup %4532 }
 0x281   :  { %v591_v32 = vsel %vm587_vm1, %v4533_v31, 0.0 }
 0x282   :  { %592 = vadd.xlane.f32.xlu1 %v591_v32  ;;  %v4391_v32 = vld [vmem:[#allocation2 + $0xb0] ss:$40 sps:$4 sm:$0xff]  }
 0x303   :  { %v590_v54 = vpop.xlane.xlu0 %589 }
 0x304   :  { %4534 = vrcp.f32 %v590_v54  ;;  %v4398_v54 = vld [vmem:[#allocation4 + $0x30] ss:$8 sps:$4 sm:$0xff]  }
 0x30b   :  { %v593_v55 = vpop.xlane.xlu1 %592 }
 0x30c   :  { %4536 = vrcp.f32 %v593_v55 }
 0x311   :  { %v4535_v56 = vpop.eup %4534 }
 0x312   :  { %v596_v57 = vmul.f32 %v4535_v56, %v4531_v23  ;;  %v4388_v23 = vld [vmem:[#allocation2 + $0x1a0] ss:$40 sps:$4 sm:$0xff]  }
 0x314   :  { %v598_v58 = vsel %vm587_vm1, %v596_v57, 0.0 }
 0x315   :  { %v599_v59 = vrot.slane %v598_v58, 4 }
 0x317   :  { %v600_v60 = vadd.f32 %v599_v59, %v598_v58 }
 0x319   :  { %v4537_v61 = vpop.eup %4536  ;;  %v601_v62 = vrot.slane %v600_v60, 2 }
 0x31a   :  { %v597_v63 = vmul.f32 %v4537_v61, %v4533_v31  ;;  %v4390_v31 = vld [vmem:[#allocation2 + $0x100] ss:$40 sps:$4 sm:$0xff]  }
 0x31b   :  { %v602_v1 = vadd.f32 %v601_v62, %v600_v60  ;;  %v4399_v62 = vld [vmem:[#allocation4 + $0x20] ss:$8 sps:$4 sm:$0xff]  }
 0x31c   :  { %v605_v2 = vsel %vm587_vm1, %v597_v63, 0.0 }
 0x31d   :  { %v603_v3 = vrot.slane %v602_v1, 1  ;;  %v606_v4 = vrot.slane %v605_v2, 4 }
 0x31f   :  { %v604_v5 = vadd.f32 %v603_v3, %v602_v1  ;;  %v607_v6 = vadd.f32 %v606_v4, %v605_v2  ;;  %v4401_v1 = vld [vmem:[#allocation4] ss:$8 sps:$4 sm:$0xff]  }
 0x320   :  { %v3571_v2 = vld [vmem:[%s5159_s4] ss:$0 sm:$0xff] }
 0x321   :  { %v612_v7 = vadd.f32 1e-09, %v604_v5  ;;  %v608_v8 = vrot.slane %v607_v6, 2 }
 0x323   :  { %4538 = vrcp.f32 %v612_v7  ;;  %v609_v9 = vadd.f32 %v608_v8, %v607_v6 }
 0x325   :  { %v610_v10 = vrot.slane %v609_v9, 1 }
 0x327   :  { %v611_v11 = vadd.f32 %v610_v10, %v609_v9 }
 0x329   :  { %v613_v12 = vadd.f32 1e-09, %v611_v11 }
 0x32b   :  { %4540 = vrcp.f32 %v613_v12 }
 0x330   :  { %v4539_v13 = vpop.eup %4538 }
 0x331   :  { %v616_v15 = vmul.f32 %v4539_v13, %v596_v57  ;;  %v3588_v13 = vld [vmem:[%s5159_s4 + $0x1] ss:$0 sm:$0xff] }
 0x333   :  { %v618_v16 = vpack.c.bf16 %v616_v15, %v616_v15 }
 0x335   :  { %3932 = vmatmul.mubr.msk.bf16.vlgmr.msra.gmra.mxu1 %vm587_vm1, %v618_v16 }
 0x336   :  { %3936 = vmatpush3.bf16.msra.mxu1 %v673_v19  ;;  %3937 = vmatprep.mubr.msk.bf16.mxu1 %vm4688_vm0, %v4687_v28 }
 0x337   :  { %3961 = vmatprep.subr.bf16.mxu1 %v4687_v28 }
 0x338   :  { %v4541_v20 = vpop.eup %4540 }
 0x339   :  { %v617_v21 = vmul.f32 %v4541_v20, %v597_v63  ;;  %v4400_v63 = vld [vmem:[#allocation4 + $0x10] ss:$8 sps:$4 sm:$0xff]  }
 0x33b   :  { %v619_v22 = vpack.c.bf16 %v617_v21, %v617_v21 }
 0x33d   :  { %3938 = vmatmul.mubr.msk.bf16.vlgmr.msra.gmra.mxu1 %vm587_vm1, %v619_v22 }
 0x33e   :  { %3977 = vmatprep.mubr.msk.bf16.mxu1 %vm4688_vm0, %v4687_v28  ;;  %3962 = vmatpush3.bf16.msra.mxu1 %v4386_v27 }
 0x33f   :  { %3963 = vmatprep.subr.bf16.mxu1 %v4687_v28 }
 0x342   :  { %3964 = vmatpush3.bf16.msra.mxu1 %v4387_v29 }
 0x343   :  { %3965 = vmatprep.subr.bf16.mxu1 %v4687_v28 }
 0x346   :  { %3966 = vmatpush3.bf16.msra.mxu1 %v4388_v23 }
 0x347   :  { %3967 = vmatprep.subr.bf16.mxu1 %v4687_v28 }
 0x34a   :  { %3968 = vmatpush3.bf16.msra.mxu1 %v4389_v30 }
 0x34b   :  { %3969 = vmatprep.subr.bf16.mxu1 %v4687_v28 }
 0x34e   :  { %3970 = vmatpush3.bf16.msra.mxu1 %v4390_v31  ;;  %v204_v31 = vmul.f32 %v4800_v33, %v4800_v33 }
 0x34f   :  { %3971 = vmatprep.subr.bf16.mxu1 %v4687_v28 }
 0x352   :  { %3972 = vmatpush3.bf16.msra.mxu1 %v4391_v32 }
 0x353   :  { %3973 = vmatprep.subr.bf16.mxu1 %v4687_v28 }
 0x356   :  { %3974 = vmatpush3.bf16.msra.mxu1 %v4392_v50 }
 0x357   :  { %3975 = vmatprep.subr.bf16.mxu1 %v4687_v28 }
 0x35a   :  { %3976 = vmatpush3.bf16.msra.mxu1 %v4393_v51 }
 0x35b   :  { %4001 = vmatprep.subr.bf16.mxu1 %v4687_v28 }
 0x3f5   :  { %v663_v34 = vpop.f32.mrf.mxu1 }
 0x3f6   :  { %v715_v44 = vsub.f32 %v4730_v17, %v663_v34  ;;  %v4395_v17 = vld [vmem:[#allocation4 + $0x60] ss:$8 sps:$4 sm:$0xff]   ;;  %v205_v34 = vmul.f32 %v4802_v35, %v4802_v35 }
 0x3f7   :  { %v3933_v36 = vpop.f32.mrf.mxu1 }
 0x3f8   :  { %v206_v36 = vmul.f32 %v4806_v38, %v4806_v38 }
 0x3f9   :  { %v666_v39 = vpop.f32.mrf.mxu1 }
 0x3fa   :  { %v4402_v39 = vld [vmem:[#allocation2 + $0x244] ss:$40 sps:$4 sm:$0xff]  }
 0x3fb   :  { %v3934_v41 = vpop.f32.mrf.mxu1 }
 0x3fc   :  { %v4403_v41 = vld [vmem:[#allocation2 + $0x1f4] ss:$40 sps:$4 sm:$0xff]  }
 0x3fd   :  { %v709_v43 = vpop.f32.mrf.mxu1 }
 0x3fe   :  { %v716_v45 = vsub.f32 %v4735_v18, %v709_v43  ;;  %v4396_v18 = vld [vmem:[#allocation4 + $0x50] ss:$8 sps:$4 sm:$0xff]   ;;  %v4404_v43 = vld [vmem:[#allocation2 + $0x1a4] ss:$40 sps:$4 sm:$0xff]  }
 0x3ff   :  { %v3939_v46 = vpop.f32.mrf.mxu1 }
 0x400   :  { %v733_v47 = vpack.c.bf16 %v716_v45, %v715_v44  ;;  %v4405_v44 = vld [vmem:[#allocation2 + $0x154] ss:$40 sps:$4 sm:$0xff]   ;;  %v4406_v45 = vld [vmem:[#allocation2 + $0x104] ss:$40 sps:$4 sm:$0xff]  }
 0x401   :  { %v712_v48 = vpop.f32.mrf.mxu1  ;;  %v4407_v46 = vld [vmem:[#allocation2 + $0xb4] ss:$40 sps:$4 sm:$0xff]  }
 0x402   :  { %3958 = vmatmul.mubr.bf16.vlgmr.msra.gmra.mxu0 %v733_v47  ;;  %v4408_v47 = vld [vmem:[#allocation2 + $0x64] ss:$40 sps:$4 sm:$0xff]   ;;  %v4409_v48 = vld [vmem:[#allocation2 + $0x14] ss:$40 sps:$4 sm:$0xff]  }
 0x403   :  { %v3940_v49 = vpop.f32.mrf.mxu1  ;;  %3997 = vmatprep.mubr.msk.bf16.mxu0 %vm4688_vm0, %v4687_v28  ;;  %3982 = vmatpush3.bf16.msra.mxu0 %v4394_v52 }
 0x404   :  { %3983 = vmatprep.subr.bf16.mxu0 %v4687_v28 }
 0x407   :  { %3984 = vmatpush3.bf16.msra.mxu0 %v4395_v17 }
 0x408   :  { %3985 = vmatprep.subr.bf16.mxu0 %v4687_v28 }
 0x40b   :  { %3986 = vmatpush3.bf16.msra.mxu0 %v4396_v18 }
 0x40c   :  { %3987 = vmatprep.subr.bf16.mxu0 %v4687_v28 }
 0x40f   :  { %3988 = vmatpush3.bf16.msra.mxu0 %v4397_v53 }
 0x410   :  { %3989 = vmatprep.subr.bf16.mxu0 %v4687_v28 }
 0x413   :  { %3990 = vmatpush3.bf16.msra.mxu0 %v4398_v54  ;;  %v3589_v54 = vld [vmem:[%s5159_s4 + $0x2] ss:$0 sm:$0xff] }
 0x414   :  { %3991 = vmatprep.subr.bf16.mxu0 %v4687_v28 }
 0x417   :  { %3992 = vmatpush3.bf16.msra.mxu0 %v4399_v62  ;;  %v4634_v62 = vld [vmem:[%s5155_s0] sm:$0xff] }
 0x418   :  { %3993 = vmatprep.subr.bf16.mxu0 %v4687_v28 }
 0x41b   :  { %3994 = vmatpush3.bf16.msra.mxu0 %v4400_v63 }
 0x41c   :  { %3995 = vmatprep.subr.bf16.mxu0 %v4687_v28 }
 0x41f   :  { %3996 = vmatpush3.bf16.msra.mxu0 %v4401_v1 }
 0x420   :  { %4045 = vmatprep.subr.bf16.mxu0 %v4687_v28 }
 0x4c2   :  { %v816_v55 = vpop.f32.mrf.mxu0 }
 0x4c3   :  { %v823_v58 = vmax.f32 %v816_v55, 0.0 }
 0x4c4   :  { %v3959_v56 = vpop.f32.mrf.mxu0 }
 0x4c5   :  { %v3590_v56 = vld [vmem:[%s5159_s4 + $0x3] ss:$0 sm:$0xff] }
 0x4c6   :  { %v819_v57 = vpop.f32.mrf.mxu0 }
 0x4c7   :  { %v824_v59 = vmax.f32 %v819_v57, 0.0 }
 0x4c8   :  { %v3960_v60 = vpop.f32.mrf.mxu0 }
 0x4c9   :  { %v845_v61 = vpack.c.bf16 %v824_v59, %v823_v58 }
 0x4cb   :  { %3978 = vmatmul.mubr.bf16.vlgmr.msra.gmra.mxu1 %v845_v61 }
 0x4cc   :  { %4017 = vmatprep.mubr.msk.bf16.mxu1 %vm4688_vm0, %v4687_v28  ;;  %4002 = vmatpush3.bf16.msra.mxu1 %v4402_v39 }
 0x4cd   :  { %4003 = vmatprep.subr.bf16.mxu1 %v4687_v28 }
 0x4d0   :  { %4004 = vmatpush3.bf16.msra.mxu1 %v4403_v41 }
 0x4d1   :  { %4005 = vmatprep.subr.bf16.mxu1 %v4687_v28 }
 0x4d4   :  { %4006 = vmatpush3.bf16.msra.mxu1 %v4404_v43 }
 0x4d5   :  { %4007 = vmatprep.subr.bf16.mxu1 %v4687_v28 }
 0x4d8   :  { %4008 = vmatpush3.bf16.msra.mxu1 %v4405_v44 }
 0x4d9   :  { %4009 = vmatprep.subr.bf16.mxu1 %v4687_v28 }
 0x4dc   :  { %4010 = vmatpush3.bf16.msra.mxu1 %v4406_v45 }
 0x4dd   :  { %4011 = vmatprep.subr.bf16.mxu1 %v4687_v28 }
 0x4e0   :  { %4012 = vmatpush3.bf16.msra.mxu1 %v4407_v46 }
 0x4e1   :  { %4013 = vmatprep.subr.bf16.mxu1 %v4687_v28 }
 0x4e4   :  { %4014 = vmatpush3.bf16.msra.mxu1 %v4408_v47 }
 0x4e5   :  { %4015 = vmatprep.subr.bf16.mxu1 %v4687_v28 }
 0x4e8   :  { %4016 = vmatpush3.bf16.msra.mxu1 %v4409_v48 }
 0x4e9   :  { %4021 = vmatprep.subr.bf16.mxu1 %v4687_v28 }
 0x58b   :  { %v932_v3 = vpop.f32.mrf.mxu1 }
 0x58c   :  { %v933_v5 = vadd.f32 %v3571_v2, %v932_v3  ;;  %v4635_v3 = vld [vmem:[%s5155_s0 + $0x8] sm:$0xff] }
 0x58d   :  { %v3979_v4 = vpop.f32.mrf.mxu1 }
 0x58e   :  { %v939_v9 = vmax.f32 %v933_v5, 0.0 }
 0x58f   :  { %v935_v6 = vpop.f32.mrf.mxu1 }
 0x590   :  { %v936_v7 = vadd.f32 %v3571_v2, %v935_v6 }
 0x591   :  { %v3980_v8 = vpop.f32.mrf.mxu1 }
 0x592   :  { %v940_v10 = vmax.f32 %v936_v7, 0.0 }
 0x594   :  { %v957_v11 = vpack.c.bf16 %v940_v10, %v939_v9 }
 0x596   :  { %3998 = vmatmul.mubr.bf16.vlgmr.msra.gmra.mxu0 %v957_v11 }
 0x597   :  { %4061 = vmatprep.mubr.msk.bf16.mxu0 %vm4688_vm0, %v4687_v28 }
 0x656   :  { %v1040_v12 = vpop.f32.mrf.mxu0 }
 0x657   :  { %v1047_v14 = vadd.f32 %v1040_v12, %v823_v58 }
 0x658   :  { %v3999_v15 = vpop.f32.mrf.mxu0 }
 0x659   :  { %v1053_v16 = vadd.f32 %v3588_v13, %v1047_v14 }
 0x65a   :  { %v1043_v19 = vpop.f32.mrf.mxu0 }
 0x65b   :  { %v1048_v20 = vadd.f32 %v1043_v19, %v824_v59  ;;  %1055 = vadd.xlane.f32.xlu0 %v1053_v16 }
 0x65c   :  { %v4000_v21 = vpop.f32.mrf.mxu0 }
 0x65d   :  { %v1054_v22 = vadd.f32 %v3588_v13, %v1048_v20 }
 0x65f   :  { %1057 = vadd.xlane.f32.xlu1 %v1054_v22 }
 0x6e4   :  { %v1056_v24 = vpop.xlane.xlu0 %1055 }
 0x6e5   :  { %v1060_v25 = vmul.f32 0.0078125, %v1056_v24 }
 0x6e7   :  { %v1062_v26 = vsub.f32 %v1053_v16, %v1060_v25 }
 0x6e8   :  { %v1058_v27 = vpop.xlane.xlu1 %1057 }
 0x6e9   :  { %v1061_v29 = vmul.f32 0.0078125, %v1058_v27  ;;  %v1064_v23 = vmul.f32 %v1062_v26, %v1062_v26 }
 0x6eb   :  { %v1063_v30 = vsub.f32 %v1054_v22, %v1061_v29  ;;  %1066 = vadd.xlane.f32.xlu0 %v1064_v23 }
 0x6ed   :  { %v1065_v32 = vmul.f32 %v1063_v30, %v1063_v30 }
 0x6ef   :  { %208 = vadd.xlane.f32.xlu0 %v204_v31  ;;  %1068 = vadd.xlane.f32.xlu1 %v1065_v32 }
 0x6f3   :  { %210 = vadd.xlane.f32.xlu1 %v205_v34 }
 0x6f7   :  { %212 = vadd.xlane.f32.xlu1 %v206_v36 }
 0x774   :  { %v1067_v49 = vpop.xlane.xlu0 %1066 }
 0x775   :  { %v1070_v50 = vmul.f32 0.0078125, %v1067_v49 }
 0x777   :  { %v1072_v51 = vadd.f32 1e-05, %v1070_v50 }
 0x778   :  { %v1069_v52 = vpop.xlane.xlu1 %1068  ;;  %v209_v44 = vpop.xlane.xlu0 %208 }
 0x779   :  { %4542 = vrsqrt.f32 %v1072_v51  ;;  %v1071_v17 = vmul.f32 0.0078125, %v1069_v52  ;;  %v216_v49 = vmax.f32 %v209_v44, 1e-24  ;;  %v4411_v44 = vld [vmem:[#allocation2 + $0x200] ss:$40 sps:$4 sm:$0xff]  }
 0x77b   :  { %v1073_v18 = vadd.f32 1e-05, %v1071_v17 }
 0x77c   :  { %v211_v39 = vpop.xlane.xlu1 %210 }
 0x77d   :  { %4544 = vrsqrt.f32 %v1073_v18  ;;  %v217_v47 = vmax.f32 %v211_v39, 1e-24 }
 0x786   :  { %v4543_v53 = vpop.eup %4542 }
 0x787   :  { %v1076_v55 = vmul.f32 %v4543_v53, %v1062_v26 }
 0x789   :  { %v1082_v57 = vmul.f32 %v3589_v54, %v1076_v55 }
 0x78a   :  { %v4545_v58 = vpop.eup %4544 }
 0x78b   :  { %v1088_v59 = vadd.f32 %v3590_v56, %v1082_v57  ;;  %v1077_v60 = vmul.f32 %v4545_v58, %v1063_v30 }
 0x78d   :  { %v1083_v61 = vmul.f32 %v3589_v54, %v1077_v60  ;;  %v1090_v63 = vadd.f32 %v4634_v62, %v1088_v59 }
 0x78f   :  { %v1089_v1 = vadd.f32 %v3590_v56, %v1083_v61  ;;  %v1092_v2 = vrot.slane %v1090_v63, 4 }
 0x791   :  { %v1091_v4 = vadd.f32 %v4635_v3, %v1089_v1  ;;  %v1093_v5 = vadd.f32 %v1092_v2, %v1090_v63  ;;  %v213_v3 = vpop.xlane.xlu1 %212 }
 0x793   :  { %v1094_v6 = vrot.slane %v1093_v5, 2  ;;  %v1098_v7 = vrot.slane %v1091_v4, 4 }
 0x795   :  { %v1095_v8 = vadd.f32 %v1094_v6, %v1093_v5  ;;  %v1099_v9 = vadd.f32 %v1098_v7, %v1091_v4  ;;  %v218_v5 = vmax.f32 %v213_v3, 1e-24 }
 0x797   :  { %v1096_v10 = vrot.slane %v1095_v8, 1  ;;  %v1100_v11 = vrot.slane %v1099_v9, 2 }
 0x799   :  { %v1097_v12 = vadd.f32 %v1096_v10, %v1095_v8  ;;  %v1101_v13 = vadd.f32 %v1100_v11, %v1099_v9 }
 0x79b   :  { %v1102_v14 = vrot.slane %v1101_v13, 1  ;;  %v1105_v15 = vmul.f32 0.125, %v1097_v12 }
 0x79d   :  { %v1103_v16 = vadd.f32 %v1102_v14, %v1101_v13  ;;  %v1107_v19 = vsub.f32 %v1090_v63, %v1105_v15 }
 0x79f   :  { %v1106_v20 = vmul.f32 0.125, %v1103_v16  ;;  %v1109_v21 = vmul.f32 %v1107_v19, %v1107_v19 }
 0x7a1   :  { %v1108_v22 = vsub.f32 %v1091_v4, %v1106_v20  ;;  %v1111_v24 = vrot.slane %v1109_v21, 4 }
 0x7a3   :  { %v1110_v25 = vmul.f32 %v1108_v22, %v1108_v22  ;;  %v1112_v26 = vadd.f32 %v1111_v24, %v1109_v21 }
 0x7a5   :  { %v1113_v27 = vrot.slane %v1112_v26, 2  ;;  %v1117_v29 = vrot.slane %v1110_v25, 4 }
 0x7a7   :  { %v1114_v23 = vadd.f32 %v1113_v27, %v1112_v26  ;;  %v1118_v30 = vadd.f32 %v1117_v29, %v1110_v25 }
 0x7a9   :  { %v1115_v31 = vrot.slane %v1114_v23, 1  ;;  %v1119_v32 = vrot.slane %v1118_v30, 2 }
 0x7ab   :  { %v1116_v34 = vadd.f32 %v1115_v31, %v1114_v23  ;;  %v1120_v36 = vadd.f32 %v1119_v32, %v1118_v30 }
 0x7ad   :  { %v1121_v41 = vrot.slane %v1120_v36, 1  ;;  %v1123_v43 = vmul.f32 0.125, %v1116_v34 }
 0x7af   :  { %v1122_v45 = vadd.f32 %v1121_v41, %v1120_v36  ;;  %v1125_v46 = vadd.f32 1e-05, %v1123_v43  ;;  %v4410_v43 = vld [vmem:[#allocation2 + $0x250] ss:$40 sps:$4 sm:$0xff]  }
 0x7b0   :  { %4046 = vmatpush3.bf16.msra.mxu0 %v4410_v43  ;;  %v4427_v43 = vld [vmem:[#allocation4 + $0x64] ss:$8 sps:$4 sm:$0xff]  }
 0x7b1   :  { %v1124_v48 = vmul.f32 0.125, %v1122_v45  ;;  %4546 = vrsqrt.f32 %v1125_v46  ;;  %4047 = vmatprep.subr.bf16.mxu0 %v4687_v28  ;;  %v4412_v45 = vld [vmem:[#allocation2 + $0x1b0] ss:$40 sps:$4 sm:$0xff]   ;;  %v4413_v46 = vld [vmem:[#allocation2 + $0x160] ss:$40 sps:$4 sm:$0xff]  }
 0x7b2   :  { %4548 = vrsqrt.f32 %v217_v47 }
 0x7b3   :  { %v1126_v50 = vadd.f32 1e-05, %v1124_v48 }
 0x7b4   :  { %4048 = vmatpush3.bf16.msra.mxu0 %v4411_v44  ;;  %v4428_v44 = vld [vmem:[#allocation4 + $0x54] ss:$8 sps:$4 sm:$0xff]  }
 0x7b5   :  { %4550 = vrsqrt.f32 %v1126_v50  ;;  %4049 = vmatprep.subr.bf16.mxu0 %v4687_v28 }
 0x7b6   :  { %4552 = vrsqrt.f32 %v216_v49 }
 0x7b8   :  { %4050 = vmatpush3.bf16.msra.mxu0 %v4412_v45  ;;  %v4429_v45 = vld [vmem:[#allocation4 + $0x44] ss:$8 sps:$4 sm:$0xff]  }
 0x7b9   :  { %4051 = vmatprep.subr.bf16.mxu0 %v4687_v28 }
 0x7bc   :  { %4052 = vmatpush3.bf16.msra.mxu0 %v4413_v46  ;;  %v4430_v46 = vld [vmem:[#allocation4 + $0x34] ss:$8 sps:$4 sm:$0xff]  }
 0x7bd   :  { %4053 = vmatprep.subr.bf16.mxu0 %v4687_v28 }
 0x7be   :  { %v4547_v51 = vpop.eup %4546 }
 0x7bf   :  { %v4549_v52 = vpop.eup %4548  ;;  %v1129_v17 = vmul.f32 %v4547_v51, %v1107_v19 }
 0x7c0   :  { %v225_v55 = vmul.f32 %v4549_v52, %v4802_v35 }
 0x7c1   :  { %v4889_v56 = vmax.f32 %v1129_v17, 0.0 }
 0x7c2   :  { %v4551_v18 = vpop.eup %4550 }
 0x7c3   :  { %v4553_v53 = vpop.eup %4552  ;;  %v1130_v54 = vmul.f32 %v4551_v18, %v1108_v22 }
 0x7c4   :  { %v224_v58 = vmul.f32 %v4553_v53, %v4800_v33  ;;  %v207_v33 = vmul.f32 %v4808_v40, %v4808_v40 }
 0x7c5   :  { %v4891_v57 = vmax.f32 %v1130_v54, 0.0 }
 0x7c6   :  { %v4896_v60 = vpack.c.bf16 %v225_v55, %v224_v58 }
 0x7c7   :  { %v1149_v59 = vpack.c.bf16 %v4891_v57, %v4889_v56 }
 0x7c9   :  { %4018 = vmatmul.mubr.bf16.vlgmr.msra.gmra.mxu1 %v1149_v59 }
 0x7ca   :  { %4022 = vmatpush3.bf16.xpose.msra.mxu1 %v4896_v60  ;;  %4023 = vmatprep.mubr.msk.bf16.mxu1 %vm4688_vm0, %v4687_v28 }
 0x7cb   :  { %4027 = vmatprep.subr.bf16.mxu1 %v4687_v28 }
 0x889   :  { %v1232_v35 = vpop.f32.mrf.mxu1 }
 0x88a   :  { %v1239_v61 = vmul.f32 %v1232_v35, %v1232_v35 }
 0x88b   :  { %v4019_v62 = vpop.f32.mrf.mxu1 }
 0x88c   :  { %1241 = vadd.xlane.f32.xlu0 %v1239_v61 }
 0x88d   :  { %v1235_v63 = vpop.f32.mrf.mxu1 }
 0x88e   :  { %v1240_v1 = vmul.f32 %v1235_v63, %v1235_v63 }
 0x88f   :  { %v4020_v2 = vpop.f32.mrf.mxu1 }
 0x890   :  { %214 = vadd.xlane.f32.xlu0 %v207_v33  ;;  %1243 = vadd.xlane.f32.xlu1 %v1240_v1 }
 0x915   :  { %v1242_v4 = vpop.xlane.xlu0 %1241 }
 0x916   :  { %v1245_v6 = vmax.f32 %v1242_v4, 1e-24 }
 0x918   :  { %4554 = vrsqrt.f32 %v1245_v6 }
 0x919   :  { %v215_v7 = vpop.xlane.xlu0 %214  ;;  %v1244_v8 = vpop.xlane.xlu1 %1243  ;;  %4556 = vrsqrt.f32 %v218_v5 }
 0x91a   :  { %v219_v9 = vmax.f32 %v215_v7, 1e-24  ;;  %v1246_v10 = vmax.f32 %v1244_v8, 1e-24 }
 0x91c   :  { %4558 = vrsqrt.f32 %v219_v9 }
 0x91d   :  { %4560 = vrsqrt.f32 %v1246_v10 }
 0x925   :  { %v4555_v11 = vpop.eup %4554 }
 0x926   :  { %v1249_v12 = vmul.f32 %v4555_v11, %v1232_v35  ;;  %v4557_v13 = vpop.eup %4556  ;;  %v4414_v11 = vld [vmem:[#allocation2 + $0x110] ss:$40 sps:$4 sm:$0xff]  }
 0x927   :  { %v226_v16 = vmul.f32 %v4557_v13, %v4806_v38  ;;  %4054 = vmatpush3.bf16.msra.mxu0 %v4414_v11  ;;  %v4416_v13 = vld [vmem:[#allocation2 + $0x70] ss:$40 sps:$4 sm:$0xff]  }
 0x928   :  { %v1251_v14 = vpack.c.bf16 %v1249_v12, %v1249_v12  ;;  %4055 = vmatprep.subr.bf16.mxu0 %v4687_v28  ;;  %v4415_v12 = vld [vmem:[#allocation2 + $0xc0] ss:$40 sps:$4 sm:$0xff]  }
 0x929   :  { %v4559_v15 = vpop.eup %4558 }
 0x92a   :  { %4024 = vmatmul.mubr.bf16.vlgmr.msra.gmra.mxu1 %v1251_v14  ;;  %v227_v19 = vmul.f32 %v4559_v15, %v4808_v40  ;;  %v4561_v20 = vpop.eup %4560  ;;  %v4417_v14 = vld [vmem:[#allocation2 + $0x20] ss:$40 sps:$4 sm:$0xff]   ;;  %v4418_v15 = vld [vmem:[#allocation2 + $0x254] ss:$40 sps:$4 sm:$0xff]  }
 0x92b   :  { %4029 = vmatprep.mubr.msk.bf16.mxu1 %vm4688_vm0, %v4687_v28  ;;  %v1250_v22 = vmul.f32 %v4561_v20, %v1235_v63  ;;  %4056 = vmatpush3.bf16.msra.mxu0 %v4415_v12  ;;  %v4421_v20 = vld [vmem:[#allocation2 + $0x164] ss:$40 sps:$4 sm:$0xff]  }
 0x92c   :  { %v4908_v21 = vpack.c.bf16 %v227_v19, %v226_v16  ;;  %4057 = vmatprep.subr.bf16.mxu0 %v4687_v28  ;;  %v4419_v16 = vld [vmem:[#allocation2 + $0x204] ss:$40 sps:$4 sm:$0xff]   ;;  %v4420_v19 = vld [vmem:[#allocation2 + $0x1b4] ss:$40 sps:$4 sm:$0xff]  }
 0x92d   :  { %v1252_v24 = vpack.c.bf16 %v1250_v22, %v1250_v22  ;;  %v4422_v22 = vld [vmem:[#allocation2 + $0x114] ss:$40 sps:$4 sm:$0xff]  }
 0x92e   :  { %4028 = vmatpush3.bf16.xpose.msra.mxu1 %v4908_v21 }
 0x92f   :  { %4033 = vmatprep.subr.bf16.mxu1 %v4687_v28  ;;  %4058 = vmatpush3.bf16.msra.mxu0 %v4416_v13 }
 0x930   :  { %4059 = vmatprep.subr.bf16.mxu0 %v4687_v28 }
 0x933   :  { %4060 = vmatpush3.bf16.msra.mxu0 %v4417_v14 }
 0x934   :  { %4085 = vmatprep.subr.bf16.mxu0 %v4687_v28 }
 0x935   :  { %4030 = vmatmul.mubr.bf16.vlgmr.msra.gmra.mxu1 %v1252_v24  ;;  %v4423_v24 = vld [vmem:[#allocation2 + $0xc4] ss:$40 sps:$4 sm:$0xff]  }
 0x936   :  { %4034 = vmatpush3.bf16.msra.mxu1 %v4804_v37  ;;  %4035 = vmatprep.mubr.msk.bf16.mxu1 %vm4688_vm0, %v4687_v28 }
 0x937   :  { %4039 = vmatprep.subr.bf16.mxu1 %v4687_v28 }
 0x9ea   :  { %v1289_v38 = vpop.f32.mrf.mxu1 }
 0x9eb   :  { %v1335_v40 = vmul.f32 1.442695, %v1289_v38 }
 0x9ec   :  { %v4025_v25 = vpop.f32.mrf.mxu1 }
 0x9ed   :  { %4562 = vpow2.f32 %v1335_v40 }
 0x9ee   :  { %v1292_v26 = vpop.f32.mrf.mxu1 }
 0x9f0   :  { %v4026_v27 = vpop.f32.mrf.mxu1 }
 0x9f5   :  { %v1329_v29 = vpop.f32.mrf.mxu1 }
 0x9f6   :  { %v1337_v23 = vmul.f32 1.442695, %v1329_v29 }
 0x9f7   :  { %v4031_v30 = vpop.f32.mrf.mxu1 }
 0x9f8   :  { %4564 = vpow2.f32 %v1337_v23 }
 0x9f9   :  { %v1332_v31 = vpop.f32.mrf.mxu1 }
 0x9fa   :  { %v4563_v32 = vpop.eup %4562 }
 0x9fb   :  { %v4032_v34 = vpop.f32.mrf.mxu1  ;;  %v1340_v36 = vsel %vm1339_vm3, %v4563_v32, 0.0 }
 0x9fc   :  { %1341 = vadd.xlane.f32.xlu0 %v1340_v36  ;;  %v4424_v36 = vld [vmem:[#allocation2 + $0x74] ss:$40 sps:$4 sm:$0xff]  }
 0xa05   :  { %v4565_v39 = vpop.eup %4564 }
 0xa06   :  { %v1343_v41 = vsel %vm1339_vm3, %v4565_v39, 0.0 }
 0xa07   :  { %1344 = vadd.xlane.f32.xlu1 %v1343_v41  ;;  %v4426_v41 = vld [vmem:[#allocation4 + $0x74] ss:$8 sps:$4 sm:$0xff]  }
 0xa85   :  { %v1342_v47 = vpop.xlane.xlu0 %1341 }
 0xa86   :  { %4566 = vrcp.f32 %v1342_v47 }
 0xa90   :  { %v1345_v48 = vpop.xlane.xlu1 %1344 }
 0xa91   :  { %4568 = vrcp.f32 %v1345_v48 }
 0xa93   :  { %v4567_v49 = vpop.eup %4566 }
 0xa94   :  { %v1348_v50 = vmul.f32 %v4567_v49, %v4563_v32 }
 0xa96   :  { %v1350_v51 = vsel %vm1339_vm3, %v1348_v50, 0.0 }
 0xa97   :  { %v1351_v52 = vrot.slane %v1350_v51, 4 }
 0xa99   :  { %v1352_v17 = vadd.f32 %v1351_v52, %v1350_v51 }
 0xa9b   :  { %v1353_v18 = vrot.slane %v1352_v17, 2 }
 0xa9d   :  { %v1354_v53 = vadd.f32 %v1353_v18, %v1352_v17  ;;  %v4431_v18 = vld [vmem:[#allocation4 + $0x24] ss:$8 sps:$4 sm:$0xff]  }
 0xa9e   :  { %v4569_v54 = vpop.eup %4568 }
 0xa9f   :  { %v1355_v55 = vrot.slane %v1354_v53, 1  ;;  %v1349_v58 = vmul.f32 %v4569_v54, %v4565_v39  ;;  %v4425_v39 = vld [vmem:[#allocation2 + $0x24] ss:$40 sps:$4 sm:$0xff]  }
 0xaa0   :  { %v4433_v54 = vld [vmem:[#allocation4 + $0x4] ss:$8 sps:$4 sm:$0xff]  }
 0xaa1   :  { %v1356_v59 = vadd.f32 %v1355_v55, %v1354_v53  ;;  %v1357_v35 = vsel %vm1339_vm3, %v1349_v58, 0.0  ;;  %v4432_v53 = vld [vmem:[#allocation4 + $0x14] ss:$8 sps:$4 sm:$0xff]   ;;  %v3609_v55 = vld [vmem:[%s5159_s4 + $0x4] ss:$0 sm:$0xff] }
 0xaa2   :  { %v1358_v61 = vrot.slane %v1357_v35, 4 }
 0xaa3   :  { %v1364_v62 = vadd.f32 1e-09, %v1356_v59 }
 0xaa4   :  { %v1359_v63 = vadd.f32 %v1358_v61, %v1357_v35 }
 0xaa5   :  { %4570 = vrcp.f32 %v1364_v62 }
 0xaa6   :  { %v1360_v33 = vrot.slane %v1359_v63, 2 }
 0xaa8   :  { %v1361_v1 = vadd.f32 %v1360_v33, %v1359_v63 }
 0xaaa   :  { %v1362_v2 = vrot.slane %v1361_v1, 1 }
 0xaac   :  { %v1363_v3 = vadd.f32 %v1362_v2, %v1361_v1 }
 0xaae   :  { %v1365_v4 = vadd.f32 1e-09, %v1363_v3  ;;  %v3626_v3 = vld [vmem:[%s5159_s4 + $0x5] ss:$0 sm:$0xff] }
 0xab0   :  { %4572 = vrcp.f32 %v1365_v4 }
 0xab2   :  { %v4571_v5 = vpop.eup %4570 }
 0xab3   :  { %v1368_v6 = vmul.f32 %v4571_v5, %v1348_v50 }
 0xab5   :  { %v1370_v7 = vpack.c.bf16 %v1368_v6, %v1368_v6 }
 0xab7   :  { %4036 = vmatmul.mubr.msk.bf16.vlgmr.msra.gmra.mxu1 %vm1339_vm3, %v1370_v7 }
 0xab8   :  { %4040 = vmatpush3.bf16.msra.mxu1 %v4810_v42  ;;  %4041 = vmatprep.mubr.msk.bf16.mxu1 %vm4688_vm0, %v4687_v28 }
 0xab9   :  { %4065 = vmatprep.subr.bf16.mxu1 %v4687_v28 }
 0xabd   :  { %v4573_v8 = vpop.eup %4572 }
 0xabe   :  { %v1369_v9 = vmul.f32 %v4573_v8, %v1349_v58 }
 0xac0   :  { %v1371_v10 = vpack.c.bf16 %v1369_v9, %v1369_v9 }
 0xac2   :  { %4042 = vmatmul.mubr.msk.bf16.vlgmr.msra.gmra.mxu1 %vm1339_vm3, %v1371_v10 }
 0xac3   :  { %4081 = vmatprep.mubr.msk.bf16.mxu1 %vm4688_vm0, %v4687_v28  ;;  %4066 = vmatpush3.bf16.msra.mxu1 %v4418_v15 }
 0xac4   :  { %4067 = vmatprep.subr.bf16.mxu1 %v4687_v28 }
 0xac7   :  { %4068 = vmatpush3.bf16.msra.mxu1 %v4419_v16 }
 0xac8   :  { %4069 = vmatprep.subr.bf16.mxu1 %v4687_v28 }
 0xacb   :  { %4070 = vmatpush3.bf16.msra.mxu1 %v4420_v19 }
 0xacc   :  { %4071 = vmatprep.subr.bf16.mxu1 %v4687_v28 }
 0xacf   :  { %4072 = vmatpush3.bf16.msra.mxu1 %v4421_v20 }
 0xad0   :  { %4073 = vmatprep.subr.bf16.mxu1 %v4687_v28 }
 0xad3   :  { %4074 = vmatpush3.bf16.msra.mxu1 %v4422_v22  ;;  %v4434_v22 = vld [vmem:[#allocation2 + $0x230] ss:$40 sps:$4 sm:$0xff]  }
 0xad4   :  { %4075 = vmatprep.subr.bf16.mxu1 %v4687_v28 }
 0xad7   :  { %4076 = vmatpush3.bf16.msra.mxu1 %v4423_v24  ;;  %v4436_v24 = vld [vmem:[#allocation2 + $0x234] ss:$40 sps:$4 sm:$0xff]  }
 0xad8   :  { %4077 = vmatprep.subr.bf16.mxu1 %v4687_v28 }
 0xadb   :  { %4078 = vmatpush3.bf16.msra.mxu1 %v4424_v36  ;;  %v4453_v36 = vld [vmem:[#allocation2 + $0xf8] ss:$40 sps:$4 sm:$0xff]  }
 0xadc   :  { %4079 = vmatprep.subr.bf16.mxu1 %v4687_v28 }
 0xadf   :  { %4080 = vmatpush3.bf16.msra.mxu1 %v4425_v39  ;;  %v4450_v39 = vld [vmem:[#allocation2 + $0xf0] ss:$40 sps:$4 sm:$0xff]  }
 0xae0   :  { %2037 = vmatprep.subr.bf16.mxu1 %v4436_v24 }
 0xb77   :  { %v1411_v38 = vpop.f32.mrf.mxu1 }
 0xb78   :  { %v1460_v29 = vsub.f32 %v4889_v56, %v1411_v38  ;;  %v4437_v38 = vld [vmem:[#allocation2 + $0x238] ss:$40 sps:$4 sm:$0xff]  }
 0xb79   :  { %v4037_v40 = vpop.f32.mrf.mxu1 }
 0xb7a   :  { %v4440_v40 = vld [vmem:[#allocation2 + $0x1e4] ss:$40 sps:$4 sm:$0xff]  }
 0xb7b   :  { %v1414_v25 = vpop.f32.mrf.mxu1 }
 0xb7c   :  { %v4441_v25 = vld [vmem:[#allocation2 + $0x1e8] ss:$40 sps:$4 sm:$0xff]  }
 0xb7d   :  { %v4038_v26 = vpop.f32.mrf.mxu1 }
 0xb7e   :  { %v4438_v26 = vld [vmem:[#allocation2 + $0x1e0] ss:$40 sps:$4 sm:$0xff]  }
 0xb82   :  { %v1454_v27 = vpop.f32.mrf.mxu1 }
 0xb83   :  { %v1461_v23 = vsub.f32 %v4891_v57, %v1454_v27  ;;  %v4444_v27 = vld [vmem:[#allocation2 + $0x194] ss:$40 sps:$4 sm:$0xff]  }
 0xb84   :  { %v4043_v30 = vpop.f32.mrf.mxu1 }
 0xb85   :  { %v1478_v31 = vpack.c.bf16 %v1461_v23, %v1460_v29  ;;  %v4445_v29 = vld [vmem:[#allocation2 + $0x198] ss:$40 sps:$4 sm:$0xff]   ;;  %v4448_v30 = vld [vmem:[#allocation2 + $0x144] ss:$40 sps:$4 sm:$0xff]  }
 0xb86   :  { %v1457_v32 = vpop.f32.mrf.mxu1  ;;  %v4442_v23 = vld [vmem:[#allocation2 + $0x190] ss:$40 sps:$4 sm:$0xff]  }
 0xb87   :  { %4062 = vmatmul.mubr.bf16.vlgmr.msra.gmra.mxu0 %v1478_v31  ;;  %v4449_v31 = vld [vmem:[#allocation2 + $0x148] ss:$40 sps:$4 sm:$0xff]  }
 0xb88   :  { %v4044_v34 = vpop.f32.mrf.mxu1  ;;  %4101 = vmatprep.mubr.msk.bf16.mxu0 %vm4688_vm0, %v4687_v28  ;;  %4086 = vmatpush3.bf16.msra.mxu0 %v4426_v41  ;;  %v4446_v32 = vld [vmem:[#allocation2 + $0x140] ss:$40 sps:$4 sm:$0xff]   ;;  %v4456_v41 = vld [vmem:[#allocation2 + $0xa4] ss:$40 sps:$4 sm:$0xff]  }
 0xb89   :  { %4087 = vmatprep.subr.bf16.mxu0 %v4687_v28  ;;  %v4452_v34 = vld [vmem:[#allocation2 + $0xf4] ss:$40 sps:$4 sm:$0xff]  }
 0xb8c   :  { %4088 = vmatpush3.bf16.msra.mxu0 %v4427_v43  ;;  %v4457_v43 = vld [vmem:[#allocation2 + $0xa8] ss:$40 sps:$4 sm:$0xff]  }
 0xb8d   :  { %4089 = vmatprep.subr.bf16.mxu0 %v4687_v28 }
 0xb90   :  { %4090 = vmatpush3.bf16.msra.mxu0 %v4428_v44  ;;  %v4454_v44 = vld [vmem:[#allocation2 + $0xa0] ss:$40 sps:$4 sm:$0xff]  }
 0xb91   :  { %4091 = vmatprep.subr.bf16.mxu0 %v4687_v28 }
 0xb94   :  { %4092 = vmatpush3.bf16.msra.mxu0 %v4429_v45  ;;  %v4460_v45 = vld [vmem:[#allocation2 + $0x54] ss:$40 sps:$4 sm:$0xff]  }
 0xb95   :  { %4093 = vmatprep.subr.bf16.mxu0 %v4687_v28 }
 0xb98   :  { %4094 = vmatpush3.bf16.msra.mxu0 %v4430_v46  ;;  %v4461_v46 = vld [vmem:[#allocation2 + $0x58] ss:$40 sps:$4 sm:$0xff]  }
 0xb99   :  { %4095 = vmatprep.subr.bf16.mxu0 %v4687_v28 }
 0xb9c   :  { %4096 = vmatpush3.bf16.msra.mxu0 %v4431_v18 }
 0xb9d   :  { %4097 = vmatprep.subr.bf16.mxu0 %v4687_v28 }
 0xba0   :  { %4098 = vmatpush3.bf16.msra.mxu0 %v4432_v53 }
 0xba1   :  { %4099 = vmatprep.subr.bf16.mxu0 %v4687_v28 }
 0xba4   :  { %4100 = vmatpush3.bf16.msra.mxu0 %v4433_v54 }
 0xba5   :  { %4105 = vmatprep.subr.bf16.mxu0 %v4687_v28 }
 0xc47   :  { %v1561_v47 = vpop.f32.mrf.mxu0 }
 0xc48   :  { %v1568_v50 = vmax.f32 %v1561_v47, 0.0  ;;  %v4458_v47 = vld [vmem:[#allocation2 + $0x50] ss:$40 sps:$4 sm:$0xff]  }
 0xc49   :  { %v4063_v48 = vpop.f32.mrf.mxu0 }
 0xc4a   :  { %v4464_v48 = vld [vmem:[#allocation2 + $0x4] ss:$40 sps:$4 sm:$0xff]  }
 0xc4b   :  { %v1564_v49 = vpop.f32.mrf.mxu0 }
 0xc4c   :  { %v1569_v51 = vmax.f32 %v1564_v49, 0.0  ;;  %v4465_v49 = vld [vmem:[#allocation2 + $0x8] ss:$40 sps:$4 sm:$0xff]  }
 0xc4d   :  { %v4064_v52 = vpop.f32.mrf.mxu0 }
 0xc4e   :  { %v1590_v17 = vpack.c.bf16 %v1569_v51, %v1568_v50 }
 0xc50   :  { %4082 = vmatmul.mubr.bf16.vlgmr.msra.gmra.mxu1 %v1590_v17 }
 0xc51   :  { %2069 = vmatprep.mubr.bf16.mxu1 %v4686_v0  ;;  %2038 = vmatpush1.bf16.msra.mxu1 %v4434_v22 }
 0xc52   :  { %2039 = vmatprep.subr.bf16.mxu1 %v4440_v40 }
 0xc55   :  { %2040 = vmatpush1.bf16.msra.mxu1 %v4438_v26 }
 0xc56   :  { %2041 = vmatprep.subr.bf16.mxu1 %v4444_v27 }
 0xc59   :  { %2042 = vmatpush1.bf16.msra.mxu1 %v4442_v23 }
 0xc5a   :  { %2043 = vmatprep.subr.bf16.mxu1 %v4448_v30 }
 0xc5d   :  { %2044 = vmatpush1.bf16.msra.mxu1 %v4446_v32 }
 0xc5e   :  { %2045 = vmatprep.subr.bf16.mxu1 %v4452_v34 }
 0xc61   :  { %2046 = vmatpush1.bf16.msra.mxu1 %v4450_v39 }
 0xc62   :  { %2047 = vmatprep.subr.bf16.mxu1 %v4456_v41 }
 0xc65   :  { %2048 = vmatpush1.bf16.msra.mxu1 %v4454_v44 }
 0xc66   :  { %2049 = vmatprep.subr.bf16.mxu1 %v4460_v45 }
 0xc69   :  { %2050 = vmatpush1.bf16.msra.mxu1 %v4458_v47 }
 0xc6a   :  { %2051 = vmatprep.subr.bf16.mxu1 %v4464_v48 }
 0xd10   :  { %v1677_v58 = vpop.f32.mrf.mxu1 }
 0xd11   :  { %v1678_v35 = vadd.f32 %v3609_v55, %v1677_v58  ;;  %v3627_v58 = vld [vmem:[%s5159_s4 + $0x6] ss:$0 sm:$0xff] }
 0xd12   :  { %v4083_v59 = vpop.f32.mrf.mxu1 }
 0xd13   :  { %v1684_v63 = vmax.f32 %v1678_v35, 0.0  ;;  %v3628_v35 = vld [vmem:[%s5159_s4 + $0x7] ss:$0 sm:$0xff] }
 0xd14   :  { %v1680_v0 = vpop.f32.mrf.mxu1 }
 0xd15   :  { %v1681_v61 = vadd.f32 %v3609_v55, %v1680_v0 }
 0xd16   :  { %v4084_v62 = vpop.f32.mrf.mxu1 }
 0xd17   :  { %v1685_v33 = vmax.f32 %v1681_v61, 0.0 }
 0xd19   :  { %v1702_v1 = vpack.c.bf16 %v1685_v33, %v1684_v63 }
 0xd1b   :  { %4102 = vmatmul.mubr.bf16.vlgmr.msra.gmra.mxu0 %v1702_v1 }
 0xd1c   :  { %4121 = vmatprep.mubr.msk.bf16.mxu0 %vm4688_vm0, %v4687_v28  ;;  %4106 = vmatpush3.bf16.msra.mxu0 %v4437_v38 }
 0xd1d   :  { %4107 = vmatprep.subr.bf16.mxu0 %v4687_v28 }
 0xd20   :  { %4108 = vmatpush3.bf16.msra.mxu0 %v4441_v25 }
 0xd21   :  { %4109 = vmatprep.subr.bf16.mxu0 %v4687_v28 }
 0xd24   :  { %4110 = vmatpush3.bf16.msra.mxu0 %v4445_v29 }
 0xd25   :  { %4111 = vmatprep.subr.bf16.mxu0 %v4687_v28 }
 0xd28   :  { %4112 = vmatpush3.bf16.msra.mxu0 %v4449_v31 }
 0xd29   :  { %4113 = vmatprep.subr.bf16.mxu0 %v4687_v28 }
 0xd2c   :  { %4114 = vmatpush3.bf16.msra.mxu0 %v4453_v36 }
 0xd2d   :  { %4115 = vmatprep.subr.bf16.mxu0 %v4687_v28 }
 0xd30   :  { %4116 = vmatpush3.bf16.msra.mxu0 %v4457_v43 }
 0xd31   :  { %4117 = vmatprep.subr.bf16.mxu0 %v4687_v28 }
 0xd34   :  { %4118 = vmatpush3.bf16.msra.mxu0 %v4461_v46 }
 0xd35   :  { %4119 = vmatprep.subr.bf16.mxu0 %v4687_v28 }
 0xd38   :  { %4120 = vmatpush3.bf16.msra.mxu0 %v4465_v49 }
 0xd39   :  { %4149 = vmatprep.subr.bf16.mxu0 %v4687_v28 }
 0xddb   :  { %v1785_v2 = vpop.f32.mrf.mxu0 }
 0xddc   :  { %v1792_v4 = vadd.f32 %v1785_v2, %v1568_v50  ;;  %v4462_v50 = vld [vmem:[#allocation2] ss:$40 sps:$4 sm:$0xff]  }
 0xddd   :  { %v4103_v5 = vpop.f32.mrf.mxu0  ;;  %2052 = vmatpush1.bf16.msra.mxu1 %v4462_v50 }
 0xdde   :  { %v1798_v6 = vadd.f32 %v3626_v3, %v1792_v4  ;;  %4125 = vmatprep.subr.bf16.mxu1 %v4687_v28 }
 0xddf   :  { %v1788_v7 = vpop.f32.mrf.mxu0 }
 0xde0   :  { %v1793_v8 = vadd.f32 %v1788_v7, %v1569_v51  ;;  %1800 = vadd.xlane.f32.xlu0 %v1798_v6 }
 0xde1   :  { %v4104_v9 = vpop.f32.mrf.mxu0 }
 0xde2   :  { %v1799_v10 = vadd.f32 %v3626_v3, %v1793_v8 }
 0xde4   :  { %1802 = vadd.xlane.f32.xlu1 %v1799_v10 }
 0xe69   :  { %v1801_v11 = vpop.xlane.xlu0 %1800 }
 0xe6a   :  { %v1804_v12 = vmul.f32 0.0078125, %v1801_v11 }
 0xe6c   :  { %v4964_v13 = vsub.f32 %v1798_v6, %v1804_v12 }
 0xe6d   :  { %v1803_v14 = vpop.xlane.xlu1 %1802 }
 0xe6e   :  { %v1805_v15 = vmul.f32 0.0078125, %v1803_v14  ;;  %v1808_v16 = vmul.f32 %v4964_v13, %v4964_v13 }
 0xe70   :  { %v4968_v19 = vsub.f32 %v1799_v10, %v1805_v15  ;;  %1810 = vadd.xlane.f32.xlu0 %v1808_v16 }
 0xe72   :  { %v1809_v20 = vmul.f32 %v4968_v19, %v4968_v19 }
 0xe74   :  { %1812 = vadd.xlane.f32.xlu1 %v1809_v20 }
 0xef9   :  { %v1811_v51 = vpop.xlane.xlu0 %1810 }
 0xefa   :  { %v1814_v52 = vmul.f32 0.0078125, %v1811_v51 }
 0xefc   :  { %v1816_v17 = vadd.f32 1e-05, %v1814_v52 }
 0xefd   :  { %v1813_v18 = vpop.xlane.xlu1 %1812 }
 0xefe   :  { %4574 = vrsqrt.f32 %v1816_v17  ;;  %v1815_v53 = vmul.f32 0.0078125, %v1813_v18 }
 0xf00   :  { %v1817_v54 = vadd.f32 1e-05, %v1815_v53 }
 0xf02   :  { %4576 = vrsqrt.f32 %v1817_v54 }
 0xf0b   :  { %v4575_v55 = vpop.eup %4574 }
 0xf0c   :  { %v1820_v59 = vmul.f32 %v4575_v55, %v4964_v13 }
 0xf0e   :  { %v1826_v0 = vmul.f32 %v3627_v58, %v1820_v59 }
 0xf0f   :  { %v4577_v61 = vpop.eup %4576 }
 0xf10   :  { %v1832_v62 = vadd.f32 %v3628_v35, %v1826_v0  ;;  %v1821_v63 = vmul.f32 %v4577_v61, %v4968_v19 }
 0xf12   :  { %v1827_v33 = vmul.f32 %v3627_v58, %v1821_v63  ;;  %v1834_v1 = vadd.f32 %v1832_v62, %v4889_v56 }
 0xf14   :  { %v1833_v2 = vadd.f32 %v3628_v35, %v1827_v33  ;;  %v1836_v3 = vrot.slane %v1834_v1, 4 }
 0xf16   :  { %v1835_v4 = vadd.f32 %v1833_v2, %v4891_v57  ;;  %v1837_v5 = vadd.f32 %v1836_v3, %v1834_v1 }
 0xf18   :  { %v1838_v6 = vrot.slane %v1837_v5, 2  ;;  %v1842_v7 = vrot.slane %v1835_v4, 4 }
 0xf1a   :  { %v1839_v8 = vadd.f32 %v1838_v6, %v1837_v5  ;;  %v1843_v9 = vadd.f32 %v1842_v7, %v1835_v4 }
 0xf1c   :  { %v1840_v10 = vrot.slane %v1839_v8, 1  ;;  %v1844_v11 = vrot.slane %v1843_v9, 2 }
 0xf1e   :  { %v1841_v12 = vadd.f32 %v1840_v10, %v1839_v8  ;;  %v1845_v13 = vadd.f32 %v1844_v11, %v1843_v9 }
 0xf20   :  { %v1846_v14 = vrot.slane %v1845_v13, 1  ;;  %v1848_v15 = vmul.f32 0.125, %v1841_v12 }
 0xf22   :  { %v1847_v16 = vadd.f32 %v1846_v14, %v1845_v13  ;;  %v1850_v19 = vsub.f32 %v1834_v1, %v1848_v15 }
 0xf24   :  { %v1849_v20 = vmul.f32 0.125, %v1847_v16  ;;  %v1852_v22 = vmul.f32 %v1850_v19, %v1850_v19 }
 0xf26   :  { %v1851_v56 = vsub.f32 %v1835_v4, %v1849_v20  ;;  %v1854_v24 = vrot.slane %v1852_v22, 4 }
 0xf28   :  { %v1853_v38 = vmul.f32 %v1851_v56, %v1851_v56  ;;  %v1855_v40 = vadd.f32 %v1854_v24, %v1852_v22 }
 0xf2a   :  { %v1856_v57 = vrot.slane %v1855_v40, 2  ;;  %v1860_v25 = vrot.slane %v1853_v38, 4 }
 0xf2c   :  { %v1857_v26 = vadd.f32 %v1856_v57, %v1855_v40  ;;  %v1861_v27 = vadd.f32 %v1860_v25, %v1853_v38 }
 0xf2e   :  { %v1858_v29 = vrot.slane %v1857_v26, 1  ;;  %v1862_v23 = vrot.slane %v1861_v27, 2 }
 0xf30   :  { %v1859_v30 = vadd.f32 %v1858_v29, %v1857_v26  ;;  %v1863_v31 = vadd.f32 %v1862_v23, %v1861_v27 }
 0xf32   :  { %v1864_v32 = vrot.slane %v1863_v31, 1  ;;  %v1866_v34 = vmul.f32 0.125, %v1859_v30 }
 0xf34   :  { %v1865_v36 = vadd.f32 %v1864_v32, %v1863_v31  ;;  %v1868_v39 = vadd.f32 1e-05, %v1866_v34 }
 0xf36   :  { %v1867_v41 = vmul.f32 0.125, %v1865_v36  ;;  %4578 = vrsqrt.f32 %v1868_v39  ;;  %v4466_v36 = vld [vmem:[#allocation2 + $0x23c] ss:$40 sps:$4 sm:$0xff]   ;;  %v4467_v39 = vld [vmem:[#allocation2 + $0x1ec] ss:$40 sps:$4 sm:$0xff]  }
 0xf38   :  { %v1869_v43 = vadd.f32 1e-05, %v1867_v41  ;;  %v4468_v41 = vld [vmem:[#allocation2 + $0x19c] ss:$40 sps:$4 sm:$0xff]  }
 0xf3a   :  { %4580 = vrsqrt.f32 %v1869_v43  ;;  %v4469_v43 = vld [vmem:[#allocation2 + $0x14c] ss:$40 sps:$4 sm:$0xff]  }
 0xf43   :  { %v4579_v44 = vpop.eup %4578 }
 0xf44   :  { %v1872_v45 = vmul.f32 %v4579_v44, %v1850_v19  ;;  %v4470_v44 = vld [vmem:[#allocation2 + $0xfc] ss:$40 sps:$4 sm:$0xff]  }
 0xf46   :  { %v4991_v48 = vmax.f32 %v1872_v45, 0.0 }
 0xf47   :  { %v4581_v46 = vpop.eup %4580 }
 0xf48   :  { %v1873_v47 = vmul.f32 %v4581_v46, %v1851_v56 }
 0xf4a   :  { %v4993_v49 = vmax.f32 %v1873_v47, 0.0 }
 0xf4c   :  { %v1908_v50 = vpack.c.bf16 %v4993_v49, %v4991_v48 }
 0xf4e   :  { %2070 = vmatmul.mubr.bf16.vlgmr.msra.gmra.mxu1 %v1908_v50  ;;  %4122 = vmatmul.mubr.bf16.vlgmr.msra.gmra.mxu0 %v1908_v50 }
 0xf4f   :  { %4127 = vmatprep.mubr.msk.bf16.mxu1 %vm4688_vm0, %v4687_v28  ;;  %4165 = vmatprep.mubr.msk.bf16.mxu0 %vm4688_vm0, %v4687_v28 }
 0xf50   :  { %4150 = vmatpush3.bf16.msra.mxu0 %v4466_v36  ;;  %v4482_v36 = vld [vmem:[#allocation4 + $0x70] ss:$8 sps:$4 sm:$0xff]  }
 0xf51   :  { %4151 = vmatprep.subr.bf16.mxu0 %v4687_v28 }
 0xf54   :  { %4152 = vmatpush3.bf16.msra.mxu0 %v4467_v39  ;;  %v4483_v39 = vld [vmem:[#allocation4 + $0x60] ss:$8 sps:$4 sm:$0xff]  }
 0xf55   :  { %4153 = vmatprep.subr.bf16.mxu0 %v4687_v28 }
 0xf58   :  { %4154 = vmatpush3.bf16.msra.mxu0 %v4468_v41  ;;  %v4484_v41 = vld [vmem:[#allocation4 + $0x50] ss:$8 sps:$4 sm:$0xff]  }
 0xf59   :  { %4155 = vmatprep.subr.bf16.mxu0 %v4687_v28 }
 0xf5c   :  { %4156 = vmatpush3.bf16.msra.mxu0 %v4469_v43  ;;  %v4485_v43 = vld [vmem:[#allocation4 + $0x40] ss:$8 sps:$4 sm:$0xff]  }
 0xf5d   :  { %4157 = vmatprep.subr.bf16.mxu0 %v4687_v28 }
 0xf60   :  { %4158 = vmatpush3.bf16.msra.mxu0 %v4470_v44  ;;  %v4486_v44 = vld [vmem:[#allocation4 + $0x30] ss:$8 sps:$4 sm:$0xff]  }
 0xf61   :  { %4159 = vmatprep.subr.bf16.mxu0 %v4687_v28 }
0x100e   :  { %v2071_v51 = vpop.f32.mrf.mxu1  ;;  %v2114_v52 = vpop.f32.mrf.mxu0 }
0x100f   :  { %v2121_v17 = vmul.f32 %v2071_v51, %v2071_v51  ;;  %v2265_v19 = vpack.c.bf16 %v2114_v52, %v2114_v52 }
0x1010   :  { %v2073_v18 = vpop.f32.mrf.mxu1  ;;  %v4123_v53 = vpop.f32.mrf.mxu0 }
0x1011   :  { %2123 = vadd.xlane.f32.xlu1 %v2121_v17  ;;  %v2133_v54 = vmul.f32 %v2073_v18, %v2073_v18  ;;  %v2271_v22 = vsel %vm625_vm2, %v2265_v19, 0  ;;  %v4476_v19 = vld [vmem:[#allocation2 + $0x1a0] ss:$40 sps:$4 sm:$0xff]  }
0x1012   :  { %v2075_v55 = vpop.f32.mrf.mxu1  ;;  %v5001_v58 = vpop.f32.mrf.mxu0 }
0x1013   :  { %2135 = vadd.xlane.f32.xlu0 %v2133_v54  ;;  %v2122_v59 = vmul.f32 %v2075_v55, %v2075_v55 }
0x1014   :  { %v2077_v35 = vpop.f32.mrf.mxu1  ;;  %v4124_v0 = vpop.f32.mrf.mxu0 }
0x1015   :  { %2125 = vadd.xlane.f32.xlu1 %v2122_v59  ;;  %v2134_v61 = vmul.f32 %v2077_v35, %v2077_v35 }
0x1017   :  { %2137 = vadd.xlane.f32.xlu0 %v2134_v61 }
0x109a   :  { %v2124_v62 = vpop.xlane.xlu1 %2123 }
0x109b   :  { %v2127_v1 = vmax.f32 %v2124_v62, 1e-24 }
0x109c   :  { %v2136_v63 = vpop.xlane.xlu0 %2135 }
0x109d   :  { %v2139_v33 = vmax.f32 %v2136_v63, 1e-24 }
0x109e   :  { %v2126_v4 = vpop.xlane.xlu1 %2125 }
0x109f   :  { %4582 = vrsqrt.f32 %v2139_v33  ;;  %v2128_v5 = vmax.f32 %v2126_v4, 1e-24 }
0x10a0   :  { %v2138_v2 = vpop.xlane.xlu0 %2137  ;;  %4584 = vrsqrt.f32 %v2127_v1 }
0x10a1   :  { %v2140_v3 = vmax.f32 %v2138_v2, 1e-24 }
0x10a3   :  { %4586 = vrsqrt.f32 %v2140_v3 }
0x10a4   :  { %4588 = vrsqrt.f32 %v2128_v5 }
0x10ac   :  { %v4583_v6 = vpop.eup %4582 }
0x10ad   :  { %v2143_v7 = vmul.f32 %v4583_v6, %v2073_v18  ;;  %v4585_v8 = vpop.eup %4584  ;;  %v2266_v6 = vpack.c.bf16 %v5001_v58, %v5001_v58  ;;  %v4471_v58 = vld [vmem:[#allocation2 + $0xac] ss:$40 sps:$4 sm:$0xff]  }
0x10ae   :  { %v2131_v11 = vmul.f32 %v4585_v8, %v2071_v51  ;;  %4160 = vmatpush3.bf16.msra.mxu0 %v4471_v58 }
0x10af   :  { %v2147_v9 = vpack.c.bf16 %v2143_v7, %v2143_v7  ;;  %4161 = vmatprep.subr.bf16.mxu0 %v4687_v28 }
0x10b0   :  { %v4587_v10 = vpop.eup %4586  ;;  %v2145_v13 = vpack.c.bf16 %v2131_v11, %v2131_v11 }
0x10b1   :  { %4126 = vmatpush3.bf16.xpose.msra.mxu1 %v2147_v9  ;;  %v2144_v12 = vmul.f32 %v4587_v10, %v2077_v35  ;;  %v4589_v14 = vpop.eup %4588  ;;  %v2317_v9 = vsel %vm625_vm2, %v2266_v6, 0 }
0x10b2   :  { %4131 = vmatprep.subr.bf16.mxu1 %v4687_v28  ;;  %v2132_v16 = vmul.f32 %v4589_v14, %v2075_v55  ;;  %v4473_v14 = vld [vmem:[#allocation2 + $0xc] ss:$40 sps:$4 sm:$0xff]  }
0x10b3   :  { %v2148_v15 = vpack.c.bf16 %v2144_v12, %v2144_v12 }
0x10b4   :  { %v2146_v20 = vpack.c.bf16 %v2132_v16, %v2132_v16  ;;  %v4475_v16 = vld [vmem:[#allocation2 + $0x1f0] ss:$40 sps:$4 sm:$0xff]  }
0x10b8   :  { %4128 = vmatmul.mubr.bf16.vlgmr.msra.gmra.mxu1 %v2145_v13  ;;  %v4472_v13 = vld [vmem:[#allocation2 + $0x5c] ss:$40 sps:$4 sm:$0xff]  }
0x10b9   :  { %4132 = vmatpush3.bf16.xpose.msra.mxu1 %v2148_v15  ;;  %4133 = vmatprep.mubr.msk.bf16.mxu1 %vm4688_vm0, %v4687_v28  ;;  %v4474_v15 = vld [vmem:[#allocation2 + $0x240] ss:$40 sps:$4 sm:$0xff]  }
0x10ba   :  { %4137 = vmatprep.subr.bf16.mxu1 %v4687_v28  ;;  %4162 = vmatpush3.bf16.msra.mxu0 %v4472_v13 }
0x10bb   :  { %4163 = vmatprep.subr.bf16.mxu0 %v4687_v28 }
0x10be   :  { %4164 = vmatpush3.bf16.msra.mxu0 %v4473_v14 }
0x10bf   :  { %4189 = vmatprep.subr.bf16.mxu0 %v4687_v28 }
0x10c0   :  { %4134 = vmatmul.mubr.bf16.vlgmr.msra.gmra.mxu1 %v2146_v20  ;;  %v4477_v20 = vld [vmem:[#allocation2 + $0x150] ss:$40 sps:$4 sm:$0xff]  }
0x10c1   :  { %4138 = vmatpush3.bf16.msra.mxu1 %v2271_v22  ;;  %4139 = vmatprep.mubr.msk.bf16.mxu1 %vm4688_vm0, %v4687_v28  ;;  %v4478_v22 = vld [vmem:[#allocation2 + $0x100] ss:$40 sps:$4 sm:$0xff]  }
0x10c2   :  { %4143 = vmatprep.subr.bf16.mxu1 %v4687_v28 }
0x1178   :  { %v2183_v56 = vpop.f32.mrf.mxu1 }
0x1179   :  { %v2229_v24 = vmul.f32 1.442695, %v2183_v56  ;;  %v4479_v56 = vld [vmem:[#allocation2 + $0xb0] ss:$40 sps:$4 sm:$0xff]  }
0x117a   :  { %v4129_v38 = vpop.f32.mrf.mxu1 }
0x117b   :  { %4590 = vpow2.f32 %v2229_v24 }
0x117c   :  { %v2186_v40 = vpop.f32.mrf.mxu1 }
0x117e   :  { %v4130_v57 = vpop.f32.mrf.mxu1 }
0x1180   :  { %v2223_v25 = vpop.f32.mrf.mxu1 }
0x1181   :  { %v2231_v26 = vmul.f32 1.442695, %v2223_v25 }
0x1182   :  { %v4135_v27 = vpop.f32.mrf.mxu1 }
0x1183   :  { %4592 = vpow2.f32 %v2231_v26 }
0x1184   :  { %v2226_v29 = vpop.f32.mrf.mxu1 }
0x1186   :  { %v4136_v23 = vpop.f32.mrf.mxu1 }
0x1188   :  { %v4591_v30 = vpop.eup %4590 }
0x1189   :  { %v2233_v31 = vsel %vm587_vm1, %v4591_v30, 0.0 }
0x118a   :  { %2234 = vadd.xlane.f32.xlu0 %v2233_v31 }
0x1190   :  { %v4593_v32 = vpop.eup %4592 }
0x1191   :  { %v2236_v34 = vsel %vm587_vm1, %v4593_v32, 0.0 }
0x1192   :  { %2237 = vadd.xlane.f32.xlu1 %v2236_v34  ;;  %v4481_v34 = vld [vmem:[#allocation2 + $0x10] ss:$40 sps:$4 sm:$0xff]  }
0x1213   :  { %v2235_v45 = vpop.xlane.xlu0 %2234 }
0x1214   :  { %4594 = vrcp.f32 %v2235_v45  ;;  %v4487_v45 = vld [vmem:[#allocation4 + $0x20] ss:$8 sps:$4 sm:$0xff]  }
0x121b   :  { %v2238_v46 = vpop.xlane.xlu1 %2237 }
0x121c   :  { %4596 = vrcp.f32 %v2238_v46 }
0x1221   :  { %v4595_v47 = vpop.eup %4594 }
0x1222   :  { %v2241_v50 = vmul.f32 %v4595_v47, %v4591_v30 }
0x1224   :  { %v2243_v51 = vsel %vm587_vm1, %v2241_v50, 0.0 }
0x1225   :  { %v2244_v52 = vrot.slane %v2243_v51, 4 }
0x1227   :  { %v2245_v17 = vadd.f32 %v2244_v52, %v2243_v51 }
0x1229   :  { %v4597_v18 = vpop.eup %4596  ;;  %v2246_v53 = vrot.slane %v2245_v17, 2 }
0x122a   :  { %v2242_v54 = vmul.f32 %v4597_v18, %v4593_v32  ;;  %v4480_v32 = vld [vmem:[#allocation2 + $0x60] ss:$40 sps:$4 sm:$0xff]  }
0x122b   :  { %v2247_v55 = vadd.f32 %v2246_v53, %v2245_v17  ;;  %v4488_v53 = vld [vmem:[#allocation4 + $0x10] ss:$8 sps:$4 sm:$0xff]  }
0x122c   :  { %v2250_v59 = vsel %vm587_vm1, %v2242_v54, 0.0 }
0x122d   :  { %v2248_v35 = vrot.slane %v2247_v55, 1  ;;  %v2251_v0 = vrot.slane %v2250_v59, 4 }
0x122f   :  { %v2249_v61 = vadd.f32 %v2248_v35, %v2247_v55  ;;  %v2252_v62 = vadd.f32 %v2251_v0, %v2250_v59  ;;  %v3663_v55 = vld [vmem:[%s5159_s4] ss:$0 sm:$0xff] }
0x1231   :  { %v2257_v63 = vadd.f32 1e-09, %v2249_v61  ;;  %v2253_v33 = vrot.slane %v2252_v62, 2 }
0x1233   :  { %4598 = vrcp.f32 %v2257_v63  ;;  %v2254_v1 = vadd.f32 %v2253_v33, %v2252_v62 }
0x1235   :  { %v2255_v2 = vrot.slane %v2254_v1, 1 }
0x1237   :  { %v2256_v3 = vadd.f32 %v2255_v2, %v2254_v1 }
0x1239   :  { %v2258_v4 = vadd.f32 1e-09, %v2256_v3 }
0x123b   :  { %4600 = vrcp.f32 %v2258_v4  ;;  %v3680_v4 = vld [vmem:[%s5159_s4 + $0x1] ss:$0 sm:$0xff] }
0x1240   :  { %v4599_v5 = vpop.eup %4598 }
0x1241   :  { %v2261_v7 = vmul.f32 %v4599_v5, %v2241_v50 }
0x1243   :  { %v2263_v8 = vpack.c.bf16 %v2261_v7, %v2261_v7 }
0x1245   :  { %4140 = vmatmul.mubr.msk.bf16.vlgmr.msra.gmra.mxu1 %vm587_vm1, %v2263_v8 }
0x1246   :  { %4144 = vmatpush3.bf16.msra.mxu1 %v2317_v9  ;;  %4145 = vmatprep.mubr.msk.bf16.mxu1 %vm4688_vm0, %v4687_v28 }
0x1247   :  { %4169 = vmatprep.subr.bf16.mxu1 %v4687_v28 }
0x1248   :  { %v4601_v10 = vpop.eup %4600 }
0x1249   :  { %v2262_v11 = vmul.f32 %v4601_v10, %v2242_v54  ;;  %v4489_v54 = vld [vmem:[#allocation4] ss:$8 sps:$4 sm:$0xff]  }
0x124b   :  { %v2264_v12 = vpack.c.bf16 %v2262_v11, %v2262_v11 }
0x124d   :  { %4146 = vmatmul.mubr.msk.bf16.vlgmr.msra.gmra.mxu1 %vm587_vm1, %v2264_v12 }
0x124e   :  { %4185 = vmatprep.mubr.msk.bf16.mxu1 %vm4688_vm0, %v4687_v28  ;;  %4170 = vmatpush3.bf16.msra.mxu1 %v4474_v15 }
0x124f   :  { %4171 = vmatprep.subr.bf16.mxu1 %v4687_v28 }
0x1252   :  { %4172 = vmatpush3.bf16.msra.mxu1 %v4475_v16 }
0x1253   :  { %4173 = vmatprep.subr.bf16.mxu1 %v4687_v28 }
0x1256   :  { %4174 = vmatpush3.bf16.msra.mxu1 %v4476_v19 }
0x1257   :  { %4175 = vmatprep.subr.bf16.mxu1 %v4687_v28 }
0x125a   :  { %4176 = vmatpush3.bf16.msra.mxu1 %v4477_v20  ;;  %v4490_v20 = vld [vmem:[#allocation2 + $0x244] ss:$40 sps:$4 sm:$0xff]  }
0x125b   :  { %4177 = vmatprep.subr.bf16.mxu1 %v4687_v28 }
0x125e   :  { %4178 = vmatpush3.bf16.msra.mxu1 %v4478_v22  ;;  %v4491_v22 = vld [vmem:[#allocation2 + $0x1f4] ss:$40 sps:$4 sm:$0xff]  }
0x125f   :  { %4179 = vmatprep.subr.bf16.mxu1 %v4687_v28 }
0x1262   :  { %4180 = vmatpush3.bf16.msra.mxu1 %v4479_v56  ;;  %v4492_v56 = vld [vmem:[#allocation2 + $0x1a4] ss:$40 sps:$4 sm:$0xff]  }
0x1263   :  { %4181 = vmatprep.subr.bf16.mxu1 %v4687_v28 }
0x1266   :  { %4182 = vmatpush3.bf16.msra.mxu1 %v4480_v32 }
0x1267   :  { %4183 = vmatprep.subr.bf16.mxu1 %v4687_v28 }
0x126a   :  { %4184 = vmatpush3.bf16.msra.mxu1 %v4481_v34  ;;  %v3681_v34 = vld [vmem:[%s5159_s4 + $0x2] ss:$0 sm:$0xff] }
0x126b   :  { %4209 = vmatprep.subr.bf16.mxu1 %v4687_v28 }
0x1305   :  { %v2307_v24 = vpop.f32.mrf.mxu1 }
0x1306   :  { %v2359_v26 = vsub.f32 %v4991_v48, %v2307_v24  ;;  %v4493_v24 = vld [vmem:[#allocation2 + $0x154] ss:$40 sps:$4 sm:$0xff]  }
0x1307   :  { %v4141_v38 = vpop.f32.mrf.mxu1 }
0x1308   :  { %v4494_v38 = vld [vmem:[#allocation2 + $0x104] ss:$40 sps:$4 sm:$0xff]  }
0x1309   :  { %v2310_v40 = vpop.f32.mrf.mxu1 }
0x130a   :  { %v4495_v40 = vld [vmem:[#allocation2 + $0xb4] ss:$40 sps:$4 sm:$0xff]  }
0x130b   :  { %v4142_v57 = vpop.f32.mrf.mxu1 }
0x130c   :  { %v4496_v57 = vld [vmem:[#allocation2 + $0x64] ss:$40 sps:$4 sm:$0xff]  }
0x130d   :  { %v2353_v25 = vpop.f32.mrf.mxu1 }
0x130e   :  { %v2360_v27 = vsub.f32 %v4993_v49, %v2353_v25  ;;  %v4497_v25 = vld [vmem:[#allocation2 + $0x14] ss:$40 sps:$4 sm:$0xff]  }
0x130f   :  { %v4147_v29 = vpop.f32.mrf.mxu1 }
0x1310   :  { %v2377_v23 = vpack.c.bf16 %v2360_v27, %v2359_v26 }
0x1311   :  { %v2356_v30 = vpop.f32.mrf.mxu1 }
0x1312   :  { %4166 = vmatmul.mubr.bf16.vlgmr.msra.gmra.mxu0 %v2377_v23 }
0x1313   :  { %v4148_v31 = vpop.f32.mrf.mxu1  ;;  %4205 = vmatprep.mubr.msk.bf16.mxu0 %vm4688_vm0, %v4687_v28  ;;  %4190 = vmatpush3.bf16.msra.mxu0 %v4482_v36 }
0x1314   :  { %4191 = vmatprep.subr.bf16.mxu0 %v4687_v28 }
0x1317   :  { %4192 = vmatpush3.bf16.msra.mxu0 %v4483_v39  ;;  %v3682_v39 = vld [vmem:[%s5159_s4 + $0x3] ss:$0 sm:$0xff] }
0x1318   :  { %4193 = vmatprep.subr.bf16.mxu0 %v4687_v28 }
0x131b   :  { %4194 = vmatpush3.bf16.msra.mxu0 %v4484_v41 }
0x131c   :  { %4195 = vmatprep.subr.bf16.mxu0 %v4687_v28 }
0x131f   :  { %4196 = vmatpush3.bf16.msra.mxu0 %v4485_v43 }
0x1320   :  { %4197 = vmatprep.subr.bf16.mxu0 %v4687_v28 }
0x1323   :  { %4198 = vmatpush3.bf16.msra.mxu0 %v4486_v44 }
0x1324   :  { %4199 = vmatprep.subr.bf16.mxu0 %v4687_v28 }
0x1327   :  { %4200 = vmatpush3.bf16.msra.mxu0 %v4487_v45 }
0x1328   :  { %4201 = vmatprep.subr.bf16.mxu0 %v4687_v28 }
0x132b   :  { %4202 = vmatpush3.bf16.msra.mxu0 %v4488_v53 }
0x132c   :  { %4203 = vmatprep.subr.bf16.mxu0 %v4687_v28 }
0x132f   :  { %4204 = vmatpush3.bf16.msra.mxu0 %v4489_v54 }
0x1330   :  { %4229 = vmatprep.subr.bf16.mxu0 %v4687_v28 }
0x13d2   :  { %v2460_v46 = vpop.f32.mrf.mxu0 }
0x13d3   :  { %v2467_v51 = vmax.f32 %v2460_v46, 0.0 }
0x13d4   :  { %v4167_v47 = vpop.f32.mrf.mxu0 }
0x13d6   :  { %v2463_v50 = vpop.f32.mrf.mxu0 }
0x13d7   :  { %v2468_v52 = vmax.f32 %v2463_v50, 0.0 }
0x13d8   :  { %v4168_v17 = vpop.f32.mrf.mxu0 }
0x13d9   :  { %v2489_v18 = vpack.c.bf16 %v2468_v52, %v2467_v51 }
0x13db   :  { %4186 = vmatmul.mubr.bf16.vlgmr.msra.gmra.mxu1 %v2489_v18 }
0x13dc   :  { %4225 = vmatprep.mubr.msk.bf16.mxu1 %vm4688_vm0, %v4687_v28  ;;  %4210 = vmatpush3.bf16.msra.mxu1 %v4490_v20 }
0x13dd   :  { %4211 = vmatprep.subr.bf16.mxu1 %v4687_v28 }
0x13e0   :  { %4212 = vmatpush3.bf16.msra.mxu1 %v4491_v22 }
0x13e1   :  { %4213 = vmatprep.subr.bf16.mxu1 %v4687_v28 }
0x13e4   :  { %4214 = vmatpush3.bf16.msra.mxu1 %v4492_v56 }
0x13e5   :  { %4215 = vmatprep.subr.bf16.mxu1 %v4687_v28 }
0x13e8   :  { %4216 = vmatpush3.bf16.msra.mxu1 %v4493_v24 }
0x13e9   :  { %4217 = vmatprep.subr.bf16.mxu1 %v4687_v28 }
0x13ec   :  { %4218 = vmatpush3.bf16.msra.mxu1 %v4494_v38 }
0x13ed   :  { %4219 = vmatprep.subr.bf16.mxu1 %v4687_v28 }
0x13f0   :  { %4220 = vmatpush3.bf16.msra.mxu1 %v4495_v40 }
0x13f1   :  { %4221 = vmatprep.subr.bf16.mxu1 %v4687_v28 }
0x13f4   :  { %4222 = vmatpush3.bf16.msra.mxu1 %v4496_v57 }
0x13f5   :  { %4223 = vmatprep.subr.bf16.mxu1 %v4687_v28 }
0x13f8   :  { %4224 = vmatpush3.bf16.msra.mxu1 %v4497_v25 }
0x13f9   :  { %4235 = vmatprep.subr.bf16.mxu1 %v4687_v28 }
0x149b   :  { %v2576_v59 = vpop.f32.mrf.mxu1 }
0x149c   :  { %v2577_v0 = vadd.f32 %v3663_v55, %v2576_v59 }
0x149d   :  { %v4187_v35 = vpop.f32.mrf.mxu1 }
0x149e   :  { %v2583_v33 = vmax.f32 %v2577_v0, 0.0 }
0x149f   :  { %v2579_v61 = vpop.f32.mrf.mxu1 }
0x14a0   :  { %v2580_v62 = vadd.f32 %v3663_v55, %v2579_v61 }
0x14a1   :  { %v4188_v63 = vpop.f32.mrf.mxu1 }
0x14a2   :  { %v2584_v1 = vmax.f32 %v2580_v62, 0.0 }
0x14a4   :  { %v2601_v2 = vpack.c.bf16 %v2584_v1, %v2583_v33 }
0x14a6   :  { %4206 = vmatmul.mubr.bf16.vlgmr.msra.gmra.mxu0 %v2601_v2 }
0x14a7   :  { %4230 = vmatpush3.bf16.xpose.msra.mxu0 %v4896_v60  ;;  %4231 = vmatprep.mubr.msk.bf16.mxu0 %vm4688_vm0, %v4687_v28 }
0x14a8   :  { %4241 = vmatprep.subr.bf16.mxu0 %v4687_v28 }
0x1566   :  { %v2684_v3 = vpop.f32.mrf.mxu0 }
0x1567   :  { %v2691_v5 = vadd.f32 %v2684_v3, %v2467_v51 }
0x1568   :  { %v4207_v6 = vpop.f32.mrf.mxu0 }
0x1569   :  { %v2697_v7 = vadd.f32 %v3680_v4, %v2691_v5 }
0x156a   :  { %v2687_v8 = vpop.f32.mrf.mxu0 }
0x156b   :  { %v2692_v9 = vadd.f32 %v2687_v8, %v2468_v52  ;;  %2699 = vadd.xlane.f32.xlu0 %v2697_v7 }
0x156c   :  { %v4208_v10 = vpop.f32.mrf.mxu0 }
0x156d   :  { %v2698_v11 = vadd.f32 %v3680_v4, %v2692_v9 }
0x156f   :  { %2701 = vadd.xlane.f32.xlu1 %v2698_v11 }
0x15f4   :  { %v2700_v60 = vpop.xlane.xlu0 %2699 }
0x15f5   :  { %v2703_v12 = vmul.f32 0.0078125, %v2700_v60 }
0x15f7   :  { %v2705_v58 = vsub.f32 %v2697_v7, %v2703_v12 }
0x15f8   :  { %v2702_v13 = vpop.xlane.xlu1 %2701 }
0x15f9   :  { %v2704_v14 = vmul.f32 0.0078125, %v2702_v13  ;;  %v2707_v15 = vmul.f32 %v2705_v58, %v2705_v58 }
0x15fb   :  { %v2706_v16 = vsub.f32 %v2698_v11, %v2704_v14  ;;  %2709 = vadd.xlane.f32.xlu0 %v2707_v15 }
0x15fd   :  { %v2708_v19 = vmul.f32 %v2706_v16, %v2706_v16 }
0x15ff   :  { %2711 = vadd.xlane.f32.xlu1 %v2708_v19 }
0x1684   :  { %v2710_v26 = vpop.xlane.xlu0 %2709 }
0x1685   :  { %v2713_v27 = vmul.f32 0.0078125, %v2710_v26 }
0x1687   :  { %v2715_v29 = vadd.f32 1e-05, %v2713_v27 }
0x1688   :  { %v2712_v23 = vpop.xlane.xlu1 %2711 }
0x1689   :  { %4602 = vrsqrt.f32 %v2715_v29  ;;  %v2714_v30 = vmul.f32 0.0078125, %v2712_v23 }
0x168b   :  { %v2716_v31 = vadd.f32 1e-05, %v2714_v30 }
0x168d   :  { %4604 = vrsqrt.f32 %v2716_v31 }
0x1696   :  { %v4603_v32 = vpop.eup %4602 }
0x1697   :  { %v2719_v36 = vmul.f32 %v4603_v32, %v2705_v58 }
0x1699   :  { %v2725_v41 = vmul.f32 %v3681_v34, %v2719_v36 }
0x169a   :  { %v4605_v43 = vpop.eup %4604 }
0x169b   :  { %v2731_v44 = vadd.f32 %v3682_v39, %v2725_v41  ;;  %v2720_v45 = vmul.f32 %v4605_v43, %v2706_v16 }
0x169d   :  { %v2726_v46 = vmul.f32 %v3681_v34, %v2720_v45  ;;  %v2733_v47 = vadd.f32 %v2731_v44, %v4991_v48 }
0x169f   :  { %v2732_v50 = vadd.f32 %v3682_v39, %v2726_v46  ;;  %v2735_v51 = vrot.slane %v2733_v47, 4 }
0x16a1   :  { %v2734_v52 = vadd.f32 %v2732_v50, %v4993_v49  ;;  %v2736_v17 = vadd.f32 %v2735_v51, %v2733_v47 }
0x16a3   :  { %v2737_v18 = vrot.slane %v2736_v17, 2  ;;  %v2741_v53 = vrot.slane %v2734_v52, 4 }
0x16a5   :  { %v2738_v54 = vadd.f32 %v2737_v18, %v2736_v17  ;;  %v2742_v55 = vadd.f32 %v2741_v53, %v2734_v52 }
0x16a7   :  { %v2739_v59 = vrot.slane %v2738_v54, 1  ;;  %v2743_v35 = vrot.slane %v2742_v55, 2 }
0x16a9   :  { %v2740_v0 = vadd.f32 %v2739_v59, %v2738_v54  ;;  %v2744_v61 = vadd.f32 %v2743_v35, %v2742_v55 }
0x16ab   :  { %v2745_v62 = vrot.slane %v2744_v61, 1  ;;  %v2747_v63 = vmul.f32 0.125, %v2740_v0 }
0x16ad   :  { %v2746_v33 = vadd.f32 %v2745_v62, %v2744_v61  ;;  %v2749_v1 = vsub.f32 %v2733_v47, %v2747_v63 }
0x16af   :  { %v2748_v2 = vmul.f32 0.125, %v2746_v33  ;;  %v2751_v3 = vmul.f32 %v2749_v1, %v2749_v1 }
0x16b1   :  { %v2750_v48 = vsub.f32 %v2734_v52, %v2748_v2  ;;  %v2753_v4 = vrot.slane %v2751_v3, 4 }
0x16b3   :  { %v2752_v5 = vmul.f32 %v2750_v48, %v2750_v48  ;;  %v2754_v6 = vadd.f32 %v2753_v4, %v2751_v3 }
0x16b5   :  { %v2755_v49 = vrot.slane %v2754_v6, 2  ;;  %v2759_v7 = vrot.slane %v2752_v5, 4 }
0x16b7   :  { %v2756_v8 = vadd.f32 %v2755_v49, %v2754_v6  ;;  %v2760_v9 = vadd.f32 %v2759_v7, %v2752_v5 }
0x16b9   :  { %v2757_v10 = vrot.slane %v2756_v8, 1  ;;  %v2761_v11 = vrot.slane %v2760_v9, 2 }
0x16bb   :  { %v2758_v60 = vadd.f32 %v2757_v10, %v2756_v8  ;;  %v2762_v12 = vadd.f32 %v2761_v11, %v2760_v9 }
0x16bd   :  { %v2763_v58 = vrot.slane %v2762_v12, 1  ;;  %v2765_v13 = vmul.f32 0.125, %v2758_v60 }
0x16bf   :  { %v2764_v14 = vadd.f32 %v2763_v58, %v2762_v12  ;;  %v2767_v15 = vadd.f32 1e-05, %v2765_v13 }
0x16c1   :  { %v2766_v16 = vmul.f32 0.125, %v2764_v14  ;;  %4606 = vrsqrt.f32 %v2767_v15 }
0x16c3   :  { %v2768_v19 = vadd.f32 1e-05, %v2766_v16  ;;  %v4498_v16 = vld [vmem:[#allocation2 + $0x250] ss:$40 sps:$4 sm:$0xff]  }
0x16c5   :  { %4608 = vrsqrt.f32 %v2768_v19 }
0x16ce   :  { %v4607_v20 = vpop.eup %4606 }
0x16cf   :  { %v2771_v22 = vmul.f32 %v4607_v20, %v2749_v1 }
0x16d1   :  { %v5081_v38 = vmax.f32 %v2771_v22, 0.0 }
0x16d2   :  { %v4609_v56 = vpop.eup %4608 }
0x16d3   :  { %v2772_v24 = vmul.f32 %v4609_v56, %v2750_v48  ;;  %v4499_v56 = vld [vmem:[#allocation2 + $0x200] ss:$40 sps:$4 sm:$0xff]  }
0x16d5   :  { %v5083_v40 = vmax.f32 %v2772_v24, 0.0 }
0x16d7   :  { %v2791_v57 = vpack.c.bf16 %v5083_v40, %v5081_v38 }
0x16d9   :  { %4226 = vmatmul.mubr.bf16.vlgmr.msra.gmra.mxu1 %v2791_v57  ;;  %v4500_v57 = vld [vmem:[#allocation2 + $0x1b0] ss:$40 sps:$4 sm:$0xff]  }
0x16da   :  { %4236 = vmatpush3.bf16.xpose.msra.mxu1 %v4908_v21  ;;  %4237 = vmatprep.mubr.msk.bf16.mxu1 %vm4688_vm0, %v4687_v28 }
0x16db   :  { %4247 = vmatprep.subr.bf16.mxu1 %v4687_v28 }
0x1799   :  { %v2874_v25 = vpop.f32.mrf.mxu1 }
0x179a   :  { %v2881_v26 = vmul.f32 %v2874_v25, %v2874_v25 }
0x179b   :  { %v4227_v27 = vpop.f32.mrf.mxu1 }
0x179c   :  { %2883 = vadd.xlane.f32.xlu0 %v2881_v26  ;;  %v4502_v26 = vld [vmem:[#allocation2 + $0x110] ss:$40 sps:$4 sm:$0xff]   ;;  %v4503_v27 = vld [vmem:[#allocation2 + $0xc0] ss:$40 sps:$4 sm:$0xff]  }
0x179d   :  { %v2877_v29 = vpop.f32.mrf.mxu1 }
0x179e   :  { %v2882_v23 = vmul.f32 %v2877_v29, %v2877_v29 }
0x179f   :  { %v4228_v30 = vpop.f32.mrf.mxu1 }
0x17a0   :  { %2885 = vadd.xlane.f32.xlu1 %v2882_v23  ;;  %v4505_v23 = vld [vmem:[#allocation2 + $0x20] ss:$40 sps:$4 sm:$0xff]   ;;  %v4506_v30 = vld [vmem:[#allocation2 + $0x254] ss:$40 sps:$4 sm:$0xff]  }
0x1825   :  { %v2884_v31 = vpop.xlane.xlu0 %2883 }
0x1826   :  { %v2887_v32 = vmax.f32 %v2884_v31, 1e-24  ;;  %v4507_v31 = vld [vmem:[#allocation2 + $0x204] ss:$40 sps:$4 sm:$0xff]  }
0x1828   :  { %4610 = vrsqrt.f32 %v2887_v32  ;;  %v4508_v32 = vld [vmem:[#allocation2 + $0x1b4] ss:$40 sps:$4 sm:$0xff]  }
0x1829   :  { %v2886_v34 = vpop.xlane.xlu1 %2885 }
0x182a   :  { %v2888_v36 = vmax.f32 %v2886_v34, 1e-24  ;;  %v4509_v34 = vld [vmem:[#allocation2 + $0x164] ss:$40 sps:$4 sm:$0xff]  }
0x182c   :  { %4612 = vrsqrt.f32 %v2888_v36  ;;  %v4510_v36 = vld [vmem:[#allocation2 + $0x114] ss:$40 sps:$4 sm:$0xff]  }
0x1835   :  { %v4611_v21 = vpop.eup %4610 }
0x1836   :  { %v2891_v39 = vmul.f32 %v4611_v21, %v2874_v25  ;;  %v4501_v25 = vld [vmem:[#allocation2 + $0x160] ss:$40 sps:$4 sm:$0xff]   ;;  %v4511_v21 = vld [vmem:[#allocation2 + $0xc4] ss:$40 sps:$4 sm:$0xff]  }
0x1838   :  { %v2893_v41 = vpack.c.bf16 %v2891_v39, %v2891_v39 }
0x1839   :  { %v4613_v43 = vpop.eup %4612 }
0x183a   :  { %4232 = vmatmul.mubr.bf16.vlgmr.msra.gmra.mxu0 %v2893_v41  ;;  %v2892_v44 = vmul.f32 %v4613_v43, %v2877_v29  ;;  %v4504_v29 = vld [vmem:[#allocation2 + $0x70] ss:$40 sps:$4 sm:$0xff]  }
0x183b   :  { %4242 = vmatpush3.bf16.msra.mxu0 %v4804_v37  ;;  %4243 = vmatprep.mubr.msk.bf16.mxu0 %vm4688_vm0, %v4687_v28 }
0x183c   :  { %v2894_v45 = vpack.c.bf16 %v2892_v44, %v2892_v44  ;;  %4253 = vmatprep.subr.bf16.mxu0 %v4687_v28 }
0x183e   :  { %4238 = vmatmul.mubr.bf16.vlgmr.msra.gmra.mxu1 %v2894_v45 }
0x183f   :  { %4248 = vmatpush3.bf16.msra.mxu1 %v4810_v42  ;;  %4249 = vmatprep.mubr.msk.bf16.mxu1 %vm4688_vm0, %v4687_v28 }
0x1840   :  { %4273 = vmatprep.subr.bf16.mxu1 %v4687_v28 }
0x18fa   :  { %v2929_v46 = vpop.f32.mrf.mxu0 }
0x18fb   :  { %v2975_v47 = vmul.f32 1.442695, %v2929_v46 }
0x18fc   :  { %v4233_v50 = vpop.f32.mrf.mxu0 }
0x18fd   :  { %4614 = vpow2.f32 %v2975_v47 }
0x18fe   :  { %v2932_v51 = vpop.f32.mrf.mxu0  ;;  %v2969_v37 = vpop.f32.mrf.mxu1 }
0x18ff   :  { %v2977_v52 = vmul.f32 1.442695, %v2969_v37 }
0x1900   :  { %v4234_v17 = vpop.f32.mrf.mxu0  ;;  %v4239_v18 = vpop.f32.mrf.mxu1 }
0x1901   :  { %4616 = vpow2.f32 %v2977_v52  ;;  %v4512_v17 = vld [vmem:[#allocation2 + $0x74] ss:$40 sps:$4 sm:$0xff]   ;;  %v4513_v18 = vld [vmem:[#allocation2 + $0x24] ss:$40 sps:$4 sm:$0xff]  }
0x1902   :  { %v2972_v53 = vpop.f32.mrf.mxu1 }
0x1903   :  { %v4514_v53 = vld [vmem:[#allocation4 + $0x74] ss:$8 sps:$4 sm:$0xff]  }
0x1904   :  { %v4240_v54 = vpop.f32.mrf.mxu1 }
0x1905   :  { %v4515_v54 = vld [vmem:[#allocation4 + $0x64] ss:$8 sps:$4 sm:$0xff]  }
0x190a   :  { %v4615_v55 = vpop.eup %4614 }
0x190b   :  { %v2979_v42 = vsel %vm1339_vm3, %v4615_v55, 0.0 }
0x190c   :  { %2980 = vadd.xlane.f32.xlu0 %v2979_v42  ;;  %v4517_v42 = vld [vmem:[#allocation4 + $0x44] ss:$8 sps:$4 sm:$0xff]  }
0x190e   :  { %v4617_v59 = vpop.eup %4616 }
0x190f   :  { %v2982_v35 = vsel %vm1339_vm3, %v4617_v59, 0.0 }
0x1910   :  { %2983 = vadd.xlane.f32.xlu1 %v2982_v35 }
0x1995   :  { %v2981_v0 = vpop.xlane.xlu0 %2980 }
0x1996   :  { %4618 = vrcp.f32 %v2981_v0 }
0x1999   :  { %v2984_v61 = vpop.xlane.xlu1 %2983 }
0x199a   :  { %4620 = vrcp.f32 %v2984_v61 }
0x19a3   :  { %v4619_v62 = vpop.eup %4618 }
0x19a4   :  { %v2987_v63 = vmul.f32 %v4619_v62, %v4615_v55  ;;  %v4516_v55 = vld [vmem:[#allocation4 + $0x54] ss:$8 sps:$4 sm:$0xff]  }
0x19a6   :  { %v2989_v33 = vsel %vm1339_vm3, %v2987_v63, 0.0 }
0x19a7   :  { %v4621_v1 = vpop.eup %4620  ;;  %v2990_v2 = vrot.slane %v2989_v33, 4 }
0x19a8   :  { %v2988_v3 = vmul.f32 %v4621_v1, %v4617_v59  ;;  %v4518_v59 = vld [vmem:[#allocation4 + $0x34] ss:$8 sps:$4 sm:$0xff]  }
0x19a9   :  { %v2991_v48 = vadd.f32 %v2990_v2, %v2989_v33  ;;  %v4519_v2 = vld [vmem:[#allocation4 + $0x24] ss:$8 sps:$4 sm:$0xff]  }
0x19aa   :  { %v2996_v4 = vsel %vm1339_vm3, %v2988_v3, 0.0 }
0x19ab   :  { %v2992_v5 = vrot.slane %v2991_v48, 2  ;;  %v2997_v6 = vrot.slane %v2996_v4, 4 }
0x19ad   :  { %v2993_v49 = vadd.f32 %v2992_v5, %v2991_v48  ;;  %v2998_v7 = vadd.f32 %v2997_v6, %v2996_v4  ;;  %v4521_v48 = vld [vmem:[#allocation4 + $0x4] ss:$8 sps:$4 sm:$0xff]  }
0x19ae   :  { %v3701_v4 = vld [vmem:[%s5159_s4 + $0x4] ss:$0 sm:$0xff] }
0x19af   :  { %v2994_v8 = vrot.slane %v2993_v49, 1  ;;  %v2999_v9 = vrot.slane %v2998_v7, 2 }
0x19b1   :  { %v2995_v10 = vadd.f32 %v2994_v8, %v2993_v49  ;;  %v3000_v11 = vadd.f32 %v2999_v9, %v2998_v7 }
0x19b3   :  { %v3003_v60 = vadd.f32 1e-09, %v2995_v10  ;;  %v3001_v12 = vrot.slane %v3000_v11, 1 }
0x19b5   :  { %4622 = vrcp.f32 %v3003_v60  ;;  %v3002_v58 = vadd.f32 %v3001_v12, %v3000_v11 }
0x19b7   :  { %v3004_v13 = vadd.f32 1e-09, %v3002_v58 }
0x19b9   :  { %4624 = vrcp.f32 %v3004_v13 }
0x19c2   :  { %v4623_v14 = vpop.eup %4622 }
0x19c3   :  { %v3007_v15 = vmul.f32 %v4623_v14, %v2987_v63 }
0x19c5   :  { %v3009_v19 = vpack.c.bf16 %v3007_v15, %v3007_v15 }
0x19c6   :  { %v4625_v20 = vpop.eup %4624 }
0x19c7   :  { %4244 = vmatmul.mubr.msk.bf16.vlgmr.msra.gmra.mxu0 %vm1339_vm3, %v3009_v19  ;;  %v3008_v22 = vmul.f32 %v4625_v20, %v2988_v3  ;;  %v4520_v3 = vld [vmem:[#allocation4 + $0x14] ss:$8 sps:$4 sm:$0xff]  }
0x19c8   :  { %4254 = vmatpush3.bf16.msra.mxu0 %v4498_v16  ;;  %4269 = vmatprep.mubr.msk.bf16.mxu0 %vm4688_vm0, %v4687_v28 }
0x19c9   :  { %v3010_v24 = vpack.c.bf16 %v3008_v22, %v3008_v22  ;;  %4255 = vmatprep.subr.bf16.mxu0 %v4687_v28 }
0x19cb   :  { %4250 = vmatmul.mubr.msk.bf16.vlgmr.msra.gmra.mxu1 %vm1339_vm3, %v3010_v24 }
0x19cc   :  { %4256 = vmatpush3.bf16.msra.mxu0 %v4499_v56  ;;  %4289 = vmatprep.mubr.msk.bf16.mxu1 %vm4688_vm0, %v4687_v28 }
0x19cd   :  { %4257 = vmatprep.subr.bf16.mxu0 %v4687_v28  ;;  %4274 = vmatpush3.bf16.msra.mxu1 %v4506_v30 }
0x19ce   :  { %4275 = vmatprep.subr.bf16.mxu1 %v4687_v28 }
0x19d0   :  { %4258 = vmatpush3.bf16.msra.mxu0 %v4500_v57 }
0x19d1   :  { %4259 = vmatprep.subr.bf16.mxu0 %v4687_v28  ;;  %4276 = vmatpush3.bf16.msra.mxu1 %v4507_v31 }
0x19d2   :  { %4277 = vmatprep.subr.bf16.mxu1 %v4687_v28 }
0x19d4   :  { %4260 = vmatpush3.bf16.msra.mxu0 %v4501_v25 }
0x19d5   :  { %4261 = vmatprep.subr.bf16.mxu0 %v4687_v28  ;;  %4278 = vmatpush3.bf16.msra.mxu1 %v4508_v32 }
0x19d6   :  { %4279 = vmatprep.subr.bf16.mxu1 %v4687_v28 }
0x19d8   :  { %4262 = vmatpush3.bf16.msra.mxu0 %v4502_v26 }
0x19d9   :  { %4263 = vmatprep.subr.bf16.mxu0 %v4687_v28  ;;  %4280 = vmatpush3.bf16.msra.mxu1 %v4509_v34 }
0x19da   :  { %4281 = vmatprep.subr.bf16.mxu1 %v4687_v28 }
0x19dc   :  { %4264 = vmatpush3.bf16.msra.mxu0 %v4503_v27 }
0x19dd   :  { %4265 = vmatprep.subr.bf16.mxu0 %v4687_v28  ;;  %4282 = vmatpush3.bf16.msra.mxu1 %v4510_v36 }
0x19de   :  { %4283 = vmatprep.subr.bf16.mxu1 %v4687_v28 }
0x19e0   :  { %4266 = vmatpush3.bf16.msra.mxu0 %v4504_v29 }
0x19e1   :  { %4267 = vmatprep.subr.bf16.mxu0 %v4687_v28  ;;  %4284 = vmatpush3.bf16.msra.mxu1 %v4511_v21 }
0x19e2   :  { %4285 = vmatprep.subr.bf16.mxu1 %v4687_v28 }
0x19e4   :  { %4268 = vmatpush3.bf16.msra.mxu0 %v4505_v23 }
0x19e5   :  { %4293 = vmatprep.subr.bf16.mxu0 %v4687_v28  ;;  %4286 = vmatpush3.bf16.msra.mxu1 %v4512_v17 }
0x19e6   :  { %4287 = vmatprep.subr.bf16.mxu1 %v4687_v28 }
0x19e9   :  { %4288 = vmatpush3.bf16.msra.mxu1 %v4513_v18 }
0x1a87   :  { %v3048_v39 = vpop.f32.mrf.mxu0 }
0x1a88   :  { %v3097_v45 = vsub.f32 %v5081_v38, %v3048_v39  ;;  %v3719_v39 = vld [vmem:[%s5159_s4 + $0x6] ss:$0 sm:$0xff] }
0x1a89   :  { %v4245_v41 = vpop.f32.mrf.mxu0 }
0x1a8b   :  { %v3051_v43 = vpop.f32.mrf.mxu0  ;;  %v3091_v44 = vpop.f32.mrf.mxu1 }
0x1a8c   :  { %v3098_v46 = vsub.f32 %v5083_v40, %v3091_v44  ;;  %v3720_v43 = vld [vmem:[%s5159_s4 + $0x7] ss:$0 sm:$0xff] }
0x1a8d   :  { %v4246_v47 = vpop.f32.mrf.mxu0  ;;  %v4251_v50 = vpop.f32.mrf.mxu1 }
0x1a8e   :  { %v3115_v51 = vpack.c.bf16 %v3098_v46, %v3097_v45 }
0x1a8f   :  { %v3094_v37 = vpop.f32.mrf.mxu1 }
0x1a90   :  { %4270 = vmatmul.mubr.bf16.vlgmr.msra.gmra.mxu0 %v3115_v51 }
0x1a91   :  { %v4252_v52 = vpop.f32.mrf.mxu1  ;;  %4309 = vmatprep.mubr.msk.bf16.mxu0 %vm4688_vm0, %v4687_v28  ;;  %4294 = vmatpush3.bf16.msra.mxu0 %v4514_v53 }
0x1a92   :  { %4295 = vmatprep.subr.bf16.mxu0 %v4687_v28 }
0x1a95   :  { %4296 = vmatpush3.bf16.msra.mxu0 %v4515_v54 }
0x1a96   :  { %4297 = vmatprep.subr.bf16.mxu0 %v4687_v28 }
0x1a99   :  { %4298 = vmatpush3.bf16.msra.mxu0 %v4516_v55 }
0x1a9a   :  { %4299 = vmatprep.subr.bf16.mxu0 %v4687_v28 }
0x1a9d   :  { %4300 = vmatpush3.bf16.msra.mxu0 %v4517_v42 }
0x1a9e   :  { %4301 = vmatprep.subr.bf16.mxu0 %v4687_v28 }
0x1aa1   :  { %4302 = vmatpush3.bf16.msra.mxu0 %v4518_v59 }
0x1aa2   :  { %4303 = vmatprep.subr.bf16.mxu0 %v4687_v28 }
0x1aa5   :  { %4304 = vmatpush3.bf16.msra.mxu0 %v4519_v2 }
0x1aa6   :  { %4305 = vmatprep.subr.bf16.mxu0 %v4687_v28 }
0x1aa9   :  { %4306 = vmatpush3.bf16.msra.mxu0 %v4520_v3 }
0x1aaa   :  { %4307 = vmatprep.subr.bf16.mxu0 %v4687_v28  ;;  %v3718_v28 = vld [vmem:[%s5159_s4 + $0x5] ss:$0 sm:$0xff] }
0x1aad   :  { %4308 = vmatpush3.bf16.msra.mxu0 %v4521_v48 }
0x1b50   :  { %v3198_v35 = vpop.f32.mrf.mxu0 }
0x1b51   :  { %v3205_v62 = vmax.f32 %v3198_v35, 0.0 }
0x1b52   :  { %v4271_v0 = vpop.f32.mrf.mxu0 }
0x1b54   :  { %v3201_v61 = vpop.f32.mrf.mxu0 }
0x1b55   :  { %v3206_v63 = vmax.f32 %v3201_v61, 0.0 }
0x1b56   :  { %v4272_v33 = vpop.f32.mrf.mxu0 }
0x1b57   :  { %v3227_v1 = vpack.c.bf16 %v3206_v63, %v3205_v62 }
0x1b59   :  { %4290 = vmatmul.mubr.bf16.vlgmr.msra.gmra.mxu1 %v3227_v1 }
0x1c19   :  { %v3314_v5 = vpop.f32.mrf.mxu1 }
0x1c1a   :  { %v3315_v49 = vadd.f32 %v3701_v4, %v3314_v5 }
0x1c1b   :  { %v4291_v6 = vpop.f32.mrf.mxu1 }
0x1c1c   :  { %v3321_v10 = vmax.f32 %v3315_v49, 0.0 }
0x1c1d   :  { %v3317_v7 = vpop.f32.mrf.mxu1 }
0x1c1e   :  { %v3318_v8 = vadd.f32 %v3701_v4, %v3317_v7 }
0x1c1f   :  { %v4292_v9 = vpop.f32.mrf.mxu1 }
0x1c20   :  { %v3322_v11 = vmax.f32 %v3318_v8, 0.0 }
0x1c22   :  { %v3339_v60 = vpack.c.bf16 %v3322_v11, %v3321_v10 }
0x1c24   :  { %4310 = vmatmul.mubr.bf16.vlgmr.msra.gmra.mxu0 %v3339_v60 }
0x1ce4   :  { %v3422_v12 = vpop.f32.mrf.mxu0 }
0x1ce5   :  { %v3429_v58 = vadd.f32 %v3422_v12, %v3205_v62 }
0x1ce6   :  { %v4311_v13 = vpop.f32.mrf.mxu0 }
0x1ce7   :  { %v3435_v14 = vadd.f32 %v3718_v28, %v3429_v58 }
0x1ce8   :  { %v3425_v15 = vpop.f32.mrf.mxu0 }
0x1ce9   :  { %v3430_v16 = vadd.f32 %v3425_v15, %v3206_v63  ;;  %3437 = vadd.xlane.f32.xlu0 %v3435_v14 }
0x1cea   :  { %v4312_v19 = vpop.f32.mrf.mxu0 }
0x1ceb   :  { %v3436_v20 = vadd.f32 %v3718_v28, %v3430_v16 }
0x1ced   :  { %3439 = vadd.xlane.f32.xlu1 %v3436_v20 }
0x1d72   :  { %v3438_v22 = vpop.xlane.xlu0 %3437 }
0x1d73   :  { %v3441_v56 = vmul.f32 0.0078125, %v3438_v22 }
0x1d75   :  { %v3443_v24 = vsub.f32 %v3435_v14, %v3441_v56 }
0x1d76   :  { %v3440_v57 = vpop.xlane.xlu1 %3439 }
0x1d77   :  { %v3442_v25 = vmul.f32 0.0078125, %v3440_v57  ;;  %v3445_v26 = vmul.f32 %v3443_v24, %v3443_v24 }
0x1d79   :  { %v3444_v27 = vsub.f32 %v3436_v20, %v3442_v25  ;;  %3447 = vadd.xlane.f32.xlu0 %v3445_v26 }
0x1d7b   :  { %v3446_v29 = vmul.f32 %v3444_v27, %v3444_v27 }
0x1d7d   :  { %3449 = vadd.xlane.f32.xlu1 %v3446_v29 }
0x1e02   :  { %v3448_v23 = vpop.xlane.xlu0 %3447 }
0x1e03   :  { %v3451_v30 = vmul.f32 0.0078125, %v3448_v23 }
0x1e05   :  { %v3453_v31 = vadd.f32 1e-05, %v3451_v30 }
0x1e06   :  { %v3450_v32 = vpop.xlane.xlu1 %3449 }
0x1e07   :  { %4626 = vrsqrt.f32 %v3453_v31  ;;  %v3452_v34 = vmul.f32 0.0078125, %v3450_v32 }
0x1e09   :  { %v3454_v36 = vadd.f32 1e-05, %v3452_v34 }
0x1e0b   :  { %4628 = vrsqrt.f32 %v3454_v36 }
0x1e14   :  { %v4627_v21 = vpop.eup %4626 }
0x1e15   :  { %v3457_v41 = vmul.f32 %v4627_v21, %v3443_v24 }
0x1e17   :  { %v3463_v44 = vmul.f32 %v3719_v39, %v3457_v41 }
0x1e18   :  { %v4629_v45 = vpop.eup %4628 }
0x1e19   :  { %v3469_v46 = vadd.f32 %v3720_v43, %v3463_v44  ;;  %v3458_v47 = vmul.f32 %v4629_v45, %v3444_v27 }
0x1e1b   :  { %v3471_v50 = vadd.f32 %v3469_v46, %v5081_v38  ;;  %v3464_v51 = vmul.f32 %v3719_v39, %v3458_v47 }
0x1e1d   :  { %v3473_v37 = vrot.slane %v3471_v50, 4  ;;  %v3470_v52 = vadd.f32 %v3720_v43, %v3464_v51 }
0x1e1f   :  { %v3474_v17 = vadd.f32 %v3473_v37, %v3471_v50  ;;  %v3472_v18 = vadd.f32 %v3470_v52, %v5083_v40 }
0x1e21   :  { %v3475_v53 = vrot.slane %v3474_v17, 2  ;;  %v3479_v54 = vrot.slane %v3472_v18, 4 }
0x1e23   :  { %v3476_v55 = vadd.f32 %v3475_v53, %v3474_v17  ;;  %v3480_v42 = vadd.f32 %v3479_v54, %v3472_v18 }
0x1e25   :  { %v3477_v59 = vrot.slane %v3476_v55, 1  ;;  %v3481_v35 = vrot.slane %v3480_v42, 2 }
0x1e27   :  { %v3478_v0 = vadd.f32 %v3477_v59, %v3476_v55  ;;  %v3482_v61 = vadd.f32 %v3481_v35, %v3480_v42 }
0x1e29   :  { %v3485_v62 = vmul.f32 0.125, %v3478_v0  ;;  %v3483_v63 = vrot.slane %v3482_v61, 1 }
0x1e2b   :  { %v3487_v33 = vsub.f32 %v3471_v50, %v3485_v62  ;;  %v3484_v1 = vadd.f32 %v3483_v63, %v3482_v61 }
0x1e2d   :  { %v3489_v2 = vmul.f32 %v3487_v33, %v3487_v33  ;;  %v3486_v38 = vmul.f32 0.125, %v3484_v1 }
0x1e2f   :  { %v3491_v3 = vrot.slane %v3489_v2, 4  ;;  %v3488_v48 = vsub.f32 %v3472_v18, %v3486_v38 }
0x1e31   :  { %v3492_v4 = vadd.f32 %v3491_v3, %v3489_v2  ;;  %v3490_v5 = vmul.f32 %v3488_v48, %v3488_v48 }
0x1e33   :  { %v3493_v6 = vrot.slane %v3492_v4, 2  ;;  %v3497_v40 = vrot.slane %v3490_v5, 4 }
0x1e35   :  { %v3494_v49 = vadd.f32 %v3493_v6, %v3492_v4  ;;  %v3498_v7 = vadd.f32 %v3497_v40, %v3490_v5 }
0x1e37   :  { %v3495_v8 = vrot.slane %v3494_v49, 1  ;;  %v3499_v9 = vrot.slane %v3498_v7, 2 }
0x1e39   :  { %v3496_v10 = vadd.f32 %v3495_v8, %v3494_v49  ;;  %v3500_v11 = vadd.f32 %v3499_v9, %v3498_v7 }
0x1e3b   :  { %v3503_v60 = vmul.f32 0.125, %v3496_v10  ;;  %v3501_v12 = vrot.slane %v3500_v11, 1 }
0x1e3d   :  { %v3505_v28 = vadd.f32 1e-05, %v3503_v60  ;;  %v3502_v58 = vadd.f32 %v3501_v12, %v3500_v11 }
0x1e3f   :  { %4630 = vrsqrt.f32 %v3505_v28  ;;  %v3504_v13 = vmul.f32 0.125, %v3502_v58 }
0x1e41   :  { %v3506_v14 = vadd.f32 1e-05, %v3504_v13 }
0x1e43   :  { %4632 = vrsqrt.f32 %v3506_v14 }
0x1e4c   :  { %v4631_v15 = vpop.eup %4630 }
0x1e4d   :  { %v3509_v16 = vmul.f32 %v4631_v15, %v3487_v33 }
0x1e4f   :  { %v3511_v19 = vmax.f32 %v3509_v16, 0.0 }
0x1e50   :  { %v4633_v20 = vpop.eup %4632 }
0x1e51   :  { %3513 = vst [vmem:[%s5160_s5] sm:$0xff] %v3511_v19  ;;  %v3510_v22 = vmul.f32 %v4633_v20, %v3488_v48 }
0x1e53   :  { %v3512_v56 = vmax.f32 %v3510_v22, 0.0 }
0x1e55   :  { %3514 = vst [vmem:[%s5160_s5 + $0x8] sm:$0xff] %v3512_v56 }
0x1e56   :  { %3519 = vsyncpa [#allocation3], 1 }
0x1e57   :  { %3520 = vsyncpa [#allocation5], 1 }

</bundles_post_ra>
